<compile_context>
chip_gen: v6e
topology: v6e:2x2x1
jax: 0.10.0
libtpu: 0.0.40
codegen_flags: <defaults>
</compile_context>

<pallas_src>
import functools

import numpy as np
import jax
import jax.numpy as jnp
from jax.experimental import pallas as pl
from jax.experimental.pallas import tpu as pltpu

HID = 64          # LSTM hidden size
NCLS = 13         # number of output classes
FC1 = 128         # fc1 width
OUTP = 128        # lane-padded output width (classes padded 13 -> 128)
EPS = 1e-5        # BatchNorm eps
NEG = -1e9        # logit bias for padded (fake) classes -> exp() == 0
C1, C2 = 32, 64   # conv channel widths


def _convlstm12_kernel(
    x1_ref,                                   # (T*Bp, 36) bf16, im2col'd input
    mask_ref,                                 # (T*Bp, 1)  f32, 1 for real batch rows
    w1_ref, g1_ref, be1_ref,                  # conv1 (36,32) bf16, bn1 (1,32) f32
    w2_ref, g2_ref, be2_ref,                  # conv2 (96,64) bf16, bn2 (1,64) f32
    wl0_ref, bl0_ref,                         # LSTM L0: (128,256) bf16, (1,256) f32
    wl1_ref, bl1_ref,                         # LSTM L1
    wfc1_ref, bfc1_ref,                       # (64,128) bf16, (1,128) f32
    wfc2_ref, bfc2_ref,                       # (128,128) bf16 (cols>=13 zero), (1,128) f32
    out_ref,                                  # (Bp, 128) f32
    x2_ref,                                   # VMEM (T*Bp, 96) f32: conv2 im2col operand
    pooled_ref,                               # VMEM (Tp*Bp, 64) f32: maxpooled sequence
    *, B, Bp, T):
  f32 = jnp.float32
  bf16 = jnp.bfloat16
  Tp = T // 2
  TB = T * Bp
  inv_n = 1.0 / float(T * B)                  # BN divisor = count of *real* rows
  n_pad = float(T * (Bp - B))                 # number of (all-zero) padded rows

  # ---- conv1: single im2col'd matmul, K = 3*12 = 36 (bias folded into BN).
  acc = jnp.dot(x1_ref[...], w1_ref[...], preferred_element_type=f32)  # (TB, 32)

  # ---- bn1 (training-mode batch stats) + relu, folded to scale/shift.
  # Padded rows of `acc` are exactly zero, so sums with divisor T*B give the
  # real-batch statistics.  Two-pass variance; the padded rows contribute
  # exactly n_pad * m^2 to sum((acc-m)^2), which we subtract back out.
  m1 = jnp.sum(acc, axis=0, keepdims=True) * inv_n
  d1 = acc - m1
  v1 = (jnp.sum(d1 * d1, axis=0, keepdims=True) - n_pad * (m1 * m1)) * inv_n
  s1 = g1_ref[...] * jax.lax.rsqrt(v1 + EPS)
  h1 = jnp.maximum(acc * s1 + (be1_ref[...] - m1 * s1), 0.0)            # (TB, 32)
  # Re-zero padded batch rows (BN shift made them nonzero) so conv2's padded
  # rows stay exactly zero and bn2's sum-based stats remain exact.
  h1 = h1 * mask_ref[...]

  # ---- conv2 im2col operand assembled directly in a VMEM scratch:
  #   x2[t, 0:32]  = h1[t-1]   (zero at t = 0)
  #   x2[t, 32:64] = h1[t]
  #   x2[t, 64:96] = h1[t+1]   (zero at t = T-1)
  # All stores are 8-row / static-offset aligned; no in-kernel concatenate.
  zblk = jnp.zeros((Bp, C1), f32)
  x2_ref[0:Bp, 0:C1] = zblk
  x2_ref[(T - 1) * Bp:TB, 2 * C1:3 * C1] = zblk
  x2_ref[Bp:TB, 0:C1] = h1[0:(T - 1) * Bp, :]
  x2_ref[0:TB, C1:2 * C1] = h1
  x2_ref[0:(T - 1) * Bp, 2 * C1:3 * C1] = h1[Bp:TB, :]

  # single im2col'd matmul, K = 3*32 = 96 (cast once at load).
  acc2 = jnp.dot(x2_ref[...].astype(bf16), w2_ref[...],
                 preferred_element_type=f32)                            # (TB, 64)

  # ---- bn2 + relu (same folding / correction; padded rows of acc2 are zero).
  m2 = jnp.sum(acc2, axis=0, keepdims=True) * inv_n
  d2 = acc2 - m2
  v2 = (jnp.sum(d2 * d2, axis=0, keepdims=True) - n_pad * (m2 * m2)) * inv_n
  s2 = g2_ref[...] * jax.lax.rsqrt(v2 + EPS)
  h2 = jnp.maximum(acc2 * s2 + (be2_ref[...] - m2 * s2), 0.0)           # (TB, 64)

  # ---- maxpool(k=2) over time, precomputed once (static aligned slices).
  for j in range(Tp):
    a = h2[(2 * j) * Bp:(2 * j + 1) * Bp, :]
    b = h2[(2 * j + 1) * Bp:(2 * j + 2) * Bp, :]
    pooled_ref[j * Bp:(j + 1) * Bp, :] = jnp.maximum(a, b)

  # ---- 2-layer LSTM.  One fused (Bp,128)x(128,256) matmul per step on
  # [x_t | h_{t-1}]; all four gates from a single whole-vreg tanh
  # (sigmoid(x) = 0.5*(1+tanh(x/2)), the 1/2 pre-folded into i/f/o columns).
  # The two layers are interleaved in one fully-unrolled loop so layer-1 step
  # t overlaps layer-0 step t+1 in the scheduler.
  def lstm_step(x_f32, h, c, w_ref, b_ref):
    xin = jnp.concatenate([x_f32, h], axis=1).astype(bf16)      # (Bp, 128)
    g = jnp.dot(xin, w_ref[...], preferred_element_type=f32) + b_ref[...]
    tg = jnp.tanh(g)                                            # one EUP pass
    i_ = 0.5 * (tg[:, 0:HID] + 1.0)
    f_ = 0.5 * (tg[:, HID:2 * HID] + 1.0)
    g_ = tg[:, 2 * HID:3 * HID]
    o_ = 0.5 * (tg[:, 3 * HID:4 * HID] + 1.0)
    c = f_ * c + i_ * g_
    h = o_ * jnp.tanh(c)
    return h, c

  hA = jnp.zeros((Bp, HID), f32)
  cA = jnp.zeros((Bp, HID), f32)
  hB = jnp.zeros((Bp, HID), f32)
  cB = jnp.zeros((Bp, HID), f32)
  for t in range(Tp):                                           # fully unrolled
    x0 = pooled_ref[t * Bp:(t + 1) * Bp, :]
    hA, cA = lstm_step(x0, hA, cA, wl0_ref, bl0_ref)            # layer 0, step t
    hB, cB = lstm_step(hA, hB, cB, wl1_ref, bl1_ref)            # layer 1, step t

  # ---- fc1 -> relu -> fc2 (lane-padded to 128) -> softmax over real classes.
  y = jnp.dot(hB.astype(bf16), wfc1_ref[...], preferred_element_type=f32)
  y = jnp.maximum(y + bfc1_ref[...], 0.0)
  logits = jnp.dot(y.astype(bf16), wfc2_ref[...], preferred_element_type=f32)
  logits = logits + bfc2_ref[...]           # padded classes get -1e9 -> exp == 0
  mx = jnp.max(logits, axis=1, keepdims=True)
  e = jnp.exp(logits - mx)
  out_ref[...] = e * pl.reciprocal(jnp.sum(e, axis=1, keepdims=True), approx=True)


# ------------------------------------------------------------------ wrapper
def prepare_params(p):
  """One-time weight preprocessing (hoisted out of the per-call wrapper)."""
  bf = lambda a: a.astype(jnp.bfloat16)

  def fuse(wih, whh, bl):
    # per-gate (4, in, hid) -> stacked [x | h] weight (128, 256), columns
    # ordered [i|f|g|o].  Fold the 1/2 of sigmoid(x)=0.5*(1+tanh(x/2)) into
    # the i/f/o weight & bias columns so the kernel needs no per-step rescale.
    w = jnp.concatenate([wih, whh], axis=1)                       # (4, 128, 64)
    w = jnp.transpose(w, (1, 0, 2)).reshape(2 * HID, 4 * HID)     # (128, 256)
    b = bl.reshape(1, 4 * HID)
    sc = np.concatenate([np.full(HID, 0.5), np.full(HID, 0.5),
                         np.ones(HID), np.full(HID, 0.5)]).astype(np.float32)
    sc = jnp.asarray(sc).reshape(1, 4 * HID)
    return bf(w * sc), (b * sc).astype(jnp.float32)

  wl0, bl0 = fuse(p["wih0"], p["whh0"], p["bl0"])
  wl1, bl1 = fuse(p["wih1"], p["whh1"], p["bl1"])

  # lane-dense fc2: zero-padded weight columns, -1e9 bias for fake classes.
  wfc2p = jnp.zeros((FC1, OUTP), jnp.float32).at[:, :NCLS].set(p["wfc2"])
  bfc2p = jnp.full((1, OUTP), NEG, jnp.float32).at[:, :NCLS].set(p["bfc2"])

  return {
      # conv weights reshaped for im2col: row index = k*Cin + cin.
      # conv biases are intentionally dropped (cancel in training-mode BN).
      "w1c": bf(p["w1"].reshape(3 * 12, C1)),
      "g1": p["g1"], "be1": p["be1"],
      "w2c": bf(p["w2"].reshape(3 * C1, C2)),
      "g2": p["g2"], "be2": p["be2"],
      "wl0": wl0, "bl0": bl0, "wl1": wl1, "bl1": bl1,
      "wfc1": bf(p["wfc1"]), "bfc1": p["bfc1"],
      "wfc2": bf(wfc2p), "bfc2": bfc2p,
  }


@jax.jit
def conv_lstm12_forward(x, prep):
  """x: (B, 12, T) float32, NCL like the PyTorch module.  prep = prepare_params(...)."""
  B, cin, T = x.shape
  assert T % 2 == 0
  Bp = ((B + 7) // 8) * 8                   # pad batch to a sublane multiple
  TB = T * Bp

  # per-call input prep only: pad batch, NCL -> time-major channels-last,
  # zero-pad time, im2col the k=3 window (lane-concat of the 3 taps), flatten.
  xb = jnp.pad(x, ((0, Bp - B), (0, 0), (0, 0)))           # (Bp, Cin, T)
  xt = jnp.transpose(xb, (2, 0, 1))                        # (T, Bp, Cin)
  xpad = jnp.pad(xt, ((1, 1), (0, 0), (0, 0)))             # (T+2, Bp, Cin)
  x1 = jnp.concatenate([xpad[0:T], xpad[1:T + 1], xpad[2:T + 2]], axis=-1)
  x1 = x1.reshape(TB, 3 * cin).astype(jnp.bfloat16)        # (T*Bp, 36)

  # 0/1 mask of real batch rows (trace-time constant, folded by XLA).
  mask = jnp.asarray(
      np.tile((np.arange(Bp) < B).astype(np.float32), T).reshape(TB, 1))

  inputs = (
      x1, mask,
      prep["w1c"], prep["g1"], prep["be1"],
      prep["w2c"], prep["g2"], prep["be2"],
      prep["wl0"], prep["bl0"], prep["wl1"], prep["bl1"],
      prep["wfc1"], prep["bfc1"], prep["wfc2"], prep["bfc2"],
  )
  vspec = pl.BlockSpec(memory_space=pltpu.MemorySpace.VMEM)
  kernel = functools.partial(_convlstm12_kernel, B=B, Bp=Bp, T=T)
  # Total VMEM (inputs + scratch + output) is ~0.3 MB at B=4, T=16 -- far under
  # every generation's scoped limit.  Scale-up would need a batch/time grid
  # (and vmem_limit_bytes via pltpu.CompilerParams) before the scoped wall.
  out = pl.pallas_call(
      kernel,
      out_shape=jax.ShapeDtypeStruct((Bp, OUTP), jnp.float32),
      in_specs=[vspec] * len(inputs),
      out_specs=vspec,
      scratch_shapes=[
          pltpu.VMEM((TB, 3 * C1), jnp.float32),        # conv2 im2col operand
          pltpu.VMEM((T // 2 * Bp, C2), jnp.float32),   # maxpooled LSTM inputs
      ],
  )(*inputs)
  return out[:B, :NCLS]


# ------------------------------------------------------------------ reference
def _bn_train(y, gamma, beta):
  m = y.mean(axis=(0, 2), keepdims=True)
  v = ((y - m) ** 2).mean(axis=(0, 2), keepdims=True)
  return (gamma.reshape(1, -1, 1) * (y - m) / jnp.sqrt(v + EPS)
          + beta.reshape(1, -1, 1))


def reference_forward(x, p):
  """Pure-JAX reference with PyTorch semantics (NCL conv, batch-stat BN)."""
  B, _, T = x.shape
  w1 = jnp.transpose(p["w1"], (2, 1, 0))                 # (O, I, K)
  y = jax.lax.conv_general_dilated(x, w1, (1,), ((1, 1),),
                                   dimension_numbers=("NCH", "OIH", "NCH"))
  y = y + p["b1"].reshape(1, -1, 1)
  y = jnp.maximum(_bn_train(y, p["g1"], p["be1"]), 0.0)

  w2 = jnp.transpose(p["w2"], (2, 1, 0))
  y = jax.lax.conv_general_dilated(y, w2, (1,), ((1, 1),),
                                   dimension_numbers=("NCH", "OIH", "NCH"))
  y = y + p["b2"].reshape(1, -1, 1)
  y = jnp.maximum(_bn_train(y, p["g2"], p["be2"]), 0.0)

  C = y.shape[1]
  y = y.reshape(B, C, T // 2, 2).max(axis=3)             # MaxPool1d(2)
  seq = jnp.transpose(y, (0, 2, 1))                      # (B, Tp, C)

  def run_layer(seq, wih, whh, b):
    def step(carry, xt):
      h, c = carry
      def gate(g):
        return xt @ wih[g] + h @ whh[g] + b[g]
      i = jax.nn.sigmoid(gate(0))
      f = jax.nn.sigmoid(gate(1))
      g_ = jnp.tanh(gate(2))
      o = jax.nn.sigmoid(gate(3))
      c = f * c + i * g_
      h = o * jnp.tanh(c)
      return (h, c), h
    z = jnp.zeros((seq.shape[0], HID), jnp.float32)
    _, hs = jax.lax.scan(step, (z, z), jnp.transpose(seq, (1, 0, 2)))
    return jnp.transpose(hs, (1, 0, 2))

  seq = run_layer(seq, p["wih0"], p["whh0"], p["bl0"])
  seq = run_layer(seq, p["wih1"], p["whh1"], p["bl1"])
  h = seq[:, -1, :]
  h = jnp.maximum(h @ p["wfc1"] + p["bfc1"], 0.0)
  logits = h @ p["wfc2"] + p["bfc2"]
  return jax.nn.softmax(logits, axis=1)


# ------------------------------------------------------------------ params
def init_params(key):
  ks = jax.random.split(key, 14)

  def uni(k, shape, fan_in):
    b = 1.0 / (fan_in ** 0.5)
    return jax.random.uniform(k, shape, jnp.float32, -b, b)

  p = {}
  p["w1"] = uni(ks[0], (3, 12, 32), 12 * 3)      # (K, Cin, Cout)
  p["b1"] = uni(ks[1], (1, 32), 12 * 3)          # used by reference only
  p["g1"] = jnp.ones((1, 32), jnp.float32)
  p["be1"] = jnp.zeros((1, 32), jnp.float32)
  p["w2"] = uni(ks[2], (3, 32, 64), 32 * 3)
  p["b2"] = uni(ks[3], (1, 64), 32 * 3)          # used by reference only
  p["g2"] = jnp.ones((1, 64), jnp.float32)
  p["be2"] = jnp.zeros((1, 64), jnp.float32)
  # LSTM weights per gate (i,f,g,o), already transposed to (in, hidden);
  # bias is b_ih + b_hh combined.
  p["wih0"] = uni(ks[4], (4, HID, HID), HID)
  p["whh0"] = uni(ks[5], (4, HID, HID), HID)
  p["bl0"] = uni(ks[6], (4, HID), HID)
  p["wih1"] = uni(ks[7], (4, HID, HID), HID)
  p["whh1"] = uni(ks[8], (4, HID, HID), HID)
  p["bl1"] = uni(ks[9], (4, HID), HID)
  p["wfc1"] = uni(ks[10], (HID, FC1), HID)
  p["bfc1"] = uni(ks[11], (1, FC1), HID)
  p["wfc2"] = uni(ks[12], (FC1, NCLS), FC1)
  p["bfc2"] = uni(ks[13], (1, NCLS), FC1)
  return p


if __name__ == "__main__":
  key = jax.random.PRNGKey(0)
  pkey, xkey = jax.random.split(key)
  params = init_params(pkey)
  prep = prepare_params(params)          # one-time weight preprocessing

  B, Cin, T = 4, 12, 16
  x = jax.random.normal(xkey, (B, Cin, T), jnp.float32)

  out = jax.block_until_ready(conv_lstm12_forward(x, prep))
  ref = jax.block_until_ready(reference_forward(x, params))
  assert out.shape == (B, NCLS)
  # bf16 matmul operands (f32 accumulation) + approx softmax reciprocal ->
  # slightly looser bound than pure f32.
  max_err = float(jnp.max(jnp.abs(out - ref)))
  if max_err > 4e-3:
    raise AssertionError(f"kernel/reference mismatch: {max_err}")
  print("KERNEL_OK")
</pallas_src>

<mosaic_0001>
module attributes {stable_mosaic.version = 11 : i64} {
  func.func @_convlstm12_kernel(%arg0: memref<128x36xbf16, #tpu.memory_space<vmem>>, %arg1: memref<128x1xf32, #tpu.memory_space<vmem>>, %arg2: memref<36x32xbf16, #tpu.memory_space<vmem>>, %arg3: memref<1x32xf32, #tpu.memory_space<vmem>>, %arg4: memref<1x32xf32, #tpu.memory_space<vmem>>, %arg5: memref<96x64xbf16, #tpu.memory_space<vmem>>, %arg6: memref<1x64xf32, #tpu.memory_space<vmem>>, %arg7: memref<1x64xf32, #tpu.memory_space<vmem>>, %arg8: memref<128x256xbf16, #tpu.memory_space<vmem>>, %arg9: memref<1x256xf32, #tpu.memory_space<vmem>>, %arg10: memref<128x256xbf16, #tpu.memory_space<vmem>>, %arg11: memref<1x256xf32, #tpu.memory_space<vmem>>, %arg12: memref<64x128xbf16, #tpu.memory_space<vmem>>, %arg13: memref<1x128xf32, #tpu.memory_space<vmem>>, %arg14: memref<128x128xbf16, #tpu.memory_space<vmem>>, %arg15: memref<1x128xf32, #tpu.memory_space<vmem>>, %arg16: memref<8x128xf32, #tpu.memory_space<vmem>>, %arg17: memref<128x96xf32, #tpu.memory_space<vmem>>, %arg18: memref<64x64xf32, #tpu.memory_space<vmem>>) attributes {dimension_semantics = [], scalar_prefetch = 0 : i64, scratch_operands = 2 : i64, tpu.core_type = #tpu.core_type<tc>} {
    %c0 = arith.constant 0 : index
    %c0_0 = arith.constant 0 : index
    %0 = vector.load %arg0[%c0, %c0_0] : memref<128x36xbf16, #tpu.memory_space<vmem>>, vector<128x36xbf16>
    %c0_1 = arith.constant 0 : index
    %c0_2 = arith.constant 0 : index
    %1 = vector.load %arg2[%c0_1, %c0_2] : memref<36x32xbf16, #tpu.memory_space<vmem>>, vector<36x32xbf16>
    %cst = arith.constant dense<0.000000e+00> : vector<128x32xf32>
    %2 = tpu.matmul %0, %1, %cst {dimension_numbers = #tpu.dot_dimension_numbers<[1], [0], [0], [1], [0, 0, 1, 1], [], []>} : vector<128x36xbf16>, vector<36x32xbf16>, vector<128x32xf32> -> vector<128x32xf32>
    %cst_3 = arith.constant dense<0.000000e+00> : vector<32xf32>
    %3 = vector.multi_reduction <add>, %2, %cst_3 [0] : vector<128x32xf32> to vector<32xf32>
    %4 = vector.shape_cast %3 : vector<32xf32> to vector<1x32xf32>
    %cst_4 = arith.constant 1.562500e-02 : f32
    %5 = vector.broadcast %cst_4 : f32 to vector<1x32xf32>
    %6 = arith.mulf %4, %5 : vector<1x32xf32>
    %7 = vector.broadcast %6 : vector<1x32xf32> to vector<128x32xf32>
    %8 = arith.subf %2, %7 : vector<128x32xf32>
    %9 = arith.mulf %8, %8 : vector<128x32xf32>
    %cst_5 = arith.constant dense<0.000000e+00> : vector<32xf32>
    %10 = vector.multi_reduction <add>, %9, %cst_5 [0] : vector<128x32xf32> to vector<32xf32>
    %11 = vector.shape_cast %10 : vector<32xf32> to vector<1x32xf32>
    %12 = arith.mulf %6, %6 : vector<1x32xf32>
    %cst_6 = arith.constant 6.400000e+01 : f32
    %13 = vector.broadcast %cst_6 : f32 to vector<1x32xf32>
    %14 = arith.mulf %13, %12 : vector<1x32xf32>
    %15 = arith.subf %11, %14 : vector<1x32xf32>
    %cst_7 = arith.constant 1.562500e-02 : f32
    %16 = vector.broadcast %cst_7 : f32 to vector<1x32xf32>
    %17 = arith.mulf %15, %16 : vector<1x32xf32>
    %c0_8 = arith.constant 0 : index
    %c0_9 = arith.constant 0 : index
    %18 = vector.load %arg3[%c0_8, %c0_9] : memref<1x32xf32, #tpu.memory_space<vmem>>, vector<1x32xf32>
    %cst_10 = arith.constant 9.99999974E-6 : f32
    %19 = vector.broadcast %cst_10 : f32 to vector<1x32xf32>
    %20 = arith.addf %17, %19 : vector<1x32xf32>
    %21 = math.rsqrt %20 : vector<1x32xf32>
    %22 = arith.mulf %18, %21 : vector<1x32xf32>
    %23 = vector.broadcast %22 : vector<1x32xf32> to vector<128x32xf32>
    %24 = arith.mulf %2, %23 : vector<128x32xf32>
    %c0_11 = arith.constant 0 : index
    %c0_12 = arith.constant 0 : index
    %25 = vector.load %arg4[%c0_11, %c0_12] : memref<1x32xf32, #tpu.memory_space<vmem>>, vector<1x32xf32>
    %26 = arith.mulf %6, %22 : vector<1x32xf32>
    %27 = arith.subf %25, %26 : vector<1x32xf32>
    %28 = vector.broadcast %27 : vector<1x32xf32> to vector<128x32xf32>
    %29 = arith.addf %24, %28 : vector<128x32xf32>
    %cst_13 = arith.constant 0.000000e+00 : f32
    %30 = vector.broadcast %cst_13 : f32 to vector<128x32xf32>
    %31 = arith.maximumf %29, %30 : vector<128x32xf32>
    %c0_14 = arith.constant 0 : index
    %c0_15 = arith.constant 0 : index
    %32 = vector.load %arg1[%c0_14, %c0_15] : memref<128x1xf32, #tpu.memory_space<vmem>>, vector<128x1xf32>
    %33 = vector.broadcast %32 : vector<128x1xf32> to vector<128x32xf32>
    %34 = arith.mulf %31, %33 : vector<128x32xf32>
    %cst_16 = arith.constant 0.000000e+00 : f32
    %35 = vector.broadcast %cst_16 : f32 to vector<8x32xf32>
    %c0_17 = arith.constant 0 : index
    %c0_18 = arith.constant 0 : index
    %36 = vector.load %arg17[%c0_17, %c0_18] : memref<128x96xf32, #tpu.memory_space<vmem>>, vector<8x32xf32>
    tpu.vector_store %arg17[%c0_17, %c0_18], %35 {strides = array<i32>} : memref<128x96xf32, #tpu.memory_space<vmem>>, vector<8x32xf32>,
    %c120 = arith.constant 120 : index
    %c64 = arith.constant 64 : index
    %37 = vector.load %arg17[%c120, %c64] : memref<128x96xf32, #tpu.memory_space<vmem>>, vector<8x32xf32>
    tpu.vector_store %arg17[%c120, %c64], %35 {strides = array<i32>} : memref<128x96xf32, #tpu.memory_space<vmem>>, vector<8x32xf32>,
    %38 = vector.extract_strided_slice %34 {offsets = [0, 0], sizes = [120, 32], strides = [1, 1]} : vector<128x32xf32> to vector<120x32xf32>
    %c8 = arith.constant 8 : index
    %c0_19 = arith.constant 0 : index
    %39 = vector.load %arg17[%c8, %c0_19] : memref<128x96xf32, #tpu.memory_space<vmem>>, vector<120x32xf32>
    tpu.vector_store %arg17[%c8, %c0_19], %38 {strides = array<i32>} : memref<128x96xf32, #tpu.memory_space<vmem>>, vector<120x32xf32>,
    %c0_20 = arith.constant 0 : index
    %c32 = arith.constant 32 : index
    %40 = vector.load %arg17[%c0_20, %c32] : memref<128x96xf32, #tpu.memory_space<vmem>>, vector<128x32xf32>
    tpu.vector_store %arg17[%c0_20, %c32], %34 {strides = array<i32>} : memref<128x96xf32, #tpu.memory_space<vmem>>, vector<128x32xf32>,
    %41 = vector.extract_strided_slice %34 {offsets = [8, 0], sizes = [120, 32], strides = [1, 1]} : vector<128x32xf32> to vector<120x32xf32>
    %c0_21 = arith.constant 0 : index
    %c64_22 = arith.constant 64 : index
    %42 = vector.load %arg17[%c0_21, %c64_22] : memref<128x96xf32, #tpu.memory_space<vmem>>, vector<120x32xf32>
    tpu.vector_store %arg17[%c0_21, %c64_22], %41 {strides = array<i32>} : memref<128x96xf32, #tpu.memory_space<vmem>>, vector<120x32xf32>,
    %c0_23 = arith.constant 0 : index
    %c0_24 = arith.constant 0 : index
    %43 = vector.load %arg17[%c0_23, %c0_24] : memref<128x96xf32, #tpu.memory_space<vmem>>, vector<128x96xf32>
    %44 = arith.truncf %43 : vector<128x96xf32> to vector<128x96xbf16>
    %c0_25 = arith.constant 0 : index
    %c0_26 = arith.constant 0 : index
    %45 = vector.load %arg5[%c0_25, %c0_26] : memref<96x64xbf16, #tpu.memory_space<vmem>>, vector<96x64xbf16>
    %cst_27 = arith.constant dense<0.000000e+00> : vector<128x64xf32>
    %46 = tpu.matmul %44, %45, %cst_27 {dimension_numbers = #tpu.dot_dimension_numbers<[1], [0], [0], [1], [0, 0, 1, 1], [], []>} : vector<128x96xbf16>, vector<96x64xbf16>, vector<128x64xf32> -> vector<128x64xf32>
    %cst_28 = arith.constant dense<0.000000e+00> : vector<64xf32>
    %47 = vector.multi_reduction <add>, %46, %cst_28 [0] : vector<128x64xf32> to vector<64xf32>
    %48 = vector.shape_cast %47 : vector<64xf32> to vector<1x64xf32>
    %cst_29 = arith.constant 1.562500e-02 : f32
    %49 = vector.broadcast %cst_29 : f32 to vector<1x64xf32>
    %50 = arith.mulf %48, %49 : vector<1x64xf32>
    %51 = vector.broadcast %50 : vector<1x64xf32> to vector<128x64xf32>
    %52 = arith.subf %46, %51 : vector<128x64xf32>
    %53 = arith.mulf %52, %52 : vector<128x64xf32>
    %cst_30 = arith.constant dense<0.000000e+00> : vector<64xf32>
    %54 = vector.multi_reduction <add>, %53, %cst_30 [0] : vector<128x64xf32> to vector<64xf32>
    %55 = vector.shape_cast %54 : vector<64xf32> to vector<1x64xf32>
    %56 = arith.mulf %50, %50 : vector<1x64xf32>
    %cst_31 = arith.constant 6.400000e+01 : f32
    %57 = vector.broadcast %cst_31 : f32 to vector<1x64xf32>
    %58 = arith.mulf %57, %56 : vector<1x64xf32>
    %59 = arith.subf %55, %58 : vector<1x64xf32>
    %cst_32 = arith.constant 1.562500e-02 : f32
    %60 = vector.broadcast %cst_32 : f32 to vector<1x64xf32>
    %61 = arith.mulf %59, %60 : vector<1x64xf32>
    %c0_33 = arith.constant 0 : index
    %c0_34 = arith.constant 0 : index
    %62 = vector.load %arg6[%c0_33, %c0_34] : memref<1x64xf32, #tpu.memory_space<vmem>>, vector<1x64xf32>
    %cst_35 = arith.constant 9.99999974E-6 : f32
    %63 = vector.broadcast %cst_35 : f32 to vector<1x64xf32>
    %64 = arith.addf %61, %63 : vector<1x64xf32>
    %65 = math.rsqrt %64 : vector<1x64xf32>
    %66 = arith.mulf %62, %65 : vector<1x64xf32>
    %67 = vector.broadcast %66 : vector<1x64xf32> to vector<128x64xf32>
    %68 = arith.mulf %46, %67 : vector<128x64xf32>
    %c0_36 = arith.constant 0 : index
    %c0_37 = arith.constant 0 : index
    %69 = vector.load %arg7[%c0_36, %c0_37] : memref<1x64xf32, #tpu.memory_space<vmem>>, vector<1x64xf32>
    %70 = arith.mulf %50, %66 : vector<1x64xf32>
    %71 = arith.subf %69, %70 : vector<1x64xf32>
    %72 = vector.broadcast %71 : vector<1x64xf32> to vector<128x64xf32>
    %73 = arith.addf %68, %72 : vector<128x64xf32>
    %cst_38 = arith.constant 0.000000e+00 : f32
    %74 = vector.broadcast %cst_38 : f32 to vector<128x64xf32>
    %75 = arith.maximumf %73, %74 : vector<128x64xf32>
    %76 = vector.extract_strided_slice %75 {offsets = [0, 0], sizes = [8, 64], strides = [1, 1]} : vector<128x64xf32> to vector<8x64xf32>
    %77 = vector.extract_strided_slice %75 {offsets = [8, 0], sizes = [8, 64], strides = [1, 1]} : vector<128x64xf32> to vector<8x64xf32>
    %78 = arith.maximumf %76, %77 : vector<8x64xf32>
    %c0_39 = arith.constant 0 : index
    %c0_40 = arith.constant 0 : index
    %79 = vector.load %arg18[%c0_39, %c0_40] : memref<64x64xf32, #tpu.memory_space<vmem>>, vector<8x64xf32>
    tpu.vector_store %arg18[%c0_39, %c0_40], %78 {strides = array<i32>} : memref<64x64xf32, #tpu.memory_space<vmem>>, vector<8x64xf32>,
    %80 = vector.extract_strided_slice %75 {offsets = [16, 0], sizes = [8, 64], strides = [1, 1]} : vector<128x64xf32> to vector<8x64xf32>
    %81 = vector.extract_strided_slice %75 {offsets = [24, 0], sizes = [8, 64], strides = [1, 1]} : vector<128x64xf32> to vector<8x64xf32>
    %82 = arith.maximumf %80, %81 : vector<8x64xf32>
    %c8_41 = arith.constant 8 : index
    %c0_42 = arith.constant 0 : index
    %83 = vector.load %arg18[%c8_41, %c0_42] : memref<64x64xf32, #tpu.memory_space<vmem>>, vector<8x64xf32>
    tpu.vector_store %arg18[%c8_41, %c0_42], %82 {strides = array<i32>} : memref<64x64xf32, #tpu.memory_space<vmem>>, vector<8x64xf32>,
    %84 = vector.extract_strided_slice %75 {offsets = [32, 0], sizes = [8, 64], strides = [1, 1]} : vector<128x64xf32> to vector<8x64xf32>
    %85 = vector.extract_strided_slice %75 {offsets = [40, 0], sizes = [8, 64], strides = [1, 1]} : vector<128x64xf32> to vector<8x64xf32>
    %86 = arith.maximumf %84, %85 : vector<8x64xf32>
    %c16 = arith.constant 16 : index
    %c0_43 = arith.constant 0 : index
    %87 = vector.load %arg18[%c16, %c0_43] : memref<64x64xf32, #tpu.memory_space<vmem>>, vector<8x64xf32>
    tpu.vector_store %arg18[%c16, %c0_43], %86 {strides = array<i32>} : memref<64x64xf32, #tpu.memory_space<vmem>>, vector<8x64xf32>,
    %88 = vector.extract_strided_slice %75 {offsets = [48, 0], sizes = [8, 64], strides = [1, 1]} : vector<128x64xf32> to vector<8x64xf32>
    %89 = vector.extract_strided_slice %75 {offsets = [56, 0], sizes = [8, 64], strides = [1, 1]} : vector<128x64xf32> to vector<8x64xf32>
    %90 = arith.maximumf %88, %89 : vector<8x64xf32>
    %c24 = arith.constant 24 : index
    %c0_44 = arith.constant 0 : index
    %91 = vector.load %arg18[%c24, %c0_44] : memref<64x64xf32, #tpu.memory_space<vmem>>, vector<8x64xf32>
    tpu.vector_store %arg18[%c24, %c0_44], %90 {strides = array<i32>} : memref<64x64xf32, #tpu.memory_space<vmem>>, vector<8x64xf32>,
    %92 = vector.extract_strided_slice %75 {offsets = [64, 0], sizes = [8, 64], strides = [1, 1]} : vector<128x64xf32> to vector<8x64xf32>
    %93 = vector.extract_strided_slice %75 {offsets = [72, 0], sizes = [8, 64], strides = [1, 1]} : vector<128x64xf32> to vector<8x64xf32>
    %94 = arith.maximumf %92, %93 : vector<8x64xf32>
    %c32_45 = arith.constant 32 : index
    %c0_46 = arith.constant 0 : index
    %95 = vector.load %arg18[%c32_45, %c0_46] : memref<64x64xf32, #tpu.memory_space<vmem>>, vector<8x64xf32>
    tpu.vector_store %arg18[%c32_45, %c0_46], %94 {strides = array<i32>} : memref<64x64xf32, #tpu.memory_space<vmem>>, vector<8x64xf32>,
    %96 = vector.extract_strided_slice %75 {offsets = [80, 0], sizes = [8, 64], strides = [1, 1]} : vector<128x64xf32> to vector<8x64xf32>
    %97 = vector.extract_strided_slice %75 {offsets = [88, 0], sizes = [8, 64], strides = [1, 1]} : vector<128x64xf32> to vector<8x64xf32>
    %98 = arith.maximumf %96, %97 : vector<8x64xf32>
    %c40 = arith.constant 40 : index
    %c0_47 = arith.constant 0 : index
    %99 = vector.load %arg18[%c40, %c0_47] : memref<64x64xf32, #tpu.memory_space<vmem>>, vector<8x64xf32>
    tpu.vector_store %arg18[%c40, %c0_47], %98 {strides = array<i32>} : memref<64x64xf32, #tpu.memory_space<vmem>>, vector<8x64xf32>,
    %100 = vector.extract_strided_slice %75 {offsets = [96, 0], sizes = [8, 64], strides = [1, 1]} : vector<128x64xf32> to vector<8x64xf32>
    %101 = vector.extract_strided_slice %75 {offsets = [104, 0], sizes = [8, 64], strides = [1, 1]} : vector<128x64xf32> to vector<8x64xf32>
    %102 = arith.maximumf %100, %101 : vector<8x64xf32>
    %c48 = arith.constant 48 : index
    %c0_48 = arith.constant 0 : index
    %103 = vector.load %arg18[%c48, %c0_48] : memref<64x64xf32, #tpu.memory_space<vmem>>, vector<8x64xf32>
    tpu.vector_store %arg18[%c48, %c0_48], %102 {strides = array<i32>} : memref<64x64xf32, #tpu.memory_space<vmem>>, vector<8x64xf32>,
    %104 = vector.extract_strided_slice %75 {offsets = [112, 0], sizes = [8, 64], strides = [1, 1]} : vector<128x64xf32> to vector<8x64xf32>
    %105 = vector.extract_strided_slice %75 {offsets = [120, 0], sizes = [8, 64], strides = [1, 1]} : vector<128x64xf32> to vector<8x64xf32>
    %106 = arith.maximumf %104, %105 : vector<8x64xf32>
    %c56 = arith.constant 56 : index
    %c0_49 = arith.constant 0 : index
    %107 = vector.load %arg18[%c56, %c0_49] : memref<64x64xf32, #tpu.memory_space<vmem>>, vector<8x64xf32>
    tpu.vector_store %arg18[%c56, %c0_49], %106 {strides = array<i32>} : memref<64x64xf32, #tpu.memory_space<vmem>>, vector<8x64xf32>,
    %cst_50 = arith.constant 0.000000e+00 : f32
    %108 = vector.broadcast %cst_50 : f32 to vector<8x64xf32>
    %cst_51 = arith.constant 0.000000e+00 : f32
    %109 = vector.broadcast %cst_51 : f32 to vector<8x64xf32>
    %cst_52 = arith.constant 0.000000e+00 : f32
    %110 = vector.broadcast %cst_52 : f32 to vector<8x64xf32>
    %cst_53 = arith.constant 0.000000e+00 : f32
    %111 = vector.broadcast %cst_53 : f32 to vector<8x64xf32>
    %c0_54 = arith.constant 0 : index
    %c0_55 = arith.constant 0 : index
    %112 = vector.load %arg18[%c0_54, %c0_55] : memref<64x64xf32, #tpu.memory_space<vmem>>, vector<8x64xf32>
    %113 = tpu.concatenate %112, %108 in 1 : vector<8x64xf32>, vector<8x64xf32> -> vector<8x128xf32>
    %114 = arith.truncf %113 : vector<8x128xf32> to vector<8x128xbf16>
    %c0_56 = arith.constant 0 : index
    %c0_57 = arith.constant 0 : index
    %115 = vector.load %arg8[%c0_56, %c0_57] : memref<128x256xbf16, #tpu.memory_space<vmem>>, vector<128x256xbf16>
    %cst_58 = arith.constant dense<0.000000e+00> : vector<8x256xf32>
    %116 = tpu.matmul %114, %115, %cst_58 {dimension_numbers = #tpu.dot_dimension_numbers<[1], [0], [0], [1], [0, 0, 1, 1], [], []>} : vector<8x128xbf16>, vector<128x256xbf16>, vector<8x256xf32> -> vector<8x256xf32>
    %c0_59 = arith.constant 0 : index
    %c0_60 = arith.constant 0 : index
    %117 = vector.load %arg9[%c0_59, %c0_60] : memref<1x256xf32, #tpu.memory_space<vmem>>, vector<1x256xf32>
    %118 = vector.broadcast %117 : vector<1x256xf32> to vector<8x256xf32>
    %119 = arith.addf %116, %118 : vector<8x256xf32>
    %120 = math.tanh %119 : vector<8x256xf32>
    %121 = vector.extract_strided_slice %120 {offsets = [0, 0], sizes = [8, 64], strides = [1, 1]} : vector<8x256xf32> to vector<8x64xf32>
    %cst_61 = arith.constant 1.000000e+00 : f32
    %122 = vector.broadcast %cst_61 : f32 to vector<8x64xf32>
    %123 = arith.addf %121, %122 : vector<8x64xf32>
    %cst_62 = arith.constant 5.000000e-01 : f32
    %124 = vector.broadcast %cst_62 : f32 to vector<8x64xf32>
    %125 = arith.mulf %124, %123 : vector<8x64xf32>
    %126 = vector.extract_strided_slice %120 {offsets = [0, 64], sizes = [8, 64], strides = [1, 1]} : vector<8x256xf32> to vector<8x64xf32>
    %cst_63 = arith.constant 1.000000e+00 : f32
    %127 = vector.broadcast %cst_63 : f32 to vector<8x64xf32>
    %128 = arith.addf %126, %127 : vector<8x64xf32>
    %cst_64 = arith.constant 5.000000e-01 : f32
    %129 = vector.broadcast %cst_64 : f32 to vector<8x64xf32>
    %130 = arith.mulf %129, %128 : vector<8x64xf32>
    %131 = vector.extract_strided_slice %120 {offsets = [0, 128], sizes = [8, 64], strides = [1, 1]} : vector<8x256xf32> to vector<8x64xf32>
    %132 = vector.extract_strided_slice %120 {offsets = [0, 192], sizes = [8, 64], strides = [1, 1]} : vector<8x256xf32> to vector<8x64xf32>
    %cst_65 = arith.constant 1.000000e+00 : f32
    %133 = vector.broadcast %cst_65 : f32 to vector<8x64xf32>
    %134 = arith.addf %132, %133 : vector<8x64xf32>
    %cst_66 = arith.constant 5.000000e-01 : f32
    %135 = vector.broadcast %cst_66 : f32 to vector<8x64xf32>
    %136 = arith.mulf %135, %134 : vector<8x64xf32>
    %137 = arith.mulf %130, %109 : vector<8x64xf32>
    %138 = arith.mulf %125, %131 : vector<8x64xf32>
    %139 = arith.addf %137, %138 : vector<8x64xf32>
    %140 = math.tanh %139 : vector<8x64xf32>
    %141 = arith.mulf %136, %140 : vector<8x64xf32>
    %142 = tpu.concatenate %141, %110 in 1 : vector<8x64xf32>, vector<8x64xf32> -> vector<8x128xf32>
    %143 = arith.truncf %142 : vector<8x128xf32> to vector<8x128xbf16>
    %c0_67 = arith.constant 0 : index
    %c0_68 = arith.constant 0 : index
    %144 = vector.load %arg10[%c0_67, %c0_68] : memref<128x256xbf16, #tpu.memory_space<vmem>>, vector<128x256xbf16>
    %cst_69 = arith.constant dense<0.000000e+00> : vector<8x256xf32>
    %145 = tpu.matmul %143, %144, %cst_69 {dimension_numbers = #tpu.dot_dimension_numbers<[1], [0], [0], [1], [0, 0, 1, 1], [], []>} : vector<8x128xbf16>, vector<128x256xbf16>, vector<8x256xf32> -> vector<8x256xf32>
    %c0_70 = arith.constant 0 : index
    %c0_71 = arith.constant 0 : index
    %146 = vector.load %arg11[%c0_70, %c0_71] : memref<1x256xf32, #tpu.memory_space<vmem>>, vector<1x256xf32>
    %147 = vector.broadcast %146 : vector<1x256xf32> to vector<8x256xf32>
    %148 = arith.addf %145, %147 : vector<8x256xf32>
    %149 = math.tanh %148 : vector<8x256xf32>
    %150 = vector.extract_strided_slice %149 {offsets = [0, 0], sizes = [8, 64], strides = [1, 1]} : vector<8x256xf32> to vector<8x64xf32>
    %cst_72 = arith.constant 1.000000e+00 : f32
    %151 = vector.broadcast %cst_72 : f32 to vector<8x64xf32>
    %152 = arith.addf %150, %151 : vector<8x64xf32>
    %cst_73 = arith.constant 5.000000e-01 : f32
    %153 = vector.broadcast %cst_73 : f32 to vector<8x64xf32>
    %154 = arith.mulf %153, %152 : vector<8x64xf32>
    %155 = vector.extract_strided_slice %149 {offsets = [0, 64], sizes = [8, 64], strides = [1, 1]} : vector<8x256xf32> to vector<8x64xf32>
    %cst_74 = arith.constant 1.000000e+00 : f32
    %156 = vector.broadcast %cst_74 : f32 to vector<8x64xf32>
    %157 = arith.addf %155, %156 : vector<8x64xf32>
    %cst_75 = arith.constant 5.000000e-01 : f32
    %158 = vector.broadcast %cst_75 : f32 to vector<8x64xf32>
    %159 = arith.mulf %158, %157 : vector<8x64xf32>
    %160 = vector.extract_strided_slice %149 {offsets = [0, 128], sizes = [8, 64], strides = [1, 1]} : vector<8x256xf32> to vector<8x64xf32>
    %161 = vector.extract_strided_slice %149 {offsets = [0, 192], sizes = [8, 64], strides = [1, 1]} : vector<8x256xf32> to vector<8x64xf32>
    %cst_76 = arith.constant 1.000000e+00 : f32
    %162 = vector.broadcast %cst_76 : f32 to vector<8x64xf32>
    %163 = arith.addf %161, %162 : vector<8x64xf32>
    %cst_77 = arith.constant 5.000000e-01 : f32
    %164 = vector.broadcast %cst_77 : f32 to vector<8x64xf32>
    %165 = arith.mulf %164, %163 : vector<8x64xf32>
    %166 = arith.mulf %159, %111 : vector<8x64xf32>
    %167 = arith.mulf %154, %160 : vector<8x64xf32>
    %168 = arith.addf %166, %167 : vector<8x64xf32>
    %169 = math.tanh %168 : vector<8x64xf32>
    %170 = arith.mulf %165, %169 : vector<8x64xf32>
    %c8_78 = arith.constant 8 : index
    %c0_79 = arith.constant 0 : index
    %171 = vector.load %arg18[%c8_78, %c0_79] : memref<64x64xf32, #tpu.memory_space<vmem>>, vector<8x64xf32>
    %172 = tpu.concatenate %171, %141 in 1 : vector<8x64xf32>, vector<8x64xf32> -> vector<8x128xf32>
    %173 = arith.truncf %172 : vector<8x128xf32> to vector<8x128xbf16>
    %c0_80 = arith.constant 0 : index
    %c0_81 = arith.constant 0 : index
    %174 = vector.load %arg8[%c0_80, %c0_81] : memref<128x256xbf16, #tpu.memory_space<vmem>>, vector<128x256xbf16>
    %cst_82 = arith.constant dense<0.000000e+00> : vector<8x256xf32>
    %175 = tpu.matmul %173, %174, %cst_82 {dimension_numbers = #tpu.dot_dimension_numbers<[1], [0], [0], [1], [0, 0, 1, 1], [], []>} : vector<8x128xbf16>, vector<128x256xbf16>, vector<8x256xf32> -> vector<8x256xf32>
    %c0_83 = arith.constant 0 : index
    %c0_84 = arith.constant 0 : index
    %176 = vector.load %arg9[%c0_83, %c0_84] : memref<1x256xf32, #tpu.memory_space<vmem>>, vector<1x256xf32>
    %177 = vector.broadcast %176 : vector<1x256xf32> to vector<8x256xf32>
    %178 = arith.addf %175, %177 : vector<8x256xf32>
    %179 = math.tanh %178 : vector<8x256xf32>
    %180 = vector.extract_strided_slice %179 {offsets = [0, 0], sizes = [8, 64], strides = [1, 1]} : vector<8x256xf32> to vector<8x64xf32>
    %cst_85 = arith.constant 1.000000e+00 : f32
    %181 = vector.broadcast %cst_85 : f32 to vector<8x64xf32>
    %182 = arith.addf %180, %181 : vector<8x64xf32>
    %cst_86 = arith.constant 5.000000e-01 : f32
    %183 = vector.broadcast %cst_86 : f32 to vector<8x64xf32>
    %184 = arith.mulf %183, %182 : vector<8x64xf32>
    %185 = vector.extract_strided_slice %179 {offsets = [0, 64], sizes = [8, 64], strides = [1, 1]} : vector<8x256xf32> to vector<8x64xf32>
    %cst_87 = arith.constant 1.000000e+00 : f32
    %186 = vector.broadcast %cst_87 : f32 to vector<8x64xf32>
    %187 = arith.addf %185, %186 : vector<8x64xf32>
    %cst_88 = arith.constant 5.000000e-01 : f32
    %188 = vector.broadcast %cst_88 : f32 to vector<8x64xf32>
    %189 = arith.mulf %188, %187 : vector<8x64xf32>
    %190 = vector.extract_strided_slice %179 {offsets = [0, 128], sizes = [8, 64], strides = [1, 1]} : vector<8x256xf32> to vector<8x64xf32>
    %191 = vector.extract_strided_slice %179 {offsets = [0, 192], sizes = [8, 64], strides = [1, 1]} : vector<8x256xf32> to vector<8x64xf32>
    %cst_89 = arith.constant 1.000000e+00 : f32
    %192 = vector.broadcast %cst_89 : f32 to vector<8x64xf32>
    %193 = arith.addf %191, %192 : vector<8x64xf32>
    %cst_90 = arith.constant 5.000000e-01 : f32
    %194 = vector.broadcast %cst_90 : f32 to vector<8x64xf32>
    %195 = arith.mulf %194, %193 : vector<8x64xf32>
    %196 = arith.mulf %189, %139 : vector<8x64xf32>
    %197 = arith.mulf %184, %190 : vector<8x64xf32>
    %198 = arith.addf %196, %197 : vector<8x64xf32>
    %199 = math.tanh %198 : vector<8x64xf32>
    %200 = arith.mulf %195, %199 : vector<8x64xf32>
    %201 = tpu.concatenate %200, %170 in 1 : vector<8x64xf32>, vector<8x64xf32> -> vector<8x128xf32>
    %202 = arith.truncf %201 : vector<8x128xf32> to vector<8x128xbf16>
    %c0_91 = arith.constant 0 : index
    %c0_92 = arith.constant 0 : index
    %203 = vector.load %arg10[%c0_91, %c0_92] : memref<128x256xbf16, #tpu.memory_space<vmem>>, vector<128x256xbf16>
    %cst_93 = arith.constant dense<0.000000e+00> : vector<8x256xf32>
    %204 = tpu.matmul %202, %203, %cst_93 {dimension_numbers = #tpu.dot_dimension_numbers<[1], [0], [0], [1], [0, 0, 1, 1], [], []>} : vector<8x128xbf16>, vector<128x256xbf16>, vector<8x256xf32> -> vector<8x256xf32>
    %c0_94 = arith.constant 0 : index
    %c0_95 = arith.constant 0 : index
    %205 = vector.load %arg11[%c0_94, %c0_95] : memref<1x256xf32, #tpu.memory_space<vmem>>, vector<1x256xf32>
    %206 = vector.broadcast %205 : vector<1x256xf32> to vector<8x256xf32>
    %207 = arith.addf %204, %206 : vector<8x256xf32>
    %208 = math.tanh %207 : vector<8x256xf32>
    %209 = vector.extract_strided_slice %208 {offsets = [0, 0], sizes = [8, 64], strides = [1, 1]} : vector<8x256xf32> to vector<8x64xf32>
    %cst_96 = arith.constant 1.000000e+00 : f32
    %210 = vector.broadcast %cst_96 : f32 to vector<8x64xf32>
    %211 = arith.addf %209, %210 : vector<8x64xf32>
    %cst_97 = arith.constant 5.000000e-01 : f32
    %212 = vector.broadcast %cst_97 : f32 to vector<8x64xf32>
    %213 = arith.mulf %212, %211 : vector<8x64xf32>
    %214 = vector.extract_strided_slice %208 {offsets = [0, 64], sizes = [8, 64], strides = [1, 1]} : vector<8x256xf32> to vector<8x64xf32>
    %cst_98 = arith.constant 1.000000e+00 : f32
    %215 = vector.broadcast %cst_98 : f32 to vector<8x64xf32>
    %216 = arith.addf %214, %215 : vector<8x64xf32>
    %cst_99 = arith.constant 5.000000e-01 : f32
    %217 = vector.broadcast %cst_99 : f32 to vector<8x64xf32>
    %218 = arith.mulf %217, %216 : vector<8x64xf32>
    %219 = vector.extract_strided_slice %208 {offsets = [0, 128], sizes = [8, 64], strides = [1, 1]} : vector<8x256xf32> to vector<8x64xf32>
    %220 = vector.extract_strided_slice %208 {offsets = [0, 192], sizes = [8, 64], strides = [1, 1]} : vector<8x256xf32> to vector<8x64xf32>
    %cst_100 = arith.constant 1.000000e+00 : f32
    %221 = vector.broadcast %cst_100 : f32 to vector<8x64xf32>
    %222 = arith.addf %220, %221 : vector<8x64xf32>
    %cst_101 = arith.constant 5.000000e-01 : f32
    %223 = vector.broadcast %cst_101 : f32 to vector<8x64xf32>
    %224 = arith.mulf %223, %222 : vector<8x64xf32>
    %225 = arith.mulf %218, %168 : vector<8x64xf32>
    %226 = arith.mulf %213, %219 : vector<8x64xf32>
    %227 = arith.addf %225, %226 : vector<8x64xf32>
    %228 = math.tanh %227 : vector<8x64xf32>
    %229 = arith.mulf %224, %228 : vector<8x64xf32>
    %c16_102 = arith.constant 16 : index
    %c0_103 = arith.constant 0 : index
    %230 = vector.load %arg18[%c16_102, %c0_103] : memref<64x64xf32, #tpu.memory_space<vmem>>, vector<8x64xf32>
    %231 = tpu.concatenate %230, %200 in 1 : vector<8x64xf32>, vector<8x64xf32> -> vector<8x128xf32>
    %232 = arith.truncf %231 : vector<8x128xf32> to vector<8x128xbf16>
    %c0_104 = arith.constant 0 : index
    %c0_105 = arith.constant 0 : index
    %233 = vector.load %arg8[%c0_104, %c0_105] : memref<128x256xbf16, #tpu.memory_space<vmem>>, vector<128x256xbf16>
    %cst_106 = arith.constant dense<0.000000e+00> : vector<8x256xf32>
    %234 = tpu.matmul %232, %233, %cst_106 {dimension_numbers = #tpu.dot_dimension_numbers<[1], [0], [0], [1], [0, 0, 1, 1], [], []>} : vector<8x128xbf16>, vector<128x256xbf16>, vector<8x256xf32> -> vector<8x256xf32>
    %c0_107 = arith.constant 0 : index
    %c0_108 = arith.constant 0 : index
    %235 = vector.load %arg9[%c0_107, %c0_108] : memref<1x256xf32, #tpu.memory_space<vmem>>, vector<1x256xf32>
    %236 = vector.broadcast %235 : vector<1x256xf32> to vector<8x256xf32>
    %237 = arith.addf %234, %236 : vector<8x256xf32>
    %238 = math.tanh %237 : vector<8x256xf32>
    %239 = vector.extract_strided_slice %238 {offsets = [0, 0], sizes = [8, 64], strides = [1, 1]} : vector<8x256xf32> to vector<8x64xf32>
    %cst_109 = arith.constant 1.000000e+00 : f32
    %240 = vector.broadcast %cst_109 : f32 to vector<8x64xf32>
    %241 = arith.addf %239, %240 : vector<8x64xf32>
    %cst_110 = arith.constant 5.000000e-01 : f32
    %242 = vector.broadcast %cst_110 : f32 to vector<8x64xf32>
    %243 = arith.mulf %242, %241 : vector<8x64xf32>
    %244 = vector.extract_strided_slice %238 {offsets = [0, 64], sizes = [8, 64], strides = [1, 1]} : vector<8x256xf32> to vector<8x64xf32>
    %cst_111 = arith.constant 1.000000e+00 : f32
    %245 = vector.broadcast %cst_111 : f32 to vector<8x64xf32>
    %246 = arith.addf %244, %245 : vector<8x64xf32>
    %cst_112 = arith.constant 5.000000e-01 : f32
    %247 = vector.broadcast %cst_112 : f32 to vector<8x64xf32>
    %248 = arith.mulf %247, %246 : vector<8x64xf32>
    %249 = vector.extract_strided_slice %238 {offsets = [0, 128], sizes = [8, 64], strides = [1, 1]} : vector<8x256xf32> to vector<8x64xf32>
    %250 = vector.extract_strided_slice %238 {offsets = [0, 192], sizes = [8, 64], strides = [1, 1]} : vector<8x256xf32> to vector<8x64xf32>
    %cst_113 = arith.constant 1.000000e+00 : f32
    %251 = vector.broadcast %cst_113 : f32 to vector<8x64xf32>
    %252 = arith.addf %250, %251 : vector<8x64xf32>
    %cst_114 = arith.constant 5.000000e-01 : f32
    %253 = vector.broadcast %cst_114 : f32 to vector<8x64xf32>
    %254 = arith.mulf %253, %252 : vector<8x64xf32>
    %255 = arith.mulf %248, %198 : vector<8x64xf32>
    %256 = arith.mulf %243, %249 : vector<8x64xf32>
    %257 = arith.addf %255, %256 : vector<8x64xf32>
    %258 = math.tanh %257 : vector<8x64xf32>
    %259 = arith.mulf %254, %258 : vector<8x64xf32>
    %260 = tpu.concatenate %259, %229 in 1 : vector<8x64xf32>, vector<8x64xf32> -> vector<8x128xf32>
    %261 = arith.truncf %260 : vector<8x128xf32> to vector<8x128xbf16>
    %c0_115 = arith.constant 0 : index
    %c0_116 = arith.constant 0 : index
    %262 = vector.load %arg10[%c0_115, %c0_116] : memref<128x256xbf16, #tpu.memory_space<vmem>>, vector<128x256xbf16>
    %cst_117 = arith.constant dense<0.000000e+00> : vector<8x256xf32>
    %263 = tpu.matmul %261, %262, %cst_117 {dimension_numbers = #tpu.dot_dimension_numbers<[1], [0], [0], [1], [0, 0, 1, 1], [], []>} : vector<8x128xbf16>, vector<128x256xbf16>, vector<8x256xf32> -> vector<8x256xf32>
    %c0_118 = arith.constant 0 : index
    %c0_119 = arith.constant 0 : index
    %264 = vector.load %arg11[%c0_118, %c0_119] : memref<1x256xf32, #tpu.memory_space<vmem>>, vector<1x256xf32>
    %265 = vector.broadcast %264 : vector<1x256xf32> to vector<8x256xf32>
    %266 = arith.addf %263, %265 : vector<8x256xf32>
    %267 = math.tanh %266 : vector<8x256xf32>
    %268 = vector.extract_strided_slice %267 {offsets = [0, 0], sizes = [8, 64], strides = [1, 1]} : vector<8x256xf32> to vector<8x64xf32>
    %cst_120 = arith.constant 1.000000e+00 : f32
    %269 = vector.broadcast %cst_120 : f32 to vector<8x64xf32>
    %270 = arith.addf %268, %269 : vector<8x64xf32>
    %cst_121 = arith.constant 5.000000e-01 : f32
    %271 = vector.broadcast %cst_121 : f32 to vector<8x64xf32>
    %272 = arith.mulf %271, %270 : vector<8x64xf32>
    %273 = vector.extract_strided_slice %267 {offsets = [0, 64], sizes = [8, 64], strides = [1, 1]} : vector<8x256xf32> to vector<8x64xf32>
    %cst_122 = arith.constant 1.000000e+00 : f32
    %274 = vector.broadcast %cst_122 : f32 to vector<8x64xf32>
    %275 = arith.addf %273, %274 : vector<8x64xf32>
    %cst_123 = arith.constant 5.000000e-01 : f32
    %276 = vector.broadcast %cst_123 : f32 to vector<8x64xf32>
    %277 = arith.mulf %276, %275 : vector<8x64xf32>
    %278 = vector.extract_strided_slice %267 {offsets = [0, 128], sizes = [8, 64], strides = [1, 1]} : vector<8x256xf32> to vector<8x64xf32>
    %279 = vector.extract_strided_slice %267 {offsets = [0, 192], sizes = [8, 64], strides = [1, 1]} : vector<8x256xf32> to vector<8x64xf32>
    %cst_124 = arith.constant 1.000000e+00 : f32
    %280 = vector.broadcast %cst_124 : f32 to vector<8x64xf32>
    %281 = arith.addf %279, %280 : vector<8x64xf32>
    %cst_125 = arith.constant 5.000000e-01 : f32
    %282 = vector.broadcast %cst_125 : f32 to vector<8x64xf32>
    %283 = arith.mulf %282, %281 : vector<8x64xf32>
    %284 = arith.mulf %277, %227 : vector<8x64xf32>
    %285 = arith.mulf %272, %278 : vector<8x64xf32>
    %286 = arith.addf %284, %285 : vector<8x64xf32>
    %287 = math.tanh %286 : vector<8x64xf32>
    %288 = arith.mulf %283, %287 : vector<8x64xf32>
    %c24_126 = arith.constant 24 : index
    %c0_127 = arith.constant 0 : index
    %289 = vector.load %arg18[%c24_126, %c0_127] : memref<64x64xf32, #tpu.memory_space<vmem>>, vector<8x64xf32>
    %290 = tpu.concatenate %289, %259 in 1 : vector<8x64xf32>, vector<8x64xf32> -> vector<8x128xf32>
    %291 = arith.truncf %290 : vector<8x128xf32> to vector<8x128xbf16>
    %c0_128 = arith.constant 0 : index
    %c0_129 = arith.constant 0 : index
    %292 = vector.load %arg8[%c0_128, %c0_129] : memref<128x256xbf16, #tpu.memory_space<vmem>>, vector<128x256xbf16>
    %cst_130 = arith.constant dense<0.000000e+00> : vector<8x256xf32>
    %293 = tpu.matmul %291, %292, %cst_130 {dimension_numbers = #tpu.dot_dimension_numbers<[1], [0], [0], [1], [0, 0, 1, 1], [], []>} : vector<8x128xbf16>, vector<128x256xbf16>, vector<8x256xf32> -> vector<8x256xf32>
    %c0_131 = arith.constant 0 : index
    %c0_132 = arith.constant 0 : index
    %294 = vector.load %arg9[%c0_131, %c0_132] : memref<1x256xf32, #tpu.memory_space<vmem>>, vector<1x256xf32>
    %295 = vector.broadcast %294 : vector<1x256xf32> to vector<8x256xf32>
    %296 = arith.addf %293, %295 : vector<8x256xf32>
    %297 = math.tanh %296 : vector<8x256xf32>
    %298 = vector.extract_strided_slice %297 {offsets = [0, 0], sizes = [8, 64], strides = [1, 1]} : vector<8x256xf32> to vector<8x64xf32>
    %cst_133 = arith.constant 1.000000e+00 : f32
    %299 = vector.broadcast %cst_133 : f32 to vector<8x64xf32>
    %300 = arith.addf %298, %299 : vector<8x64xf32>
    %cst_134 = arith.constant 5.000000e-01 : f32
    %301 = vector.broadcast %cst_134 : f32 to vector<8x64xf32>
    %302 = arith.mulf %301, %300 : vector<8x64xf32>
    %303 = vector.extract_strided_slice %297 {offsets = [0, 64], sizes = [8, 64], strides = [1, 1]} : vector<8x256xf32> to vector<8x64xf32>
    %cst_135 = arith.constant 1.000000e+00 : f32
    %304 = vector.broadcast %cst_135 : f32 to vector<8x64xf32>
    %305 = arith.addf %303, %304 : vector<8x64xf32>
    %cst_136 = arith.constant 5.000000e-01 : f32
    %306 = vector.broadcast %cst_136 : f32 to vector<8x64xf32>
    %307 = arith.mulf %306, %305 : vector<8x64xf32>
    %308 = vector.extract_strided_slice %297 {offsets = [0, 128], sizes = [8, 64], strides = [1, 1]} : vector<8x256xf32> to vector<8x64xf32>
    %309 = vector.extract_strided_slice %297 {offsets = [0, 192], sizes = [8, 64], strides = [1, 1]} : vector<8x256xf32> to vector<8x64xf32>
    %cst_137 = arith.constant 1.000000e+00 : f32
    %310 = vector.broadcast %cst_137 : f32 to vector<8x64xf32>
    %311 = arith.addf %309, %310 : vector<8x64xf32>
    %cst_138 = arith.constant 5.000000e-01 : f32
    %312 = vector.broadcast %cst_138 : f32 to vector<8x64xf32>
    %313 = arith.mulf %312, %311 : vector<8x64xf32>
    %314 = arith.mulf %307, %257 : vector<8x64xf32>
    %315 = arith.mulf %302, %308 : vector<8x64xf32>
    %316 = arith.addf %314, %315 : vector<8x64xf32>
    %317 = math.tanh %316 : vector<8x64xf32>
    %318 = arith.mulf %313, %317 : vector<8x64xf32>
    %319 = tpu.concatenate %318, %288 in 1 : vector<8x64xf32>, vector<8x64xf32> -> vector<8x128xf32>
    %320 = arith.truncf %319 : vector<8x128xf32> to vector<8x128xbf16>
    %c0_139 = arith.constant 0 : index
    %c0_140 = arith.constant 0 : index
    %321 = vector.load %arg10[%c0_139, %c0_140] : memref<128x256xbf16, #tpu.memory_space<vmem>>, vector<128x256xbf16>
    %cst_141 = arith.constant dense<0.000000e+00> : vector<8x256xf32>
    %322 = tpu.matmul %320, %321, %cst_141 {dimension_numbers = #tpu.dot_dimension_numbers<[1], [0], [0], [1], [0, 0, 1, 1], [], []>} : vector<8x128xbf16>, vector<128x256xbf16>, vector<8x256xf32> -> vector<8x256xf32>
    %c0_142 = arith.constant 0 : index
    %c0_143 = arith.constant 0 : index
    %323 = vector.load %arg11[%c0_142, %c0_143] : memref<1x256xf32, #tpu.memory_space<vmem>>, vector<1x256xf32>
    %324 = vector.broadcast %323 : vector<1x256xf32> to vector<8x256xf32>
    %325 = arith.addf %322, %324 : vector<8x256xf32>
    %326 = math.tanh %325 : vector<8x256xf32>
    %327 = vector.extract_strided_slice %326 {offsets = [0, 0], sizes = [8, 64], strides = [1, 1]} : vector<8x256xf32> to vector<8x64xf32>
    %cst_144 = arith.constant 1.000000e+00 : f32
    %328 = vector.broadcast %cst_144 : f32 to vector<8x64xf32>
    %329 = arith.addf %327, %328 : vector<8x64xf32>
    %cst_145 = arith.constant 5.000000e-01 : f32
    %330 = vector.broadcast %cst_145 : f32 to vector<8x64xf32>
    %331 = arith.mulf %330, %329 : vector<8x64xf32>
    %332 = vector.extract_strided_slice %326 {offsets = [0, 64], sizes = [8, 64], strides = [1, 1]} : vector<8x256xf32> to vector<8x64xf32>
    %cst_146 = arith.constant 1.000000e+00 : f32
    %333 = vector.broadcast %cst_146 : f32 to vector<8x64xf32>
    %334 = arith.addf %332, %333 : vector<8x64xf32>
    %cst_147 = arith.constant 5.000000e-01 : f32
    %335 = vector.broadcast %cst_147 : f32 to vector<8x64xf32>
    %336 = arith.mulf %335, %334 : vector<8x64xf32>
    %337 = vector.extract_strided_slice %326 {offsets = [0, 128], sizes = [8, 64], strides = [1, 1]} : vector<8x256xf32> to vector<8x64xf32>
    %338 = vector.extract_strided_slice %326 {offsets = [0, 192], sizes = [8, 64], strides = [1, 1]} : vector<8x256xf32> to vector<8x64xf32>
    %cst_148 = arith.constant 1.000000e+00 : f32
    %339 = vector.broadcast %cst_148 : f32 to vector<8x64xf32>
    %340 = arith.addf %338, %339 : vector<8x64xf32>
    %cst_149 = arith.constant 5.000000e-01 : f32
    %341 = vector.broadcast %cst_149 : f32 to vector<8x64xf32>
    %342 = arith.mulf %341, %340 : vector<8x64xf32>
    %343 = arith.mulf %336, %286 : vector<8x64xf32>
    %344 = arith.mulf %331, %337 : vector<8x64xf32>
    %345 = arith.addf %343, %344 : vector<8x64xf32>
    %346 = math.tanh %345 : vector<8x64xf32>
    %347 = arith.mulf %342, %346 : vector<8x64xf32>
    %c32_150 = arith.constant 32 : index
    %c0_151 = arith.constant 0 : index
    %348 = vector.load %arg18[%c32_150, %c0_151] : memref<64x64xf32, #tpu.memory_space<vmem>>, vector<8x64xf32>
    %349 = tpu.concatenate %348, %318 in 1 : vector<8x64xf32>, vector<8x64xf32> -> vector<8x128xf32>
    %350 = arith.truncf %349 : vector<8x128xf32> to vector<8x128xbf16>
    %c0_152 = arith.constant 0 : index
    %c0_153 = arith.constant 0 : index
    %351 = vector.load %arg8[%c0_152, %c0_153] : memref<128x256xbf16, #tpu.memory_space<vmem>>, vector<128x256xbf16>
    %cst_154 = arith.constant dense<0.000000e+00> : vector<8x256xf32>
    %352 = tpu.matmul %350, %351, %cst_154 {dimension_numbers = #tpu.dot_dimension_numbers<[1], [0], [0], [1], [0, 0, 1, 1], [], []>} : vector<8x128xbf16>, vector<128x256xbf16>, vector<8x256xf32> -> vector<8x256xf32>
    %c0_155 = arith.constant 0 : index
    %c0_156 = arith.constant 0 : index
    %353 = vector.load %arg9[%c0_155, %c0_156] : memref<1x256xf32, #tpu.memory_space<vmem>>, vector<1x256xf32>
    %354 = vector.broadcast %353 : vector<1x256xf32> to vector<8x256xf32>
    %355 = arith.addf %352, %354 : vector<8x256xf32>
    %356 = math.tanh %355 : vector<8x256xf32>
    %357 = vector.extract_strided_slice %356 {offsets = [0, 0], sizes = [8, 64], strides = [1, 1]} : vector<8x256xf32> to vector<8x64xf32>
    %cst_157 = arith.constant 1.000000e+00 : f32
    %358 = vector.broadcast %cst_157 : f32 to vector<8x64xf32>
    %359 = arith.addf %357, %358 : vector<8x64xf32>
    %cst_158 = arith.constant 5.000000e-01 : f32
    %360 = vector.broadcast %cst_158 : f32 to vector<8x64xf32>
    %361 = arith.mulf %360, %359 : vector<8x64xf32>
    %362 = vector.extract_strided_slice %356 {offsets = [0, 64], sizes = [8, 64], strides = [1, 1]} : vector<8x256xf32> to vector<8x64xf32>
    %cst_159 = arith.constant 1.000000e+00 : f32
    %363 = vector.broadcast %cst_159 : f32 to vector<8x64xf32>
    %364 = arith.addf %362, %363 : vector<8x64xf32>
    %cst_160 = arith.constant 5.000000e-01 : f32
    %365 = vector.broadcast %cst_160 : f32 to vector<8x64xf32>
    %366 = arith.mulf %365, %364 : vector<8x64xf32>
    %367 = vector.extract_strided_slice %356 {offsets = [0, 128], sizes = [8, 64], strides = [1, 1]} : vector<8x256xf32> to vector<8x64xf32>
    %368 = vector.extract_strided_slice %356 {offsets = [0, 192], sizes = [8, 64], strides = [1, 1]} : vector<8x256xf32> to vector<8x64xf32>
    %cst_161 = arith.constant 1.000000e+00 : f32
    %369 = vector.broadcast %cst_161 : f32 to vector<8x64xf32>
    %370 = arith.addf %368, %369 : vector<8x64xf32>
    %cst_162 = arith.constant 5.000000e-01 : f32
    %371 = vector.broadcast %cst_162 : f32 to vector<8x64xf32>
    %372 = arith.mulf %371, %370 : vector<8x64xf32>
    %373 = arith.mulf %366, %316 : vector<8x64xf32>
    %374 = arith.mulf %361, %367 : vector<8x64xf32>
    %375 = arith.addf %373, %374 : vector<8x64xf32>
    %376 = math.tanh %375 : vector<8x64xf32>
    %377 = arith.mulf %372, %376 : vector<8x64xf32>
    %378 = tpu.concatenate %377, %347 in 1 : vector<8x64xf32>, vector<8x64xf32> -> vector<8x128xf32>
    %379 = arith.truncf %378 : vector<8x128xf32> to vector<8x128xbf16>
    %c0_163 = arith.constant 0 : index
    %c0_164 = arith.constant 0 : index
    %380 = vector.load %arg10[%c0_163, %c0_164] : memref<128x256xbf16, #tpu.memory_space<vmem>>, vector<128x256xbf16>
    %cst_165 = arith.constant dense<0.000000e+00> : vector<8x256xf32>
    %381 = tpu.matmul %379, %380, %cst_165 {dimension_numbers = #tpu.dot_dimension_numbers<[1], [0], [0], [1], [0, 0, 1, 1], [], []>} : vector<8x128xbf16>, vector<128x256xbf16>, vector<8x256xf32> -> vector<8x256xf32>
    %c0_166 = arith.constant 0 : index
    %c0_167 = arith.constant 0 : index
    %382 = vector.load %arg11[%c0_166, %c0_167] : memref<1x256xf32, #tpu.memory_space<vmem>>, vector<1x256xf32>
    %383 = vector.broadcast %382 : vector<1x256xf32> to vector<8x256xf32>
    %384 = arith.addf %381, %383 : vector<8x256xf32>
    %385 = math.tanh %384 : vector<8x256xf32>
    %386 = vector.extract_strided_slice %385 {offsets = [0, 0], sizes = [8, 64], strides = [1, 1]} : vector<8x256xf32> to vector<8x64xf32>
    %cst_168 = arith.constant 1.000000e+00 : f32
    %387 = vector.broadcast %cst_168 : f32 to vector<8x64xf32>
    %388 = arith.addf %386, %387 : vector<8x64xf32>
    %cst_169 = arith.constant 5.000000e-01 : f32
    %389 = vector.broadcast %cst_169 : f32 to vector<8x64xf32>
    %390 = arith.mulf %389, %388 : vector<8x64xf32>
    %391 = vector.extract_strided_slice %385 {offsets = [0, 64], sizes = [8, 64], strides = [1, 1]} : vector<8x256xf32> to vector<8x64xf32>
    %cst_170 = arith.constant 1.000000e+00 : f32
    %392 = vector.broadcast %cst_170 : f32 to vector<8x64xf32>
    %393 = arith.addf %391, %392 : vector<8x64xf32>
    %cst_171 = arith.constant 5.000000e-01 : f32
    %394 = vector.broadcast %cst_171 : f32 to vector<8x64xf32>
    %395 = arith.mulf %394, %393 : vector<8x64xf32>
    %396 = vector.extract_strided_slice %385 {offsets = [0, 128], sizes = [8, 64], strides = [1, 1]} : vector<8x256xf32> to vector<8x64xf32>
    %397 = vector.extract_strided_slice %385 {offsets = [0, 192], sizes = [8, 64], strides = [1, 1]} : vector<8x256xf32> to vector<8x64xf32>
    %cst_172 = arith.constant 1.000000e+00 : f32
    %398 = vector.broadcast %cst_172 : f32 to vector<8x64xf32>
    %399 = arith.addf %397, %398 : vector<8x64xf32>
    %cst_173 = arith.constant 5.000000e-01 : f32
    %400 = vector.broadcast %cst_173 : f32 to vector<8x64xf32>
    %401 = arith.mulf %400, %399 : vector<8x64xf32>
    %402 = arith.mulf %395, %345 : vector<8x64xf32>
    %403 = arith.mulf %390, %396 : vector<8x64xf32>
    %404 = arith.addf %402, %403 : vector<8x64xf32>
    %405 = math.tanh %404 : vector<8x64xf32>
    %406 = arith.mulf %401, %405 : vector<8x64xf32>
    %c40_174 = arith.constant 40 : index
    %c0_175 = arith.constant 0 : index
    %407 = vector.load %arg18[%c40_174, %c0_175] : memref<64x64xf32, #tpu.memory_space<vmem>>, vector<8x64xf32>
    %408 = tpu.concatenate %407, %377 in 1 : vector<8x64xf32>, vector<8x64xf32> -> vector<8x128xf32>
    %409 = arith.truncf %408 : vector<8x128xf32> to vector<8x128xbf16>
    %c0_176 = arith.constant 0 : index
    %c0_177 = arith.constant 0 : index
    %410 = vector.load %arg8[%c0_176, %c0_177] : memref<128x256xbf16, #tpu.memory_space<vmem>>, vector<128x256xbf16>
    %cst_178 = arith.constant dense<0.000000e+00> : vector<8x256xf32>
    %411 = tpu.matmul %409, %410, %cst_178 {dimension_numbers = #tpu.dot_dimension_numbers<[1], [0], [0], [1], [0, 0, 1, 1], [], []>} : vector<8x128xbf16>, vector<128x256xbf16>, vector<8x256xf32> -> vector<8x256xf32>
    %c0_179 = arith.constant 0 : index
    %c0_180 = arith.constant 0 : index
    %412 = vector.load %arg9[%c0_179, %c0_180] : memref<1x256xf32, #tpu.memory_space<vmem>>, vector<1x256xf32>
    %413 = vector.broadcast %412 : vector<1x256xf32> to vector<8x256xf32>
    %414 = arith.addf %411, %413 : vector<8x256xf32>
    %415 = math.tanh %414 : vector<8x256xf32>
    %416 = vector.extract_strided_slice %415 {offsets = [0, 0], sizes = [8, 64], strides = [1, 1]} : vector<8x256xf32> to vector<8x64xf32>
    %cst_181 = arith.constant 1.000000e+00 : f32
    %417 = vector.broadcast %cst_181 : f32 to vector<8x64xf32>
    %418 = arith.addf %416, %417 : vector<8x64xf32>
    %cst_182 = arith.constant 5.000000e-01 : f32
    %419 = vector.broadcast %cst_182 : f32 to vector<8x64xf32>
    %420 = arith.mulf %419, %418 : vector<8x64xf32>
    %421 = vector.extract_strided_slice %415 {offsets = [0, 64], sizes = [8, 64], strides = [1, 1]} : vector<8x256xf32> to vector<8x64xf32>
    %cst_183 = arith.constant 1.000000e+00 : f32
    %422 = vector.broadcast %cst_183 : f32 to vector<8x64xf32>
    %423 = arith.addf %421, %422 : vector<8x64xf32>
    %cst_184 = arith.constant 5.000000e-01 : f32
    %424 = vector.broadcast %cst_184 : f32 to vector<8x64xf32>
    %425 = arith.mulf %424, %423 : vector<8x64xf32>
    %426 = vector.extract_strided_slice %415 {offsets = [0, 128], sizes = [8, 64], strides = [1, 1]} : vector<8x256xf32> to vector<8x64xf32>
    %427 = vector.extract_strided_slice %415 {offsets = [0, 192], sizes = [8, 64], strides = [1, 1]} : vector<8x256xf32> to vector<8x64xf32>
    %cst_185 = arith.constant 1.000000e+00 : f32
    %428 = vector.broadcast %cst_185 : f32 to vector<8x64xf32>
    %429 = arith.addf %427, %428 : vector<8x64xf32>
    %cst_186 = arith.constant 5.000000e-01 : f32
    %430 = vector.broadcast %cst_186 : f32 to vector<8x64xf32>
    %431 = arith.mulf %430, %429 : vector<8x64xf32>
    %432 = arith.mulf %425, %375 : vector<8x64xf32>
    %433 = arith.mulf %420, %426 : vector<8x64xf32>
    %434 = arith.addf %432, %433 : vector<8x64xf32>
    %435 = math.tanh %434 : vector<8x64xf32>
    %436 = arith.mulf %431, %435 : vector<8x64xf32>
    %437 = tpu.concatenate %436, %406 in 1 : vector<8x64xf32>, vector<8x64xf32> -> vector<8x128xf32>
    %438 = arith.truncf %437 : vector<8x128xf32> to vector<8x128xbf16>
    %c0_187 = arith.constant 0 : index
    %c0_188 = arith.constant 0 : index
    %439 = vector.load %arg10[%c0_187, %c0_188] : memref<128x256xbf16, #tpu.memory_space<vmem>>, vector<128x256xbf16>
    %cst_189 = arith.constant dense<0.000000e+00> : vector<8x256xf32>
    %440 = tpu.matmul %438, %439, %cst_189 {dimension_numbers = #tpu.dot_dimension_numbers<[1], [0], [0], [1], [0, 0, 1, 1], [], []>} : vector<8x128xbf16>, vector<128x256xbf16>, vector<8x256xf32> -> vector<8x256xf32>
    %c0_190 = arith.constant 0 : index
    %c0_191 = arith.constant 0 : index
    %441 = vector.load %arg11[%c0_190, %c0_191] : memref<1x256xf32, #tpu.memory_space<vmem>>, vector<1x256xf32>
    %442 = vector.broadcast %441 : vector<1x256xf32> to vector<8x256xf32>
    %443 = arith.addf %440, %442 : vector<8x256xf32>
    %444 = math.tanh %443 : vector<8x256xf32>
    %445 = vector.extract_strided_slice %444 {offsets = [0, 0], sizes = [8, 64], strides = [1, 1]} : vector<8x256xf32> to vector<8x64xf32>
    %cst_192 = arith.constant 1.000000e+00 : f32
    %446 = vector.broadcast %cst_192 : f32 to vector<8x64xf32>
    %447 = arith.addf %445, %446 : vector<8x64xf32>
    %cst_193 = arith.constant 5.000000e-01 : f32
    %448 = vector.broadcast %cst_193 : f32 to vector<8x64xf32>
    %449 = arith.mulf %448, %447 : vector<8x64xf32>
    %450 = vector.extract_strided_slice %444 {offsets = [0, 64], sizes = [8, 64], strides = [1, 1]} : vector<8x256xf32> to vector<8x64xf32>
    %cst_194 = arith.constant 1.000000e+00 : f32
    %451 = vector.broadcast %cst_194 : f32 to vector<8x64xf32>
    %452 = arith.addf %450, %451 : vector<8x64xf32>
    %cst_195 = arith.constant 5.000000e-01 : f32
    %453 = vector.broadcast %cst_195 : f32 to vector<8x64xf32>
    %454 = arith.mulf %453, %452 : vector<8x64xf32>
    %455 = vector.extract_strided_slice %444 {offsets = [0, 128], sizes = [8, 64], strides = [1, 1]} : vector<8x256xf32> to vector<8x64xf32>
    %456 = vector.extract_strided_slice %444 {offsets = [0, 192], sizes = [8, 64], strides = [1, 1]} : vector<8x256xf32> to vector<8x64xf32>
    %cst_196 = arith.constant 1.000000e+00 : f32
    %457 = vector.broadcast %cst_196 : f32 to vector<8x64xf32>
    %458 = arith.addf %456, %457 : vector<8x64xf32>
    %cst_197 = arith.constant 5.000000e-01 : f32
    %459 = vector.broadcast %cst_197 : f32 to vector<8x64xf32>
    %460 = arith.mulf %459, %458 : vector<8x64xf32>
    %461 = arith.mulf %454, %404 : vector<8x64xf32>
    %462 = arith.mulf %449, %455 : vector<8x64xf32>
    %463 = arith.addf %461, %462 : vector<8x64xf32>
    %464 = math.tanh %463 : vector<8x64xf32>
    %465 = arith.mulf %460, %464 : vector<8x64xf32>
    %c48_198 = arith.constant 48 : index
    %c0_199 = arith.constant 0 : index
    %466 = vector.load %arg18[%c48_198, %c0_199] : memref<64x64xf32, #tpu.memory_space<vmem>>, vector<8x64xf32>
    %467 = tpu.concatenate %466, %436 in 1 : vector<8x64xf32>, vector<8x64xf32> -> vector<8x128xf32>
    %468 = arith.truncf %467 : vector<8x128xf32> to vector<8x128xbf16>
    %c0_200 = arith.constant 0 : index
    %c0_201 = arith.constant 0 : index
    %469 = vector.load %arg8[%c0_200, %c0_201] : memref<128x256xbf16, #tpu.memory_space<vmem>>, vector<128x256xbf16>
    %cst_202 = arith.constant dense<0.000000e+00> : vector<8x256xf32>
    %470 = tpu.matmul %468, %469, %cst_202 {dimension_numbers = #tpu.dot_dimension_numbers<[1], [0], [0], [1], [0, 0, 1, 1], [], []>} : vector<8x128xbf16>, vector<128x256xbf16>, vector<8x256xf32> -> vector<8x256xf32>
    %c0_203 = arith.constant 0 : index
    %c0_204 = arith.constant 0 : index
    %471 = vector.load %arg9[%c0_203, %c0_204] : memref<1x256xf32, #tpu.memory_space<vmem>>, vector<1x256xf32>
    %472 = vector.broadcast %471 : vector<1x256xf32> to vector<8x256xf32>
    %473 = arith.addf %470, %472 : vector<8x256xf32>
    %474 = math.tanh %473 : vector<8x256xf32>
    %475 = vector.extract_strided_slice %474 {offsets = [0, 0], sizes = [8, 64], strides = [1, 1]} : vector<8x256xf32> to vector<8x64xf32>
    %cst_205 = arith.constant 1.000000e+00 : f32
    %476 = vector.broadcast %cst_205 : f32 to vector<8x64xf32>
    %477 = arith.addf %475, %476 : vector<8x64xf32>
    %cst_206 = arith.constant 5.000000e-01 : f32
    %478 = vector.broadcast %cst_206 : f32 to vector<8x64xf32>
    %479 = arith.mulf %478, %477 : vector<8x64xf32>
    %480 = vector.extract_strided_slice %474 {offsets = [0, 64], sizes = [8, 64], strides = [1, 1]} : vector<8x256xf32> to vector<8x64xf32>
    %cst_207 = arith.constant 1.000000e+00 : f32
    %481 = vector.broadcast %cst_207 : f32 to vector<8x64xf32>
    %482 = arith.addf %480, %481 : vector<8x64xf32>
    %cst_208 = arith.constant 5.000000e-01 : f32
    %483 = vector.broadcast %cst_208 : f32 to vector<8x64xf32>
    %484 = arith.mulf %483, %482 : vector<8x64xf32>
    %485 = vector.extract_strided_slice %474 {offsets = [0, 128], sizes = [8, 64], strides = [1, 1]} : vector<8x256xf32> to vector<8x64xf32>
    %486 = vector.extract_strided_slice %474 {offsets = [0, 192], sizes = [8, 64], strides = [1, 1]} : vector<8x256xf32> to vector<8x64xf32>
    %cst_209 = arith.constant 1.000000e+00 : f32
    %487 = vector.broadcast %cst_209 : f32 to vector<8x64xf32>
    %488 = arith.addf %486, %487 : vector<8x64xf32>
    %cst_210 = arith.constant 5.000000e-01 : f32
    %489 = vector.broadcast %cst_210 : f32 to vector<8x64xf32>
    %490 = arith.mulf %489, %488 : vector<8x64xf32>
    %491 = arith.mulf %484, %434 : vector<8x64xf32>
    %492 = arith.mulf %479, %485 : vector<8x64xf32>
    %493 = arith.addf %491, %492 : vector<8x64xf32>
    %494 = math.tanh %493 : vector<8x64xf32>
    %495 = arith.mulf %490, %494 : vector<8x64xf32>
    %496 = tpu.concatenate %495, %465 in 1 : vector<8x64xf32>, vector<8x64xf32> -> vector<8x128xf32>
    %497 = arith.truncf %496 : vector<8x128xf32> to vector<8x128xbf16>
    %c0_211 = arith.constant 0 : index
    %c0_212 = arith.constant 0 : index
    %498 = vector.load %arg10[%c0_211, %c0_212] : memref<128x256xbf16, #tpu.memory_space<vmem>>, vector<128x256xbf16>
    %cst_213 = arith.constant dense<0.000000e+00> : vector<8x256xf32>
    %499 = tpu.matmul %497, %498, %cst_213 {dimension_numbers = #tpu.dot_dimension_numbers<[1], [0], [0], [1], [0, 0, 1, 1], [], []>} : vector<8x128xbf16>, vector<128x256xbf16>, vector<8x256xf32> -> vector<8x256xf32>
    %c0_214 = arith.constant 0 : index
    %c0_215 = arith.constant 0 : index
    %500 = vector.load %arg11[%c0_214, %c0_215] : memref<1x256xf32, #tpu.memory_space<vmem>>, vector<1x256xf32>
    %501 = vector.broadcast %500 : vector<1x256xf32> to vector<8x256xf32>
    %502 = arith.addf %499, %501 : vector<8x256xf32>
    %503 = math.tanh %502 : vector<8x256xf32>
    %504 = vector.extract_strided_slice %503 {offsets = [0, 0], sizes = [8, 64], strides = [1, 1]} : vector<8x256xf32> to vector<8x64xf32>
    %cst_216 = arith.constant 1.000000e+00 : f32
    %505 = vector.broadcast %cst_216 : f32 to vector<8x64xf32>
    %506 = arith.addf %504, %505 : vector<8x64xf32>
    %cst_217 = arith.constant 5.000000e-01 : f32
    %507 = vector.broadcast %cst_217 : f32 to vector<8x64xf32>
    %508 = arith.mulf %507, %506 : vector<8x64xf32>
    %509 = vector.extract_strided_slice %503 {offsets = [0, 64], sizes = [8, 64], strides = [1, 1]} : vector<8x256xf32> to vector<8x64xf32>
    %cst_218 = arith.constant 1.000000e+00 : f32
    %510 = vector.broadcast %cst_218 : f32 to vector<8x64xf32>
    %511 = arith.addf %509, %510 : vector<8x64xf32>
    %cst_219 = arith.constant 5.000000e-01 : f32
    %512 = vector.broadcast %cst_219 : f32 to vector<8x64xf32>
    %513 = arith.mulf %512, %511 : vector<8x64xf32>
    %514 = vector.extract_strided_slice %503 {offsets = [0, 128], sizes = [8, 64], strides = [1, 1]} : vector<8x256xf32> to vector<8x64xf32>
    %515 = vector.extract_strided_slice %503 {offsets = [0, 192], sizes = [8, 64], strides = [1, 1]} : vector<8x256xf32> to vector<8x64xf32>
    %cst_220 = arith.constant 1.000000e+00 : f32
    %516 = vector.broadcast %cst_220 : f32 to vector<8x64xf32>
    %517 = arith.addf %515, %516 : vector<8x64xf32>
    %cst_221 = arith.constant 5.000000e-01 : f32
    %518 = vector.broadcast %cst_221 : f32 to vector<8x64xf32>
    %519 = arith.mulf %518, %517 : vector<8x64xf32>
    %520 = arith.mulf %513, %463 : vector<8x64xf32>
    %521 = arith.mulf %508, %514 : vector<8x64xf32>
    %522 = arith.addf %520, %521 : vector<8x64xf32>
    %523 = math.tanh %522 : vector<8x64xf32>
    %524 = arith.mulf %519, %523 : vector<8x64xf32>
    %c56_222 = arith.constant 56 : index
    %c0_223 = arith.constant 0 : index
    %525 = vector.load %arg18[%c56_222, %c0_223] : memref<64x64xf32, #tpu.memory_space<vmem>>, vector<8x64xf32>
    %526 = tpu.concatenate %525, %495 in 1 : vector<8x64xf32>, vector<8x64xf32> -> vector<8x128xf32>
    %527 = arith.truncf %526 : vector<8x128xf32> to vector<8x128xbf16>
    %c0_224 = arith.constant 0 : index
    %c0_225 = arith.constant 0 : index
    %528 = vector.load %arg8[%c0_224, %c0_225] : memref<128x256xbf16, #tpu.memory_space<vmem>>, vector<128x256xbf16>
    %cst_226 = arith.constant dense<0.000000e+00> : vector<8x256xf32>
    %529 = tpu.matmul %527, %528, %cst_226 {dimension_numbers = #tpu.dot_dimension_numbers<[1], [0], [0], [1], [0, 0, 1, 1], [], []>} : vector<8x128xbf16>, vector<128x256xbf16>, vector<8x256xf32> -> vector<8x256xf32>
    %c0_227 = arith.constant 0 : index
    %c0_228 = arith.constant 0 : index
    %530 = vector.load %arg9[%c0_227, %c0_228] : memref<1x256xf32, #tpu.memory_space<vmem>>, vector<1x256xf32>
    %531 = vector.broadcast %530 : vector<1x256xf32> to vector<8x256xf32>
    %532 = arith.addf %529, %531 : vector<8x256xf32>
    %533 = math.tanh %532 : vector<8x256xf32>
    %534 = vector.extract_strided_slice %533 {offsets = [0, 0], sizes = [8, 64], strides = [1, 1]} : vector<8x256xf32> to vector<8x64xf32>
    %cst_229 = arith.constant 1.000000e+00 : f32
    %535 = vector.broadcast %cst_229 : f32 to vector<8x64xf32>
    %536 = arith.addf %534, %535 : vector<8x64xf32>
    %cst_230 = arith.constant 5.000000e-01 : f32
    %537 = vector.broadcast %cst_230 : f32 to vector<8x64xf32>
    %538 = arith.mulf %537, %536 : vector<8x64xf32>
    %539 = vector.extract_strided_slice %533 {offsets = [0, 64], sizes = [8, 64], strides = [1, 1]} : vector<8x256xf32> to vector<8x64xf32>
    %cst_231 = arith.constant 1.000000e+00 : f32
    %540 = vector.broadcast %cst_231 : f32 to vector<8x64xf32>
    %541 = arith.addf %539, %540 : vector<8x64xf32>
    %cst_232 = arith.constant 5.000000e-01 : f32
    %542 = vector.broadcast %cst_232 : f32 to vector<8x64xf32>
    %543 = arith.mulf %542, %541 : vector<8x64xf32>
    %544 = vector.extract_strided_slice %533 {offsets = [0, 128], sizes = [8, 64], strides = [1, 1]} : vector<8x256xf32> to vector<8x64xf32>
    %545 = vector.extract_strided_slice %533 {offsets = [0, 192], sizes = [8, 64], strides = [1, 1]} : vector<8x256xf32> to vector<8x64xf32>
    %cst_233 = arith.constant 1.000000e+00 : f32
    %546 = vector.broadcast %cst_233 : f32 to vector<8x64xf32>
    %547 = arith.addf %545, %546 : vector<8x64xf32>
    %cst_234 = arith.constant 5.000000e-01 : f32
    %548 = vector.broadcast %cst_234 : f32 to vector<8x64xf32>
    %549 = arith.mulf %548, %547 : vector<8x64xf32>
    %550 = arith.mulf %543, %493 : vector<8x64xf32>
    %551 = arith.mulf %538, %544 : vector<8x64xf32>
    %552 = arith.addf %550, %551 : vector<8x64xf32>
    %553 = math.tanh %552 : vector<8x64xf32>
    %554 = arith.mulf %549, %553 : vector<8x64xf32>
    %555 = tpu.concatenate %554, %524 in 1 : vector<8x64xf32>, vector<8x64xf32> -> vector<8x128xf32>
    %556 = arith.truncf %555 : vector<8x128xf32> to vector<8x128xbf16>
    %c0_235 = arith.constant 0 : index
    %c0_236 = arith.constant 0 : index
    %557 = vector.load %arg10[%c0_235, %c0_236] : memref<128x256xbf16, #tpu.memory_space<vmem>>, vector<128x256xbf16>
    %cst_237 = arith.constant dense<0.000000e+00> : vector<8x256xf32>
    %558 = tpu.matmul %556, %557, %cst_237 {dimension_numbers = #tpu.dot_dimension_numbers<[1], [0], [0], [1], [0, 0, 1, 1], [], []>} : vector<8x128xbf16>, vector<128x256xbf16>, vector<8x256xf32> -> vector<8x256xf32>
    %c0_238 = arith.constant 0 : index
    %c0_239 = arith.constant 0 : index
    %559 = vector.load %arg11[%c0_238, %c0_239] : memref<1x256xf32, #tpu.memory_space<vmem>>, vector<1x256xf32>
    %560 = vector.broadcast %559 : vector<1x256xf32> to vector<8x256xf32>
    %561 = arith.addf %558, %560 : vector<8x256xf32>
    %562 = math.tanh %561 : vector<8x256xf32>
    %563 = vector.extract_strided_slice %562 {offsets = [0, 0], sizes = [8, 64], strides = [1, 1]} : vector<8x256xf32> to vector<8x64xf32>
    %cst_240 = arith.constant 1.000000e+00 : f32
    %564 = vector.broadcast %cst_240 : f32 to vector<8x64xf32>
    %565 = arith.addf %563, %564 : vector<8x64xf32>
    %cst_241 = arith.constant 5.000000e-01 : f32
    %566 = vector.broadcast %cst_241 : f32 to vector<8x64xf32>
    %567 = arith.mulf %566, %565 : vector<8x64xf32>
    %568 = vector.extract_strided_slice %562 {offsets = [0, 64], sizes = [8, 64], strides = [1, 1]} : vector<8x256xf32> to vector<8x64xf32>
    %cst_242 = arith.constant 1.000000e+00 : f32
    %569 = vector.broadcast %cst_242 : f32 to vector<8x64xf32>
    %570 = arith.addf %568, %569 : vector<8x64xf32>
    %cst_243 = arith.constant 5.000000e-01 : f32
    %571 = vector.broadcast %cst_243 : f32 to vector<8x64xf32>
    %572 = arith.mulf %571, %570 : vector<8x64xf32>
    %573 = vector.extract_strided_slice %562 {offsets = [0, 128], sizes = [8, 64], strides = [1, 1]} : vector<8x256xf32> to vector<8x64xf32>
    %574 = vector.extract_strided_slice %562 {offsets = [0, 192], sizes = [8, 64], strides = [1, 1]} : vector<8x256xf32> to vector<8x64xf32>
    %cst_244 = arith.constant 1.000000e+00 : f32
    %575 = vector.broadcast %cst_244 : f32 to vector<8x64xf32>
    %576 = arith.addf %574, %575 : vector<8x64xf32>
    %cst_245 = arith.constant 5.000000e-01 : f32
    %577 = vector.broadcast %cst_245 : f32 to vector<8x64xf32>
    %578 = arith.mulf %577, %576 : vector<8x64xf32>
    %579 = arith.mulf %572, %522 : vector<8x64xf32>
    %580 = arith.mulf %567, %573 : vector<8x64xf32>
    %581 = arith.addf %579, %580 : vector<8x64xf32>
    %582 = math.tanh %581 : vector<8x64xf32>
    %583 = arith.mulf %578, %582 : vector<8x64xf32>
    %584 = arith.truncf %583 : vector<8x64xf32> to vector<8x64xbf16>
    %c0_246 = arith.constant 0 : index
    %c0_247 = arith.constant 0 : index
    %585 = vector.load %arg12[%c0_246, %c0_247] : memref<64x128xbf16, #tpu.memory_space<vmem>>, vector<64x128xbf16>
    %cst_248 = arith.constant dense<0.000000e+00> : vector<8x128xf32>
    %586 = tpu.matmul %584, %585, %cst_248 {dimension_numbers = #tpu.dot_dimension_numbers<[1], [0], [0], [1], [0, 0, 1, 1], [], []>} : vector<8x64xbf16>, vector<64x128xbf16>, vector<8x128xf32> -> vector<8x128xf32>
    %c0_249 = arith.constant 0 : index
    %c0_250 = arith.constant 0 : index
    %587 = vector.load %arg13[%c0_249, %c0_250] : memref<1x128xf32, #tpu.memory_space<vmem>>, vector<1x128xf32>
    %588 = vector.broadcast %587 : vector<1x128xf32> to vector<8x128xf32>
    %589 = arith.addf %586, %588 : vector<8x128xf32>
    %cst_251 = arith.constant 0.000000e+00 : f32
    %590 = vector.broadcast %cst_251 : f32 to vector<8x128xf32>
    %591 = arith.maximumf %589, %590 : vector<8x128xf32>
    %592 = arith.truncf %591 : vector<8x128xf32> to vector<8x128xbf16>
    %c0_252 = arith.constant 0 : index
    %c0_253 = arith.constant 0 : index
    %593 = vector.load %arg14[%c0_252, %c0_253] : memref<128x128xbf16, #tpu.memory_space<vmem>>, vector<128x128xbf16>
    %cst_254 = arith.constant dense<0.000000e+00> : vector<8x128xf32>
    %594 = tpu.matmul %592, %593, %cst_254 {dimension_numbers = #tpu.dot_dimension_numbers<[1], [0], [0], [1], [0, 0, 1, 1], [], []>} : vector<8x128xbf16>, vector<128x128xbf16>, vector<8x128xf32> -> vector<8x128xf32>
    %c0_255 = arith.constant 0 : index
    %c0_256 = arith.constant 0 : index
    %595 = vector.load %arg15[%c0_255, %c0_256] : memref<1x128xf32, #tpu.memory_space<vmem>>, vector<1x128xf32>
    %596 = vector.broadcast %595 : vector<1x128xf32> to vector<8x128xf32>
    %597 = arith.addf %594, %596 : vector<8x128xf32>
    %cst_257 = arith.constant dense<0xFF800000> : vector<8xf32>
    %598 = vector.multi_reduction <maximumf>, %597, %cst_257 [1] : vector<8x128xf32> to vector<8xf32>
    %599 = vector.shape_cast %598 : vector<8xf32> to vector<8x1xf32>
    %600 = vector.broadcast %599 : vector<8x1xf32> to vector<8x128xf32>
    %601 = arith.subf %597, %600 : vector<8x128xf32>
    %602 = math.exp %601 : vector<8x128xf32>
    %cst_258 = arith.constant dense<0.000000e+00> : vector<8xf32>
    %603 = vector.multi_reduction <add>, %602, %cst_258 [1] : vector<8x128xf32> to vector<8xf32>
    %604 = vector.shape_cast %603 : vector<8xf32> to vector<8x1xf32>
    %605 = tpu.reciprocal %604 {approx = true} : vector<8x1xf32> -> vector<8x1xf32>
    %606 = vector.broadcast %605 : vector<8x1xf32> to vector<8x128xf32>
    %607 = arith.mulf %602, %606 : vector<8x128xf32>
    %c0_259 = arith.constant 0 : index
    %c0_260 = arith.constant 0 : index
    %608 = vector.load %arg16[%c0_259, %c0_260] : memref<8x128xf32, #tpu.memory_space<vmem>>, vector<8x128xf32>
    tpu.vector_store %arg16[%c0_259, %c0_260], %607 {strides = array<i32>} : memref<8x128xf32, #tpu.memory_space<vmem>>, vector<8x128xf32>,
    return
  }
}

</mosaic_0001>

<bundles_post_ra>
// kernel: conv_lstm12_forward.1
= control target key start
LH: loop header
LB: loop body
LE: loop exit
PB: predicated region body
PF: predicated region fallthrough
CT: control target
= control target key end

     0   :  { %vm155_vm0 = vcmask 1041408   ;;  %v2920_v2 = vmov 0   ;;  %vm130_vm1 = vcmask 293888   ;;  %vm256_vm2 = vcmask 261120   ;;  %s2922_s24 = smov 32   ;;  %s4345_s2 = inlined_call_operand.vmem [shape: bf16[36,32], index: 2, kind: input, shape index: {}]   ;;  %s4346_s0 = inlined_call_operand.vmem [shape: bf16[128,36], index: 0, kind: input, shape index: {}]   ;;  %s4347_s1 = inlined_call_operand.vmem [shape: f32[128,1], index: 1, kind: input, shape index: {}]   ;;  %s4348_s5 = inlined_call_operand.vmem [shape: bf16[96,64], index: 5, kind: input, shape index: {}]   ;;  %s4349_s3 = inlined_call_operand.vmem [shape: f32[1,32], index: 3, kind: input, shape index: {}]   ;;  %s4350_s4 = inlined_call_operand.vmem [shape: f32[1,32], index: 4, kind: input, shape index: {}]   ;;  %s4351_s8 = inlined_call_operand.vmem [shape: bf16[128,256], index: 8, kind: input, shape index: {}]   ;;  %s4352_s6 = inlined_call_operand.vmem [shape: f32[1,64], index: 6, kind: input, shape index: {}]   ;;  %s4353_s7 = inlined_call_operand.vmem [shape: f32[1,64], index: 7, kind: input, shape index: {}]   ;;  %s4354_s9 = inlined_call_operand.vmem [shape: f32[1,256], index: 9, kind: input, shape index: {}]   ;;  %s4355_s10 = inlined_call_operand.vmem [shape: bf16[128,256], index: 10, kind: input, shape index: {}]   ;;  %s4356_s11 = inlined_call_operand.vmem [shape: f32[1,256], index: 11, kind: input, shape index: {}]   ;;  %s4357_s12 = inlined_call_operand.vmem [shape: bf16[64,128], index: 12, kind: input, shape index: {}]   ;;  %s4358_s14 = inlined_call_operand.vmem [shape: bf16[128,128], index: 14, kind: input, shape index: {}]   ;;  %s4359_s13 = inlined_call_operand.vmem [shape: f32[1,128], index: 13, kind: input, shape index: {}]   ;;  %s4360_s15 = inlined_call_operand.vmem [shape: f32[1,128], index: 15, kind: input, shape index: {}]   ;;  %s4361_s16 = inlined_call_operand.vmem [shape: f32[8,128], index: 16, kind: output, shape index: {}]  }
   0x1   :  { %4363 = sst [smem:[#allocation4_spill]] %s4345_s2  ;;  %2706 = vset.pattern.permute.xlu1 %v2920_v2  ;;  %2705 = vset.pattern.permute.xlu0 %v2920_v2  ;;  %v2710_v4 = vld [vmem:[%s4346_s0] sm:$0xff]   ;;  %v2711_v6 = vld [vmem:[%s4346_s0 + $0x8] sm:$0xff]   ;;  %v437_v7 = vld [vmem:[%s4347_s1 + $0x10] sm:$0xff]  ;;  %vm548_vm3 = vcmask 785920   ;;  %v2921_v53 = vmov 0.0  }
   0x2   :  { %s4364_s23 = sld [smem:[#allocation4_spill]]  ;;  %2623 = vmatprep.mubr.msk.bf16.mxu0 %vm130_vm1, %v2710_v4  ;;  %v2712_v8 = vld [vmem:[%s4346_s0 + $0x10] sm:$0xff]   ;;  %463 = vperm.xlu1 %2706, %v437_v7   ;;  %v435_v9 = vld [vmem:[%s4347_s1] sm:$0xff]  ;;  %v438_v10 = vld [vmem:[%s4347_s1 + $0x18] sm:$0xff]  ;;  %547 = vst.msk [vmem:[#allocation2] sm:$0xff] %vm256_vm2, %v2921_v53  ;;  %vm629_vm4 = vcmask 523520  }
   0x3   :  { %453 = vperm.xlu0 %2705, %v435_v9   ;;  %v436_v11 = vld [vmem:[%s4347_s1 + $0x8] sm:$0xff]  ;;  %v439_v13 = vld [vmem:[%s4347_s1 + $0x20] sm:$0xff]  ;;  %v2713_v14 = vld [vmem:[%s4346_s0 + $0x18] sm:$0xff]   ;;  %549 = vst.msk [vmem:[#allocation2 + $0x78] sm:$0xff] %vm548_vm3, %v2921_v53  ;;  %vm778_vm5 = vcmask 785408   ;;  %vm900_vm6 = vcmask 523264  }
   0x4   :  { %v440_v12 = vld [vmem:[%s4347_s1 + $0x28] sm:$0xff]  ;;  %v2714_v15 = vld [vmem:[%s4346_s0 + $0x20] sm:$0xff]   ;;  %v442_v16 = vld [vmem:[%s4347_s1 + $0x38] sm:$0xff]  ;;  %vm2924_vm8 = vmmov 0  }
   0x5   :  { %v441_v17 = vld [vmem:[%s4347_s1 + $0x30] sm:$0xff]  ;;  %v444_v18 = vld [vmem:[%s4347_s1 + $0x48] sm:$0xff]  ;;  %v443_v19 = vld [vmem:[%s4347_s1 + $0x40] sm:$0xff] }
   0x6   :  { %468 = vperm.xlu1 %2706, %v438_v10   ;;  %v2715_v20 = vld [vmem:[%s4346_s0 + $0x28] sm:$0xff]   ;;  %v2716_v21 = vld [vmem:[%s4346_s0 + $0x30] sm:$0xff]   ;;  %v446_v22 = vld [vmem:[%s4347_s1 + $0x58] sm:$0xff] }
   0x7   :  { %458 = vperm.xlu0 %2705, %v436_v11   ;;  %v445_v23 = vld [vmem:[%s4347_s1 + $0x50] sm:$0xff]  ;;  %v2717_v24 = vld [vmem:[%s4346_s0 + $0x38] sm:$0xff]   ;;  %v448_v25 = vld [vmem:[%s4347_s1 + $0x68] sm:$0xff] }
   0x8   :  { %v2707_v0 = vld [vmem:[%s4364_s23 + $0x10] ss:$0 sps:$4 sm:$0x33]   ;;  %v2708_v1 = vld [vmem:[%s4364_s23 + $0x8] sm:$0xff]   ;;  %v2709_v5 = vld [vmem:[%s4364_s23] sm:$0xff]  }
   0x9   :  { %2699 = vmatprep.subr.msk.bf16.mxu0 %vm155_vm0, %v2707_v0  ;;  %v157_v3 = vsel %vm155_vm0, %v2707_v0, 0  ;;  %v447_v26 = vld [vmem:[%s4347_s1 + $0x60] sm:$0xff]  ;;  %v450_v27 = vld [vmem:[%s4347_s1 + $0x78] sm:$0xff]  ;;  %v449_v28 = vld [vmem:[%s4347_s1 + $0x70] sm:$0xff] }
   0xa   :  { %2618 = vmatpush3.bf16.msra.mxu0 %v157_v3  ;;  %478 = vperm.xlu1 %2706, %v440_v12   ;;  %vm3675_vm7 = vmpackc.low %vm900_vm6, %vm900_vm6 }
   0xb   :  { %2619 = vmatprep.subr.bf16.mxu0 %v2708_v1  ;;  %473 = vperm.xlu0 %2705, %v439_v13  }
   0xe   :  { %2620 = vmatpush3.bf16.msra.mxu0 %v2708_v1  ;;  %488 = vperm.xlu1 %2706, %v442_v16  }
   0xf   :  { %2621 = vmatprep.subr.bf16.mxu0 %v2709_v5  ;;  %483 = vperm.xlu0 %2705, %v441_v17  }
  0x12   :  { %2622 = vmatpush3.bf16.msra.mxu0 %v2709_v5  ;;  %498 = vperm.xlu1 %2706, %v444_v18  }
  0x13   :  { %493 = vperm.xlu0 %2705, %v443_v19  }
  0x15   :  { %2624 = vmatmul.mubr.msk.bf16.vlgmr.msra.gmra.mxu0 %vm130_vm1, %v2711_v6 }
  0x16   :  { %2627 = vmatprep.mubr.msk.bf16.mxu0 %vm130_vm1, %v2712_v8  ;;  %508 = vperm.xlu1 %2706, %v446_v22  }
  0x17   :  { %503 = vperm.xlu0 %2705, %v445_v23  }
  0x1a   :  { %518 = vperm.xlu1 %2706, %v448_v25  }
  0x1b   :  { %513 = vperm.xlu0 %2705, %v447_v26  }
  0x1d   :  { %2628 = vmatmul.mubr.msk.bf16.gmra.mxu0 %vm130_vm1, %v2713_v14 }
  0x1e   :  { %2631 = vmatprep.mubr.msk.bf16.mxu0 %vm130_vm1, %v2714_v15  ;;  %528 = vperm.xlu1 %2706, %v450_v27  }
  0x1f   :  { %523 = vperm.xlu0 %2705, %v449_v28  }
  0x25   :  { %2632 = vmatmul.mubr.msk.bf16.gmra.mxu0 %vm130_vm1, %v2715_v20 }
  0x26   :  { %2635 = vmatprep.mubr.msk.bf16.mxu0 %vm130_vm1, %v2716_v21 }
  0x2d   :  { %2636 = vmatmul.mubr.msk.bf16.gmra.mxu0 %vm130_vm1, %v2717_v24 }
  0x2e   :  { %1238 = vmatprep.mubr.bf16.mxu0 %v2920_v2 }
  0xd5   :  { %v3102_v29 = vpop.f32.mrf.mxu0 }
  0xd6   :  { %v260_v37 = vsel %vm256_vm2, %v3102_v29, 0.0 }
  0xd7   :  { %v3104_v30 = vpop.f32.mrf.mxu0 }
  0xd8   :  { %v257_v33 = vsel %vm256_vm2, %v3104_v30, 0.0 }
  0xd9   :  { %v3106_v31 = vpop.f32.mrf.mxu0 }
  0xda   :  { %v262_v40 = vsel %vm256_vm2, %v3106_v31, 0.0 }
  0xdb   :  { %v3108_v32 = vpop.f32.mrf.mxu0 }
  0xdc   :  { %v258_v34 = vsel %vm256_vm2, %v3108_v32, 0.0 }
  0xdd   :  { %v259_v35 = vadd.f32 %v258_v34, %v257_v33  ;;  %v3114_v36 = vpop.f32.mrf.mxu0 }
  0xde   :  { %v268_v49 = vsel %vm256_vm2, %v3114_v36, 0.0 }
  0xdf   :  { %v261_v38 = vadd.f32 %v260_v37, %v259_v35  ;;  %v3118_v39 = vpop.f32.mrf.mxu0 }
  0xe0   :  { %v264_v43 = vsel %vm256_vm2, %v3118_v39, 0.0 }
  0xe1   :  { %v263_v41 = vadd.f32 %v262_v40, %v261_v38  ;;  %v3122_v42 = vpop.f32.mrf.mxu0 }
  0xe2   :  { %v270_v52 = vsel %vm256_vm2, %v3122_v42, 0.0 }
  0xe3   :  { %v265_v44 = vadd.f32 %v264_v43, %v263_v41  ;;  %v3126_v45 = vpop.f32.mrf.mxu0 }
  0xe4   :  { %v266_v46 = vsel %vm256_vm2, %v3126_v45, 0.0 }
  0xe5   :  { %v267_v47 = vadd.f32 %v266_v46, %v265_v44  ;;  %v3130_v48 = vpop.f32.mrf.mxu0 }
  0xe6   :  { %v276_v62 = vsel %vm256_vm2, %v3130_v48, 0.0 }
  0xe7   :  { %v269_v50 = vadd.f32 %v268_v49, %v267_v47  ;;  %v3134_v51 = vpop.f32.mrf.mxu0 }
  0xe8   :  { %v272_v56 = vsel %vm256_vm2, %v3134_v51, 0.0 }
  0xe9   :  { %v271_v54 = vadd.f32 %v270_v52, %v269_v50  ;;  %v3142_v55 = vpop.f32.mrf.mxu0 }
  0xea   :  { %v278_v1 = vsel %vm256_vm2, %v3142_v55, 0.0 }
  0xeb   :  { %v273_v57 = vadd.f32 %v272_v56, %v271_v54  ;;  %v3146_v58 = vpop.f32.mrf.mxu0 }
  0xec   :  { %v274_v59 = vsel %vm256_vm2, %v3146_v58, 0.0 }
  0xed   :  { %v275_v60 = vadd.f32 %v274_v59, %v273_v57  ;;  %v3150_v61 = vpop.f32.mrf.mxu0 }
  0xee   :  { %v284_v10 = vsel %vm256_vm2, %v3150_v61, 0.0 }
  0xef   :  { %v277_v63 = vadd.f32 %v276_v62, %v275_v60  ;;  %v3154_v0 = vpop.f32.mrf.mxu0 }
  0xf0   :  { %v280_v5 = vsel %vm256_vm2, %v3154_v0, 0.0 }
  0xf1   :  { %v279_v3 = vadd.f32 %v278_v1, %v277_v63  ;;  %v3158_v4 = vpop.f32.mrf.mxu0 }
  0xf2   :  { %v286_v12 = vsel %vm256_vm2, %v3158_v4, 0.0 }
  0xf3   :  { %v281_v6 = vadd.f32 %v280_v5, %v279_v3  ;;  %v3162_v7 = vpop.f32.mrf.mxu0 }
  0xf4   :  { %v282_v8 = vsel %vm256_vm2, %v3162_v7, 0.0 }
  0xf5   :  { %v283_v9 = vadd.f32 %v282_v8, %v281_v6 }
  0xf7   :  { %v285_v11 = vadd.f32 %v284_v10, %v283_v9  ;;  %v2718_v10 = vld [vmem:[%s4348_s5 + $0x28] sm:$0xff]  }
  0xf8   :  { %2639 = vmatprep.subr.bf16.mxu1 %v2718_v10 }
  0xf9   :  { %v287_v13 = vadd.f32 %v286_v12, %v285_v11  ;;  %2640 = vmatpush3.bf16.msra.mxu1 %v2718_v10  ;;  %v373_v10 = vlaneseq }
  0xfb   :  { %v288_v14 = vrot.slane %v287_v13, 4 }
  0xfd   :  { %v289_v15 = vadd.f32 %v288_v14, %v287_v13 }
  0xff   :  { %v290_v16 = vrot.slane %v289_v15, 2 }
 0x101   :  { %v291_v17 = vadd.f32 %v290_v16, %v289_v15 }
 0x103   :  { %v292_v18 = vrot.slane %v291_v17, 1 }
 0x105   :  { %v293_v19 = vadd.f32 %v292_v18, %v291_v17 }
 0x107   :  { %v3170_v20 = vmul.f32 0.015625, %v293_v19 }
 0x109   :  { %v295_v21 = vsub.f32 %v3104_v30, %v3170_v20  ;;  %v296_v22 = vsub.f32 %v3108_v32, %v3170_v20  ;;  %v297_v23 = vsub.f32 %v3102_v29, %v3170_v20  ;;  %v298_v24 = vsub.f32 %v3106_v31, %v3170_v20 }
 0x10a   :  { %v299_v27 = vsub.f32 %v3118_v39, %v3170_v20  ;;  %v300_v33 = vsub.f32 %v3126_v45, %v3170_v20  ;;  %v301_v40 = vsub.f32 %v3114_v36, %v3170_v20  ;;  %v302_v41 = vsub.f32 %v3122_v42, %v3170_v20 }
 0x10b   :  { %v311_v25 = vmul.f32 %v295_v21, %v295_v21  ;;  %v312_v26 = vmul.f32 %v296_v22, %v296_v22  ;;  %v313_v28 = vmul.f32 %v297_v23, %v297_v23  ;;  %v314_v34 = vmul.f32 %v298_v24, %v298_v24 }
 0x10c   :  { %v315_v43 = vmul.f32 %v299_v27, %v299_v27  ;;  %v303_v46 = vsub.f32 %v3134_v51, %v3170_v20  ;;  %v316_v49 = vmul.f32 %v300_v33, %v300_v33  ;;  %v317_v54 = vmul.f32 %v301_v40, %v301_v40 }
 0x10d   :  { %v327_v35 = vsel %vm256_vm2, %v311_v25, 0.0  ;;  %v328_v37 = vsel %vm256_vm2, %v312_v26, 0.0  ;;  %v330_v44 = vsel %vm256_vm2, %v313_v28, 0.0  ;;  %v332_v50 = vsel %vm256_vm2, %v314_v34, 0.0 }
 0x10e   :  { %v329_v38 = vadd.f32 %v328_v37, %v327_v35  ;;  %v318_v56 = vmul.f32 %v302_v41, %v302_v41  ;;  %v334_v57 = vsel %vm256_vm2, %v315_v43, 0.0  ;;  %v319_v59 = vmul.f32 %v303_v46, %v303_v46 }
 0x10f   :  { %v304_v62 = vsub.f32 %v3146_v58, %v3170_v20  ;;  %v336_v63 = vsel %vm256_vm2, %v316_v49, 0.0  ;;  %v305_v3 = vsub.f32 %v3130_v48, %v3170_v20  ;;  %v338_v5 = vsel %vm256_vm2, %v317_v54, 0.0 }
 0x110   :  { %v331_v47 = vadd.f32 %v330_v44, %v329_v38  ;;  %v340_v6 = vsel %vm256_vm2, %v318_v56, 0.0  ;;  %v342_v9 = vsel %vm256_vm2, %v319_v59, 0.0  ;;  %v306_v11 = vsub.f32 %v3142_v55, %v3170_v20  ;;  %v3225_v59 = vpop.permute.xlu0 %453 }
 0x111   :  { %v320_v12 = vmul.f32 %v304_v62, %v304_v62  ;;  %v307_v14 = vsub.f32 %v3154_v0, %v3170_v20  ;;  %v321_v15 = vmul.f32 %v305_v3, %v305_v3  ;;  %v308_v17 = vsub.f32 %v3162_v7, %v3170_v20  ;;  %v464_v3 = vpop.permute.xlu1 %463 }
 0x112   :  { %v333_v52 = vadd.f32 %v332_v50, %v331_v47  ;;  %v322_v18 = vmul.f32 %v306_v11, %v306_v11  ;;  %v309_v22 = vsub.f32 %v3150_v61, %v3170_v20  ;;  %v310_v26 = vsub.f32 %v3158_v4, %v3170_v20 }
 0x113   :  { %v344_v19 = vsel %vm256_vm2, %v320_v12, 0.0  ;;  %v323_v23 = vmul.f32 %v307_v14, %v307_v14  ;;  %v346_v24 = vsel %vm256_vm2, %v321_v15, 0.0  ;;  %v324_v27 = vmul.f32 %v308_v17, %v308_v17  ;;  %v368_v14 = vld [vmem:[%s4349_s3] sm:$0x1] }
 0x114   :  { %v335_v60 = vadd.f32 %v334_v57, %v333_v52  ;;  %v348_v28 = vsel %vm256_vm2, %v322_v18, 0.0  ;;  %v325_v34 = vmul.f32 %v309_v22, %v309_v22  ;;  %v326_v38 = vmul.f32 %v310_v26, %v310_v26 }
 0x115   :  { %v350_v35 = vsel %vm256_vm2, %v323_v23, 0.0  ;;  %v352_v40 = vsel %vm256_vm2, %v324_v27, 0.0  ;;  %v364_v56 = vmul.f32 %v3170_v20, %v3170_v20  ;;  %v3231_v11 = vshrl.u32 %v373_v10, 7 }
 0x116   :  { %v337_v1 = vadd.f32 %v336_v63, %v335_v60  ;;  %v354_v43 = vsel %vm256_vm2, %v325_v34, 0.0  ;;  %v356_v46 = vsel %vm256_vm2, %v326_v38, 0.0 }
 0x117   :  { %v365_v62 = vmul.f32 64.0, %v364_v56  ;;  %v3237_v15 = vsub.s32 0, %v3231_v11 }
 0x118   :  { %v339_v8 = vadd.f32 %v338_v5, %v337_v1  ;;  %v3227_v5 = vpop.permute.xlu0 %458 }
 0x11a   :  { %v341_v13 = vadd.f32 %v340_v6, %v339_v8  ;;  %v469_v8 = vpop.permute.xlu1 %468 }
 0x11c   :  { %v343_v16 = vadd.f32 %v342_v9, %v341_v13  ;;  %v3229_v9 = vpop.permute.xlu0 %473 }
 0x11e   :  { %v345_v21 = vadd.f32 %v344_v19, %v343_v16  ;;  %v479_v12 = vpop.permute.xlu1 %478 }
 0x120   :  { %v347_v25 = vadd.f32 %v346_v24, %v345_v21  ;;  %v484_v13 = vpop.permute.xlu0 %483  ;;  %v394_v21 = vld [vmem:[%s4350_s4] sm:$0x1] }
 0x121   :  { %v2719_v24 = vld [vmem:[%s4348_s5 + $0x20] sm:$0xff]  }
 0x122   :  { %v349_v33 = vadd.f32 %v348_v28, %v347_v25  ;;  %v489_v18 = vpop.permute.xlu1 %488  ;;  %2641 = vmatprep.subr.bf16.mxu1 %v2719_v24 }
 0x123   :  { %2642 = vmatpush3.bf16.msra.mxu1 %v2719_v24 }
 0x124   :  { %v351_v37 = vadd.f32 %v350_v35, %v349_v33  ;;  %v3239_v19 = vpop.permute.xlu0 %493 }
 0x126   :  { %v353_v41 = vadd.f32 %v352_v40, %v351_v37 }
 0x128   :  { %v355_v44 = vadd.f32 %v354_v43, %v353_v41  ;;  %v3278_v37 = vpop.permute.xlu0 %503 }
 0x12a   :  { %v357_v47 = vadd.f32 %v356_v46, %v355_v44 }
 0x12c   :  { %v358_v49 = vrot.slane %v357_v47, 4  ;;  %v514_v10 = vpop.permute.xlu0 %513 }
 0x12e   :  { %v359_v50 = vadd.f32 %v358_v49, %v357_v47 }
 0x130   :  { %v360_v52 = vrot.slane %v359_v50, 2 }
 0x132   :  { %v361_v54 = vadd.f32 %v360_v52, %v359_v50  ;;  %v2721_v50 = vld [vmem:[%s4348_s5 + $0x10] sm:$0xff]  }
 0x134   :  { %v362_v57 = vrot.slane %v361_v54, 1 }
 0x136   :  { %v363_v60 = vadd.f32 %v362_v57, %v361_v54 }
 0x138   :  { %v366_v63 = vsub.f32 %v363_v60, %v365_v62 }
 0x13a   :  { %v367_v1 = vmul.f32 0.015625, %v366_v63 }
 0x13c   :  { %v369_v6 = vadd.f32 1e-05, %v367_v1 }
 0x13e   :  { %2784 = vrsqrt.f32 %v369_v6 }
 0x14b   :  { %v2785_v16 = vpop.eup %2784 }
 0x14c   :  { %v371_v17 = vmul.f32 %v2785_v16, %v368_v14 }
 0x14e   :  { %v3245_v22 = vrot.slane %v371_v17, %v3237_v15  ;;  %v395_v23 = vmul.f32 %v371_v17, %v3170_v20 }
 0x150   :  { %v3253_v25 = vmul.f32 %v3245_v22, %v3162_v7  ;;  %v396_v26 = vsub.f32 %v394_v21, %v395_v23  ;;  %v380_v27 = vmul.f32 %v3102_v29, %v3245_v22  ;;  %v378_v28 = vmul.f32 %v3245_v22, %v3104_v30 }
 0x151   :  { %v381_v33 = vmul.f32 %v3106_v31, %v3245_v22  ;;  %v379_v20 = vmul.f32 %v3245_v22, %v3108_v32  ;;  %v383_v34 = vmul.f32 %v3245_v22, %v3126_v45  ;;  %v382_v7 = vmul.f32 %v3245_v22, %v3118_v39  ;;  %v3274_v31 = vpop.permute.xlu1 %498  ;;  %v2720_v39 = vld [vmem:[%s4348_s5 + $0x18] sm:$0xff]  }
 0x152   :  { %v3268_v35 = vrot.slane %v396_v26, %v3237_v15  ;;  %v385_v29 = vmul.f32 %v3122_v42, %v3245_v22  ;;  %v384_v30 = vmul.f32 %v3114_v36, %v3245_v22  ;;  %v387_v32 = vmul.f32 %v3245_v22, %v3146_v58  ;;  %2643 = vmatprep.subr.bf16.mxu1 %v2720_v39 }
 0x153   :  { %v386_v45 = vmul.f32 %v3245_v22, %v3134_v51  ;;  %v389_v42 = vmul.f32 %v3142_v55, %v3245_v22  ;;  %v388_v36 = vmul.f32 %v3130_v48, %v3245_v22  ;;  %v390_v38 = vmul.f32 %v3245_v22, %v3154_v0  ;;  %2644 = vmatpush3.bf16.msra.mxu1 %v2720_v39 }
 0x154   :  { %v405_v58 = vadd.f32 %v3268_v35, %v380_v27  ;;  %v403_v40 = vadd.f32 %v3268_v35, %v378_v28  ;;  %v406_v41 = vadd.f32 %v3268_v35, %v381_v33  ;;  %v404_v43 = vadd.f32 %v3268_v35, %v379_v20  ;;  %2645 = vmatprep.subr.bf16.mxu1 %v2721_v50 }
 0x155   :  { %v408_v51 = vadd.f32 %v3268_v35, %v383_v34  ;;  %v407_v44 = vadd.f32 %v3268_v35, %v382_v7  ;;  %v410_v55 = vadd.f32 %v3268_v35, %v385_v29  ;;  %v409_v48 = vadd.f32 %v3268_v35, %v384_v30  ;;  %v509_v6 = vpop.permute.xlu1 %508  ;;  %v524_v30 = vpop.permute.xlu0 %523 }
 0x156   :  { %v421_v46 = vmax.f32 %v405_v58, 0.0  ;;  %v419_v0 = vmax.f32 %v403_v40, 0.0  ;;  %v422_v47 = vmax.f32 %v406_v41, 0.0  ;;  %v420_v49 = vmax.f32 %v404_v43, 0.0 }
 0x157   :  { %v424_v52 = vmax.f32 %v408_v51, 0.0  ;;  %v423_v54 = vmax.f32 %v407_v44, 0.0  ;;  %v426_v56 = vmax.f32 %v410_v55, 0.0  ;;  %v425_v57 = vmax.f32 %v409_v48, 0.0  ;;  %2646 = vmatpush3.bf16.msra.mxu1 %v2721_v50 }
 0x158   :  { %v533_v60 = vmul.f32 %v464_v3, %v421_v46  ;;  %v531_v62 = vmul.f32 %v3225_v59, %v419_v0  ;;  %v3303_v63 = vmul.f32 %v469_v8, %v422_v47  ;;  %v532_v1 = vmul.f32 %v3227_v5, %v420_v49 }
 0x159   :  { %v3306_v14 = vmul.f32 %v479_v12, %v424_v52  ;;  %v535_v16 = vmul.f32 %v3229_v9, %v423_v54  ;;  %v3309_v17 = vmul.f32 %v489_v18, %v426_v56  ;;  %v537_v21 = vmul.f32 %v484_v13, %v425_v57  ;;  %v2722_v9 = vld [vmem:[%s4348_s5 + $0x8] sm:$0xff]  }
 0x15a   :  { %552 = vst.msk [vmem:[#allocation2 + $0x18] sm:$0xff] %vm256_vm2, %v533_v60  ;;  %550 = vst.msk [vmem:[#allocation2 + $0x8] sm:$0xff] %vm256_vm2, %v531_v62  ;;  %v412_v59 = vadd.f32 %v3268_v35, %v387_v32  ;;  %v411_v3 = vadd.f32 %v3268_v35, %v386_v45  ;;  %v414_v5 = vadd.f32 %v3268_v35, %v389_v42  ;;  %583 = vrot.lane.b32.xlu1 %v532_v1, %s2922_s24  ;;  %v2723_v32 = vld [vmem:[%s4348_s5] sm:$0xff]   ;;  %s2923_s5 = smov 64  }
 0x15b   :  { %553 = vst.msk [vmem:[#allocation2 + $0x20] sm:$0xff] %vm256_vm2, %v3303_v63  ;;  %551 = vst.msk [vmem:[#allocation2 + $0x10] sm:$0xff] %vm256_vm2, %v532_v1  ;;  %v413_v8 = vadd.f32 %v3268_v35, %v388_v36  ;;  %v416_v12 = vadd.f32 %v3268_v35, %v3253_v25  ;;  %v415_v13 = vadd.f32 %v3268_v35, %v390_v38  ;;  %581 = vrot.lane.b32.xlu0 %v531_v62, %s2922_s24 }
 0x15c   :  { %555 = vst.msk [vmem:[#allocation2 + $0x30] sm:$0xff] %vm256_vm2, %v3306_v14  ;;  %554 = vst.msk [vmem:[#allocation2 + $0x28] sm:$0xff] %vm256_vm2, %v535_v16  ;;  %v392_v18 = vmul.f32 %v3150_v61, %v3245_v22  ;;  %v428_v23 = vmax.f32 %v412_v59, 0.0  ;;  %v427_v24 = vmax.f32 %v411_v3, 0.0  ;;  %v430_v26 = vmax.f32 %v414_v5, 0.0  ;;  %2647 = vmatprep.subr.bf16.mxu1 %v2722_v9  ;;  %v519_v61 = vpop.permute.xlu1 %518 }
 0x15d   :  { %557 = vst.msk [vmem:[#allocation2 + $0x40] sm:$0xff] %vm256_vm2, %v3309_v17  ;;  %556 = vst.msk [vmem:[#allocation2 + $0x38] sm:$0xff] %vm256_vm2, %v537_v21  ;;  %v429_v27 = vmax.f32 %v413_v8, 0.0  ;;  %v432_v28 = vmax.f32 %v416_v12, 0.0  ;;  %v431_v33 = vmax.f32 %v415_v13, 0.0  ;;  %2648 = vmatpush3.bf16.msra.mxu1 %v2722_v9 }
 0x15e   :  { %v417_v20 = vadd.f32 %v3268_v35, %v392_v18  ;;  %v540_v34 = vmul.f32 %v3274_v31, %v428_v23  ;;  %v539_v25 = vmul.f32 %v3239_v19, %v427_v24  ;;  %v542_v7 = vmul.f32 %v509_v6, %v430_v26  ;;  %587 = vrot.lane.b32.xlu1 %v3303_v63, %s2922_s24 }
 0x15f   :  { %v541_v29 = vmul.f32 %v3278_v37, %v429_v27  ;;  %v544_v39 = vmul.f32 %v519_v61, %v432_v28  ;;  %v543_v45 = vmul.f32 %v514_v10, %v431_v33  ;;  %585 = vrot.lane.b32.xlu0 %v533_v60, %s2922_s24  ;;  %2649 = vmatprep.subr.bf16.mxu1 %v2723_v32 }
 0x160   :  { %v433_v42 = vmax.f32 %v417_v20, 0.0  ;;  %559 = vst.msk [vmem:[#allocation2 + $0x50] sm:$0xff] %vm256_vm2, %v540_v34  ;;  %558 = vst.msk [vmem:[#allocation2 + $0x48] sm:$0xff] %vm256_vm2, %v539_v25  ;;  %v393_v31 = vmul.f32 %v3158_v4, %v3245_v22  ;;  %v529_v38 = vpop.permute.xlu1 %528 }
 0x161   :  { %561 = vst.msk [vmem:[#allocation2 + $0x60] sm:$0xff] %vm256_vm2, %v542_v7  ;;  %560 = vst.msk [vmem:[#allocation2 + $0x58] sm:$0xff] %vm256_vm2, %v541_v29  ;;  %2650 = vmatpush3.bf16.msra.mxu1 %v2723_v32 }
 0x162   :  { %563 = vst.msk [vmem:[#allocation2 + $0x70] sm:$0xff] %vm256_vm2, %v544_v39  ;;  %562 = vst.msk [vmem:[#allocation2 + $0x68] sm:$0xff] %vm256_vm2, %v543_v45  ;;  %v545_v19 = vmul.f32 %v524_v30, %v433_v42  ;;  %648 = vrot.lane.b32.xlu1 %v533_v60, %s2923_s5  ;;  %v418_v37 = vadd.f32 %v3268_v35, %v393_v31 }
 0x163   :  { %646 = vrot.lane.b32.xlu0 %v532_v1, %s2923_s5 }
 0x164   :  { %564 = vst.msk [vmem:[#allocation2 + $0x78] sm:$0xff] %vm256_vm2, %v545_v19  ;;  %v434_v36 = vmax.f32 %v418_v37, 0.0 }
 0x166   :  { %652 = vrot.lane.b32.xlu1 %v535_v16, %s2923_s5  ;;  %v546_v58 = vmul.f32 %v529_v38, %v434_v36 }
 0x167   :  { %650 = vrot.lane.b32.xlu0 %v3303_v63, %s2923_s5 }
 0x16a   :  { %591 = vrot.lane.b32.xlu1 %v3306_v14, %s2922_s24 }
 0x16b   :  { %589 = vrot.lane.b32.xlu0 %v535_v16, %s2922_s24 }
 0x16e   :  { %595 = vrot.lane.b32.xlu1 %v3309_v17, %s2922_s24 }
 0x16f   :  { %593 = vrot.lane.b32.xlu0 %v537_v21, %s2922_s24 }
 0x172   :  { %656 = vrot.lane.b32.xlu1 %v537_v21, %s2923_s5 }
 0x173   :  { %654 = vrot.lane.b32.xlu0 %v3306_v14, %s2923_s5 }
 0x176   :  { %660 = vrot.lane.b32.xlu1 %v539_v25, %s2923_s5 }
 0x177   :  { %658 = vrot.lane.b32.xlu0 %v3309_v17, %s2923_s5 }
 0x17a   :  { %599 = vrot.lane.b32.xlu1 %v540_v34, %s2922_s24 }
 0x17b   :  { %597 = vrot.lane.b32.xlu0 %v539_v25, %s2922_s24 }
 0x17e   :  { %603 = vrot.lane.b32.xlu1 %v542_v7, %s2922_s24 }
 0x17f   :  { %601 = vrot.lane.b32.xlu0 %v541_v29, %s2922_s24 }
 0x182   :  { %664 = vrot.lane.b32.xlu1 %v541_v29, %s2923_s5 }
 0x183   :  { %662 = vrot.lane.b32.xlu0 %v540_v34, %s2923_s5 }
 0x186   :  { %668 = vrot.lane.b32.xlu1 %v543_v45, %s2923_s5 }
 0x187   :  { %666 = vrot.lane.b32.xlu0 %v542_v7, %s2923_s5 }
 0x18a   :  { %607 = vrot.lane.b32.xlu1 %v544_v39, %s2922_s24 }
 0x18b   :  { %605 = vrot.lane.b32.xlu0 %v543_v45, %s2922_s24 }
 0x18e   :  { %670 = vrot.lane.b32.xlu1 %v544_v39, %s2923_s5 }
 0x18f   :  { %609 = vrot.lane.b32.xlu0 %v545_v19, %s2922_s24 }
 0x192   :  { %611 = vrot.lane.b32.xlu1 %v546_v58, %s2922_s24 }
 0x193   :  { %672 = vrot.lane.b32.xlu0 %v545_v19, %s2923_s5 }
 0x197   :  { %674 = vrot.lane.b32.xlu0 %v546_v58, %s2923_s5 }
 0x1cc   :  { %v584_v4 = vpop.permute.xlu1 %583 }
 0x1cd   :  { %631 = vst.msk [vmem:[#allocation2 + $0x8] sm:$0xff] %vm629_vm4, %v584_v4  ;;  %v582_v22 = vpop.permute.xlu0 %581 }
 0x1ce   :  { %630 = vst.msk [vmem:[#allocation2] sm:$0xff] %vm629_vm4, %v582_v22  ;;  %v3443_v22 = vld [vmem:[%s4351_s8 + $0x74] ss:$8 sps:$4 sm:$0xff]  }
 0x1cf   :  { %1206 = vmatprep.subr.bf16.mxu0 %v3443_v22 }
 0x1d0   :  { %v588_v35 = vpop.permute.xlu1 %587 }
 0x1d1   :  { %633 = vst.msk [vmem:[#allocation2 + $0x18] sm:$0xff] %vm629_vm4, %v588_v35  ;;  %v586_v40 = vpop.permute.xlu0 %585 }
 0x1d2   :  { %632 = vst.msk [vmem:[#allocation2 + $0x10] sm:$0xff] %vm629_vm4, %v586_v40  ;;  %v3450_v40 = vld [vmem:[%s4351_s8 + $0x70] ss:$8 sps:$4 sm:$0xff]  }
 0x1d3   :  { %1207 = vmatpush1.bf16.msra.mxu0 %v3450_v40 }
 0x1d4   :  { %v649_v41 = vpop.permute.xlu1 %648 }
 0x1d5   :  { %692 = vst.msk [vmem:[#allocation2 + $0x8] sm:$0xff] %vm548_vm3, %v649_v41  ;;  %v647_v43 = vpop.permute.xlu0 %646 }
 0x1d6   :  { %691 = vst.msk [vmem:[#allocation2] sm:$0xff] %vm548_vm3, %v647_v43 }
 0x1d8   :  { %v653_v51 = vpop.permute.xlu1 %652 }
 0x1d9   :  { %694 = vst.msk [vmem:[#allocation2 + $0x18] sm:$0xff] %vm548_vm3, %v653_v51  ;;  %v651_v44 = vpop.permute.xlu0 %650  ;;  %v3459_v51 = vld [vmem:[%s4351_s8 + $0x64] ss:$8 sps:$4 sm:$0xff]  }
 0x1da   :  { %693 = vst.msk [vmem:[#allocation2 + $0x10] sm:$0xff] %vm548_vm3, %v651_v44  ;;  %1208 = vmatprep.subr.bf16.mxu0 %v3459_v51 }
 0x1dc   :  { %v592_v55 = vpop.permute.xlu1 %591  ;;  %v707_v48 = vld [vmem:[#allocation2 + $0x8] sm:$0xff] }
 0x1dd   :  { %635 = vst.msk [vmem:[#allocation2 + $0x28] sm:$0xff] %vm629_vm4, %v592_v55  ;;  %v590_v46 = vpop.permute.xlu0 %589  ;;  %v706_v0 = vld [vmem:[#allocation2] sm:$0xff] }
 0x1de   :  { %634 = vst.msk [vmem:[#allocation2 + $0x20] sm:$0xff] %vm629_vm4, %v590_v46  ;;  %v722_v47 = vpack.c.bf16 %v707_v48, %v706_v0  ;;  %v3466_v55 = vld [vmem:[%s4351_s8 + $0x60] ss:$8 sps:$4 sm:$0xff]   ;;  %v3475_v0 = vld [vmem:[%s4351_s8 + $0x54] ss:$8 sps:$4 sm:$0xff]  }
 0x1df   :  { %1209 = vmatpush1.bf16.msra.mxu0 %v3466_v55 }
 0x1e0   :  { %2651 = vmatprep.mubr.msk.bf16.mxu1 %vm778_vm5, %v722_v47  ;;  %v596_v49 = vpop.permute.xlu1 %595  ;;  %v709_v50 = vld [vmem:[#allocation2 + $0x18] sm:$0xff]  ;;  %1210 = vmatprep.subr.bf16.mxu0 %v3475_v0 }
 0x1e1   :  { %637 = vst.msk [vmem:[#allocation2 + $0x38] sm:$0xff] %vm629_vm4, %v596_v49  ;;  %v594_v52 = vpop.permute.xlu0 %593  ;;  %v708_v54 = vld [vmem:[#allocation2 + $0x10] sm:$0xff] }
 0x1e2   :  { %636 = vst.msk [vmem:[#allocation2 + $0x30] sm:$0xff] %vm629_vm4, %v594_v52  ;;  %v723_v56 = vpack.c.bf16 %v709_v50, %v708_v54  ;;  %v3482_v49 = vld [vmem:[%s4351_s8 + $0x50] ss:$8 sps:$4 sm:$0xff]  }
 0x1e3   :  { %1211 = vmatpush1.bf16.msra.mxu0 %v3482_v49 }
 0x1e4   :  { %2652 = vmatmul.mubr.msk.bf16.vlgmr.msra.gmra.mxu1 %vm778_vm5, %v723_v56  ;;  %v657_v57 = vpop.permute.xlu1 %656 }
 0x1e5   :  { %696 = vst.msk [vmem:[#allocation2 + $0x28] sm:$0xff] %vm548_vm3, %v657_v57  ;;  %v655_v60 = vpop.permute.xlu0 %654  ;;  %v3495_v57 = vld [vmem:[%s4351_s8 + $0x44] ss:$8 sps:$4 sm:$0xff]  }
 0x1e6   :  { %695 = vst.msk [vmem:[#allocation2 + $0x20] sm:$0xff] %vm548_vm3, %v655_v60  ;;  %1212 = vmatprep.subr.bf16.mxu0 %v3495_v57 }
 0x1e8   :  { %v661_v62 = vpop.permute.xlu1 %660 }
 0x1e9   :  { %698 = vst.msk [vmem:[#allocation2 + $0x38] sm:$0xff] %vm548_vm3, %v661_v62  ;;  %v659_v63 = vpop.permute.xlu0 %658  ;;  %v3500_v62 = vld [vmem:[%s4351_s8 + $0x40] ss:$8 sps:$4 sm:$0xff]  }
 0x1ea   :  { %697 = vst.msk [vmem:[#allocation2 + $0x30] sm:$0xff] %vm548_vm3, %v659_v63  ;;  %1213 = vmatpush1.bf16.msra.mxu0 %v3500_v62 }
 0x1ec   :  { %v600_v1 = vpop.permute.xlu1 %599  ;;  %v711_v6 = vld [vmem:[#allocation2 + $0x28] sm:$0xff] }
 0x1ed   :  { %639 = vst.msk [vmem:[#allocation2 + $0x48] sm:$0xff] %vm629_vm4, %v600_v1  ;;  %v598_v10 = vpop.permute.xlu0 %597  ;;  %v710_v14 = vld [vmem:[#allocation2 + $0x20] sm:$0xff] }
 0x1ee   :  { %638 = vst.msk [vmem:[#allocation2 + $0x40] sm:$0xff] %vm629_vm4, %v598_v10  ;;  %v724_v16 = vpack.c.bf16 %v711_v6, %v710_v14  ;;  %v3509_v6 = vld [vmem:[%s4351_s8 + $0x34] ss:$8 sps:$4 sm:$0xff]   ;;  %v3514_v10 = vld [vmem:[%s4351_s8 + $0x30] ss:$8 sps:$4 sm:$0xff]  }
 0x1ef   :  { %1214 = vmatprep.subr.bf16.mxu0 %v3509_v6 }
 0x1f0   :  { %2655 = vmatprep.mubr.msk.bf16.mxu1 %vm778_vm5, %v724_v16  ;;  %v604_v17 = vpop.permute.xlu1 %603  ;;  %v713_v21 = vld [vmem:[#allocation2 + $0x38] sm:$0xff]  ;;  %v3521_v16 = vld [vmem:[%s4351_s8 + $0x24] ss:$8 sps:$4 sm:$0xff]   ;;  %1215 = vmatpush1.bf16.msra.mxu0 %v3514_v10 }
 0x1f1   :  { %641 = vst.msk [vmem:[#allocation2 + $0x58] sm:$0xff] %vm629_vm4, %v604_v17  ;;  %v602_v59 = vpop.permute.xlu0 %601  ;;  %v712_v3 = vld [vmem:[#allocation2 + $0x30] sm:$0xff]  ;;  %1216 = vmatprep.subr.bf16.mxu0 %v3521_v16 }
 0x1f2   :  { %640 = vst.msk [vmem:[#allocation2 + $0x50] sm:$0xff] %vm629_vm4, %v602_v59  ;;  %v725_v5 = vpack.c.bf16 %v713_v21, %v712_v3  ;;  %v3532_v3 = vld [vmem:[%s4351_s8 + $0x20] ss:$8 sps:$4 sm:$0xff]  }
 0x1f4   :  { %2656 = vmatmul.mubr.msk.bf16.gmra.mxu1 %vm778_vm5, %v725_v5  ;;  %v665_v8 = vpop.permute.xlu1 %664  ;;  %v3538_v5 = vld [vmem:[%s4351_s8 + $0x14] ss:$8 sps:$4 sm:$0xff]   ;;  %1217 = vmatpush1.bf16.msra.mxu0 %v3532_v3 }
 0x1f5   :  { %700 = vst.msk [vmem:[#allocation2 + $0x48] sm:$0xff] %vm548_vm3, %v665_v8  ;;  %v663_v9 = vpop.permute.xlu0 %662  ;;  %1218 = vmatprep.subr.bf16.mxu0 %v3538_v5 }
 0x1f6   :  { %699 = vst.msk [vmem:[#allocation2 + $0x40] sm:$0xff] %vm548_vm3, %v663_v9 }
 0x1f8   :  { %v669_v12 = vpop.permute.xlu1 %668 }
 0x1f9   :  { %702 = vst.msk [vmem:[#allocation2 + $0x58] sm:$0xff] %vm548_vm3, %v669_v12  ;;  %v667_v13 = vpop.permute.xlu0 %666 }
 0x1fa   :  { %701 = vst.msk [vmem:[#allocation2 + $0x50] sm:$0xff] %vm548_vm3, %v667_v13 }
 0x1fc   :  { %v608_v18 = vpop.permute.xlu1 %607  ;;  %v715_v23 = vld [vmem:[#allocation2 + $0x48] sm:$0xff] }
 0x1fd   :  { %643 = vst.msk [vmem:[#allocation2 + $0x68] sm:$0xff] %vm629_vm4, %v608_v18  ;;  %v606_v24 = vpop.permute.xlu0 %605  ;;  %v714_v26 = vld [vmem:[#allocation2 + $0x40] sm:$0xff]  ;;  %v3550_v18 = vld [vmem:[%s4351_s8 + $0x10] ss:$8 sps:$4 sm:$0xff]  }
 0x1fe   :  { %642 = vst.msk [vmem:[#allocation2 + $0x60] sm:$0xff] %vm629_vm4, %v606_v24  ;;  %v726_v27 = vpack.c.bf16 %v715_v23, %v714_v26  ;;  %v3558_v24 = vld [vmem:[%s4351_s8 + $0x4] ss:$8 sps:$4 sm:$0xff]   ;;  %1219 = vmatpush1.bf16.msra.mxu0 %v3550_v18 }
 0x1ff   :  { %1220 = vmatprep.subr.bf16.mxu0 %v3558_v24 }
 0x200   :  { %2659 = vmatprep.mubr.msk.bf16.mxu1 %vm778_vm5, %v726_v27  ;;  %v671_v28 = vpop.permute.xlu1 %670  ;;  %v717_v33 = vld [vmem:[#allocation2 + $0x58] sm:$0xff] }
 0x201   :  { %703 = vst.msk [vmem:[#allocation2 + $0x60] sm:$0xff] %vm548_vm3, %v671_v28  ;;  %v610_v20 = vpop.permute.xlu0 %609  ;;  %v716_v34 = vld [vmem:[#allocation2 + $0x50] sm:$0xff]  ;;  %v3564_v28 = vld [vmem:[%s4351_s8] ss:$8 sps:$4 sm:$0xff]  }
 0x202   :  { %644 = vst.msk [vmem:[#allocation2 + $0x70] sm:$0xff] %vm629_vm4, %v610_v20  ;;  %v727_v25 = vpack.c.bf16 %v717_v33, %v716_v34  ;;  %1221 = vmatpush1.bf16.msra.mxu0 %v3564_v28 }
 0x203   :  { %1435 = vmatprep.subr.bf16.mxu0 %v3443_v22 }
 0x204   :  { %2660 = vmatmul.mubr.msk.bf16.gmra.mxu1 %vm778_vm5, %v727_v25  ;;  %v612_v7 = vpop.permute.xlu1 %611 }
 0x205   :  { %645 = vst.msk [vmem:[#allocation2 + $0x78] sm:$0xff] %vm629_vm4, %v612_v7  ;;  %v673_v29 = vpop.permute.xlu0 %672 }
 0x206   :  { %704 = vst.msk [vmem:[#allocation2 + $0x68] sm:$0xff] %vm548_vm3, %v673_v29 }
 0x208   :  { %v718_v30 = vld [vmem:[#allocation2 + $0x60] sm:$0xff] }
 0x209   :  { %v675_v61 = vpop.permute.xlu0 %674 }
 0x20a   :  { %705 = vst.msk [vmem:[#allocation2 + $0x70] sm:$0xff] %vm548_vm3, %v675_v61 }
 0x20c   :  { %v721_v42 = vld [vmem:[#allocation2 + $0x78] sm:$0xff] }
 0x20d   :  { %v719_v32 = vld [vmem:[#allocation2 + $0x68] sm:$0xff] }
 0x20e   :  { %v728_v39 = vpack.c.bf16 %v719_v32, %v718_v30 }
 0x210   :  { %2663 = vmatprep.mubr.msk.bf16.mxu1 %vm778_vm5, %v728_v39 }
 0x211   :  { %v720_v45 = vld [vmem:[#allocation2 + $0x70] sm:$0xff] }
 0x212   :  { %v729_v19 = vpack.c.bf16 %v721_v42, %v720_v45 }
 0x214   :  { %2664 = vmatmul.mubr.msk.bf16.gmra.mxu1 %vm778_vm5, %v729_v19 }
 0x215   :  { %1408 = vmatprep.mubr.bf16.mxu1 %v2920_v2 }
 0x2a4   :  { %v3428_v31 = vpop.f32.mrf.mxu1 }
 0x2a5   :  { %v904_v48 = vsel %vm900_vm6, %v3428_v31, 0.0 }
 0x2a6   :  { %v3430_v37 = vpop.f32.mrf.mxu1 }
 0x2a7   :  { %v901_v41 = vsel %vm900_vm6, %v3430_v37, 0.0 }
 0x2a8   :  { %v3432_v36 = vpop.f32.mrf.mxu1 }
 0x2a9   :  { %v906_v50 = vsel %vm900_vm6, %v3432_v36, 0.0 }
 0x2aa   :  { %v3434_v38 = vpop.f32.mrf.mxu1 }
 0x2ab   :  { %v902_v4 = vsel %vm900_vm6, %v3434_v38, 0.0 }
 0x2ac   :  { %v903_v43 = vadd.f32 %v902_v4, %v901_v41 }
 0x2ae   :  { %v905_v46 = vadd.f32 %v904_v48, %v903_v43 }
 0x2b0   :  { %v907_v54 = vadd.f32 %v906_v50, %v905_v46 }
 0x2b4   :  { %v3436_v58 = vpop.f32.mrf.mxu1 }
 0x2b5   :  { %v912_v17 = vsel %vm900_vm6, %v3436_v58, 0.0 }
 0x2b6   :  { %v3445_v35 = vpop.f32.mrf.mxu1 }
 0x2b7   :  { %v908_v52 = vsel %vm900_vm6, %v3445_v35, 0.0 }
 0x2b8   :  { %v3461_v44 = vpop.f32.mrf.mxu1  ;;  %v909_v60 = vadd.f32 %v908_v52, %v907_v54 }
 0x2b9   :  { %v914_v9 = vsel %vm900_vm6, %v3461_v44, 0.0 }
 0x2ba   :  { %v3477_v47 = vpop.f32.mrf.mxu1 }
 0x2bb   :  { %v910_v56 = vsel %vm900_vm6, %v3477_v47, 0.0 }
 0x2bc   :  { %v911_v63 = vadd.f32 %v910_v56, %v909_v60 }
 0x2be   :  { %v913_v21 = vadd.f32 %v912_v17, %v911_v63 }
 0x2c0   :  { %v915_v13 = vadd.f32 %v914_v9, %v913_v21 }
 0x2c4   :  { %v3503_v1 = vpop.f32.mrf.mxu1 }
 0x2c5   :  { %v920_v33 = vsel %vm900_vm6, %v3503_v1, 0.0 }
 0x2c6   :  { %v3516_v14 = vpop.f32.mrf.mxu1 }
 0x2c7   :  { %v916_v12 = vsel %vm900_vm6, %v3516_v14, 0.0 }
 0x2c8   :  { %v3526_v59 = vpop.f32.mrf.mxu1  ;;  %v917_v26 = vadd.f32 %v916_v12, %v915_v13 }
 0x2c9   :  { %v922_v7 = vsel %vm900_vm6, %v3526_v59, 0.0 }
 0x2ca   :  { %v3540_v8 = vpop.f32.mrf.mxu1 }
 0x2cb   :  { %v918_v23 = vsel %vm900_vm6, %v3540_v8, 0.0 }
 0x2cc   :  { %v919_v27 = vadd.f32 %v918_v23, %v917_v26 }
 0x2ce   :  { %v921_v20 = vadd.f32 %v920_v33, %v919_v27 }
 0x2d0   :  { %v923_v61 = vadd.f32 %v922_v7, %v921_v20 }
 0x2d4   :  { %v3569_v34 = vpop.f32.mrf.mxu1 }
 0x2d5   :  { %v928_v19 = vsel %vm900_vm6, %v3569_v34, 0.0 }
 0x2d6   :  { %v3573_v25 = vpop.f32.mrf.mxu1 }
 0x2d7   :  { %v924_v29 = vsel %vm900_vm6, %v3573_v25, 0.0 }
 0x2d8   :  { %v3579_v30 = vpop.f32.mrf.mxu1  ;;  %v925_v32 = vadd.f32 %v924_v29, %v923_v61 }
 0x2d9   :  { %v930_v41 = vsel %vm900_vm6, %v3579_v30, 0.0 }
 0x2da   :  { %v3581_v39 = vpop.f32.mrf.mxu1 }
 0x2db   :  { %v926_v45 = vsel %vm900_vm6, %v3581_v39, 0.0 }
 0x2dc   :  { %v927_v42 = vadd.f32 %v926_v45, %v925_v32 }
 0x2de   :  { %v929_v4 = vadd.f32 %v928_v19, %v927_v42 }
 0x2e0   :  { %v931_v43 = vadd.f32 %v930_v41, %v929_v4 }
 0x2e2   :  { %v932_v48 = vrot.slane %v931_v43, 4 }
 0x2e4   :  { %v933_v46 = vadd.f32 %v932_v48, %v931_v43 }
 0x2e6   :  { %v934_v50 = vrot.slane %v933_v46, 2 }
 0x2e8   :  { %v935_v52 = vadd.f32 %v934_v50, %v933_v46 }
 0x2ea   :  { %v936_v54 = vrot.slane %v935_v52, 1 }
 0x2ec   :  { %v937_v56 = vadd.f32 %v936_v54, %v935_v52 }
 0x2ee   :  { %v3589_v60 = vmul.f32 0.015625, %v937_v56 }
 0x2f0   :  { %v939_v63 = vsub.f32 %v3430_v37, %v3589_v60  ;;  %v940_v17 = vsub.f32 %v3434_v38, %v3589_v60  ;;  %v941_v21 = vsub.f32 %v3428_v31, %v3589_v60  ;;  %v942_v9 = vsub.f32 %v3432_v36, %v3589_v60 }
 0x2f1   :  { %v943_v23 = vsub.f32 %v3445_v35, %v3589_v60  ;;  %v944_v27 = vsub.f32 %v3477_v47, %v3589_v60  ;;  %v945_v61 = vsub.f32 %v3436_v58, %v3589_v60  ;;  %v946_v19 = vsub.f32 %v3461_v44, %v3589_v60 }
 0x2f2   :  { %v955_v12 = vmul.f32 %v939_v63, %v939_v63  ;;  %v956_v13 = vmul.f32 %v940_v17, %v940_v17  ;;  %v957_v26 = vmul.f32 %v941_v21, %v941_v21  ;;  %v958_v33 = vmul.f32 %v942_v9, %v942_v9 }
 0x2f3   :  { %v959_v32 = vmul.f32 %v943_v23, %v943_v23  ;;  %v960_v4 = vmul.f32 %v944_v27, %v944_v27  ;;  %v947_v48 = vsub.f32 %v3516_v14, %v3589_v60  ;;  %v961_v46 = vmul.f32 %v945_v61, %v945_v61 }
 0x2f4   :  { %v971_v20 = vsel %vm900_vm6, %v955_v12, 0.0  ;;  %v972_v7 = vsel %vm900_vm6, %v956_v13, 0.0  ;;  %v974_v45 = vsel %vm900_vm6, %v957_v26, 0.0  ;;  %v976_v41 = vsel %vm900_vm6, %v958_v33, 0.0 }
 0x2f5   :  { %v973_v29 = vadd.f32 %v972_v7, %v971_v20  ;;  %v978_v50 = vsel %vm900_vm6, %v959_v32, 0.0  ;;  %v948_v54 = vsub.f32 %v3540_v8, %v3589_v60  ;;  %v962_v56 = vmul.f32 %v946_v19, %v946_v19 }
 0x2f6   :  { %v980_v63 = vsel %vm900_vm6, %v960_v4, 0.0  ;;  %v949_v21 = vsub.f32 %v3503_v1, %v3589_v60  ;;  %v963_v9 = vmul.f32 %v947_v48, %v947_v48  ;;  %v982_v12 = vsel %vm900_vm6, %v961_v46, 0.0 }
 0x2f7   :  { %v975_v42 = vadd.f32 %v974_v45, %v973_v29  ;;  %v950_v23 = vsub.f32 %v3526_v59, %v3589_v60  ;;  %v964_v26 = vmul.f32 %v948_v54, %v948_v54  ;;  %v984_v27 = vsel %vm900_vm6, %v962_v56, 0.0 }
 0x2f8   :  { %v951_v20 = vsub.f32 %v3573_v25, %v3589_v60  ;;  %v965_v7 = vmul.f32 %v949_v21, %v949_v21  ;;  %v986_v29 = vsel %vm900_vm6, %v963_v9, 0.0  ;;  %v952_v32 = vsub.f32 %v3581_v39, %v3589_v60 }
 0x2f9   :  { %v977_v43 = vadd.f32 %v976_v41, %v975_v42  ;;  %v966_v45 = vmul.f32 %v950_v23, %v950_v23  ;;  %v988_v42 = vsel %vm900_vm6, %v964_v26, 0.0  ;;  %v953_v4 = vsub.f32 %v3569_v34, %v3589_v60 }
 0x2fa   :  { %v967_v41 = vmul.f32 %v951_v20, %v951_v20  ;;  %v954_v46 = vsub.f32 %v3579_v30, %v3589_v60 }
 0x2fb   :  { %v979_v52 = vadd.f32 %v978_v50, %v977_v43  ;;  %v990_v43 = vsel %vm900_vm6, %v965_v7, 0.0  ;;  %v968_v50 = vmul.f32 %v952_v32, %v952_v32  ;;  %v969_v56 = vmul.f32 %v953_v4, %v953_v4 }
 0x2fc   :  { %v970_v21 = vmul.f32 %v954_v46, %v954_v46 }
 0x2fd   :  { %v981_v17 = vadd.f32 %v980_v63, %v979_v52  ;;  %v992_v52 = vsel %vm900_vm6, %v966_v45, 0.0  ;;  %v994_v63 = vsel %vm900_vm6, %v967_v41, 0.0  ;;  %v996_v9 = vsel %vm900_vm6, %v968_v50, 0.0  ;;  %v1038_v50 = vld [vmem:[%s4353_s7] sm:$0x1] }
 0x2fe   :  { %v1000_v26 = vsel %vm900_vm6, %v970_v21, 0.0 }
 0x2ff   :  { %v983_v13 = vadd.f32 %v982_v12, %v981_v17 }
 0x301   :  { %v985_v33 = vadd.f32 %v984_v27, %v983_v13  ;;  %v998_v13 = vsel %vm900_vm6, %v969_v56, 0.0 }
 0x303   :  { %v987_v61 = vadd.f32 %v986_v29, %v985_v33 }
 0x305   :  { %v989_v19 = vadd.f32 %v988_v42, %v987_v61  ;;  %v1008_v61 = vmul.f32 %v3589_v60, %v3589_v60 }
 0x307   :  { %v991_v48 = vadd.f32 %v990_v43, %v989_v19  ;;  %v1009_v42 = vmul.f32 64.0, %v1008_v61  ;;  %v1012_v43 = vld [vmem:[%s4352_s6] sm:$0x1] }
 0x309   :  { %v993_v54 = vadd.f32 %v992_v52, %v991_v48 }
 0x30b   :  { %v995_v17 = vadd.f32 %v994_v63, %v993_v54 }
 0x30d   :  { %v997_v12 = vadd.f32 %v996_v9, %v995_v17 }
 0x30f   :  { %v999_v23 = vadd.f32 %v998_v13, %v997_v12 }
 0x311   :  { %v1001_v27 = vadd.f32 %v1000_v26, %v999_v23 }
 0x313   :  { %v1002_v33 = vrot.slane %v1001_v27, 4 }
 0x315   :  { %v1003_v20 = vadd.f32 %v1002_v33, %v1001_v27 }
 0x317   :  { %v1004_v7 = vrot.slane %v1003_v20, 2 }
 0x319   :  { %v1005_v29 = vadd.f32 %v1004_v7, %v1003_v20 }
 0x31b   :  { %v1006_v32 = vrot.slane %v1005_v29, 1 }
 0x31d   :  { %v1007_v45 = vadd.f32 %v1006_v32, %v1005_v29 }
 0x31f   :  { %v1010_v19 = vsub.f32 %v1007_v45, %v1009_v42 }
 0x321   :  { %v1011_v4 = vmul.f32 0.015625, %v1010_v19 }
 0x323   :  { %v1013_v41 = vadd.f32 1e-05, %v1011_v4 }
 0x325   :  { %2786 = vrsqrt.f32 %v1013_v41 }
 0x332   :  { %v2787_v48 = vpop.eup %2786 }
 0x333   :  { %v1015_v46 = vmul.f32 %v2787_v48, %v1012_v43 }
 0x335   :  { %v1020_v52 = vrot.slane %v1015_v46, %v3237_v15  ;;  %v1039_v54 = vmul.f32 %v1015_v46, %v3589_v60 }
 0x337   :  { %v1034_v56 = vmul.f32 %v1020_v52, %v3573_v25  ;;  %v1035_v63 = vmul.f32 %v1020_v52, %v3581_v39  ;;  %v1040_v17 = vsub.f32 %v1038_v50, %v1039_v54  ;;  %v1022_v21 = vmul.f32 %v1020_v52, %v3430_v37 }
 0x338   :  { %v1023_v9 = vmul.f32 %v1020_v52, %v3434_v38  ;;  %v1024_v12 = vmul.f32 %v3428_v31, %v1020_v52  ;;  %v1025_v13 = vmul.f32 %v3432_v36, %v1020_v52  ;;  %v1026_v23 = vmul.f32 %v1020_v52, %v3445_v35 }
 0x339   :  { %v1045_v26 = vrot.slane %v1040_v17, %v3237_v15  ;;  %v1027_v27 = vmul.f32 %v1020_v52, %v3477_v47  ;;  %v1028_v60 = vmul.f32 %v3436_v58, %v1020_v52  ;;  %v1029_v25 = vmul.f32 %v3461_v44, %v1020_v52 }
 0x33a   :  { %v1030_v39 = vmul.f32 %v1020_v52, %v3516_v14  ;;  %v1031_v37 = vmul.f32 %v1020_v52, %v3540_v8  ;;  %v1032_v38 = vmul.f32 %v3503_v1, %v1020_v52  ;;  %v1033_v31 = vmul.f32 %v3526_v59, %v1020_v52 }
 0x33b   :  { %v1059_v33 = vadd.f32 %v1045_v26, %v1034_v56  ;;  %v1060_v36 = vadd.f32 %v1045_v26, %v1035_v63  ;;  %v1047_v20 = vadd.f32 %v1045_v26, %v1022_v21  ;;  %v1048_v35 = vadd.f32 %v1045_v26, %v1023_v9 }
 0x33c   :  { %v1049_v7 = vadd.f32 %v1045_v26, %v1024_v12  ;;  %v1050_v29 = vadd.f32 %v1045_v26, %v1025_v13  ;;  %v1051_v61 = vadd.f32 %v1045_v26, %v1026_v23  ;;  %v1052_v47 = vadd.f32 %v1045_v26, %v1027_v27 }
 0x33d   :  { %v1075_v32 = vmax.f32 %v1059_v33, 0.0  ;;  %v1076_v58 = vmax.f32 %v1060_v36, 0.0  ;;  %v1063_v45 = vmax.f32 %v1047_v20, 0.0  ;;  %v1064_v44 = vmax.f32 %v1048_v35, 0.0 }
 0x33e   :  { %v1065_v42 = vmax.f32 %v1049_v7, 0.0  ;;  %v1066_v14 = vmax.f32 %v1050_v29, 0.0  ;;  %v1067_v19 = vmax.f32 %v1051_v61, 0.0  ;;  %v1068_v8 = vmax.f32 %v1052_v47, 0.0 }
 0x33f   :  { %v1091_v4 = vmax.f32 %v1075_v32, %v1076_v58  ;;  %v1079_v1 = vmax.f32 %v1063_v45, %v1064_v44  ;;  %v1053_v41 = vadd.f32 %v1045_v26, %v1028_v60  ;;  %v1054_v59 = vadd.f32 %v1045_v26, %v1029_v25 }
 0x340   :  { %v1081_v43 = vmax.f32 %v1065_v42, %v1066_v14  ;;  %v1083_v48 = vmax.f32 %v1067_v19, %v1068_v8  ;;  %v1055_v46 = vadd.f32 %v1045_v26, %v1030_v39  ;;  %v1056_v50 = vadd.f32 %v1045_v26, %v1031_v37 }
 0x341   :  { %1092 = vst.msk [vmem:[#allocation3 + $0x30] sm:$0xff] %vm900_vm6, %v1091_v4  ;;  %1080 = vst.msk [vmem:[#allocation3] sm:$0xff] %vm900_vm6, %v1079_v1  ;;  %v1069_v54 = vmax.f32 %v1053_v41, 0.0  ;;  %v1070_v56 = vmax.f32 %v1054_v59, 0.0  ;;  %v1057_v63 = vadd.f32 %v1045_v26, %v1032_v38  ;;  %v1058_v17 = vadd.f32 %v1045_v26, %v1033_v31  ;;  %v3716_v4 = vld [vmem:[%s4355_s10 + $0x74] ss:$8 sps:$4 sm:$0xff]  }
 0x342   :  { %1082 = vst.msk [vmem:[#allocation3 + $0x8] sm:$0xff] %vm900_vm6, %v1081_v43  ;;  %1084 = vst.msk [vmem:[#allocation3 + $0x10] sm:$0xff] %vm900_vm6, %v1083_v48  ;;  %v1071_v21 = vmax.f32 %v1055_v46, 0.0  ;;  %v1072_v9 = vmax.f32 %v1056_v50, 0.0  ;;  %v1036_v12 = vmul.f32 %v3569_v34, %v1020_v52  ;;  %v1037_v13 = vmul.f32 %v3579_v30, %v1020_v52  ;;  %v3721_v1 = vld [vmem:[%s4355_s10 + $0x70] ss:$8 sps:$4 sm:$0xff]   ;;  %1376 = vmatprep.subr.bf16.mxu1 %v3716_v4 }
 0x343   :  { %v1085_v23 = vmax.f32 %v1069_v54, %v1070_v56  ;;  %v1073_v27 = vmax.f32 %v1057_v63, 0.0  ;;  %v1074_v60 = vmax.f32 %v1058_v17, 0.0  ;;  %v1122_v20 = vsub.s32 1, %v3231_v11  ;;  %v3727_v41 = vld [vmem:[%s4355_s10 + $0x64] ss:$8 sps:$4 sm:$0xff]   ;;  %1377 = vmatpush1.bf16.msra.mxu1 %v3721_v1 }
 0x344   :  { %v1087_v25 = vmax.f32 %v1071_v21, %v1072_v9  ;;  %v1061_v39 = vadd.f32 %v1045_v26, %v1036_v12  ;;  %v1062_v37 = vadd.f32 %v1045_v26, %v1037_v13  ;;  %v1114_v26 = vld [vmem:[%s4354_s9] sm:$0x3]  ;;  %1378 = vmatprep.subr.bf16.mxu1 %v3727_v41  ;;  %v3739_v43 = vld [vmem:[%s4355_s10 + $0x54] ss:$8 sps:$4 sm:$0xff]   ;;  %v3745_v48 = vld [vmem:[%s4355_s10 + $0x50] ss:$8 sps:$4 sm:$0xff]  }
 0x345   :  { %1086 = vst.msk [vmem:[#allocation3 + $0x18] sm:$0xff] %vm900_vm6, %v1085_v23  ;;  %v1089_v38 = vmax.f32 %v1073_v27, %v1074_v60  ;;  %v3704_v35 = vrot.slane %v1114_v26, %v3237_v15  ;;  %v3708_v7 = vrot.slane %v1114_v26, %v1122_v20  ;;  %v3733_v59 = vld [vmem:[%s4355_s10 + $0x60] ss:$8 sps:$4 sm:$0xff]   ;;  %v3751_v46 = vld [vmem:[%s4355_s10 + $0x44] ss:$8 sps:$4 sm:$0xff]  }
 0x346   :  { %1088 = vst.msk [vmem:[#allocation3 + $0x20] sm:$0xff] %vm900_vm6, %v1087_v25  ;;  %v1077_v31 = vmax.f32 %v1061_v39, 0.0  ;;  %v1078_v33 = vmax.f32 %v1062_v37, 0.0  ;;  %v3757_v50 = vld [vmem:[%s4355_s10 + $0x40] ss:$8 sps:$4 sm:$0xff]  }
 0x347   :  { %1090 = vst.msk [vmem:[#allocation3 + $0x28] sm:$0xff] %vm900_vm6, %v1089_v38  ;;  %1379 = vmatpush1.bf16.msra.mxu1 %v3733_v59  ;;  %v3763_v54 = vld [vmem:[%s4355_s10 + $0x34] ss:$8 sps:$4 sm:$0xff]   ;;  %v3769_v56 = vld [vmem:[%s4355_s10 + $0x30] ss:$8 sps:$4 sm:$0xff]  }
 0x348   :  { %v1095_v36 = vld [vmem:[#allocation3] sm:$0xff]  ;;  %v1093_v30 = vmax.f32 %v1077_v31, %v1078_v33  ;;  %1380 = vmatprep.subr.bf16.mxu1 %v3739_v43  ;;  %v3787_v21 = vld [vmem:[%s4355_s10 + $0x14] ss:$8 sps:$4 sm:$0xff]   ;;  %v3793_v9 = vld [vmem:[%s4355_s10 + $0x10] ss:$8 sps:$4 sm:$0xff]  }
 0x349   :  { %v2542_v52 = vpack.c.bf16 %v1095_v36, %v1095_v36  ;;  %v3775_v63 = vld [vmem:[%s4355_s10 + $0x24] ss:$8 sps:$4 sm:$0xff]   ;;  %v3781_v17 = vld [vmem:[%s4355_s10 + $0x20] ss:$8 sps:$4 sm:$0xff]  }
 0x34a   :  { %1094 = vst.msk [vmem:[#allocation3 + $0x38] sm:$0xff] %vm900_vm6, %v1093_v30  ;;  %v3799_v12 = vld [vmem:[%s4355_s10 + $0x4] ss:$8 sps:$4 sm:$0xff]   ;;  %v3805_v13 = vld [vmem:[%s4355_s10] ss:$8 sps:$4 sm:$0xff]  }
 0x34b   :  { %2543 = vmatmul.mubr.msk.bf16.vlgmr.msra.gmra.mxu0 %vm3675_vm7, %v2542_v52  ;;  %1381 = vmatpush1.bf16.msra.mxu1 %v3745_v48  ;;  %v1432_v31 = vld [vmem:[#allocation3 + $0x8] sm:$0xff] }
 0x34c   :  { %1436 = vmatpush1.bf16.msra.mxu0 %v3450_v40  ;;  %1467 = vmatprep.mubr.bf16.mxu0 %v2920_v2 }
 0x34d   :  { %1437 = vmatprep.subr.bf16.mxu0 %v3459_v51  ;;  %1382 = vmatprep.subr.bf16.mxu1 %v3751_v46 }
 0x34f   :  { %1383 = vmatpush1.bf16.msra.mxu1 %v3757_v50 }
 0x350   :  { %1438 = vmatpush1.bf16.msra.mxu0 %v3466_v55  ;;  %1384 = vmatprep.subr.bf16.mxu1 %v3763_v54 }
 0x351   :  { %1439 = vmatprep.subr.bf16.mxu0 %v3475_v0 }
 0x353   :  { %1385 = vmatpush1.bf16.msra.mxu1 %v3769_v56 }
 0x354   :  { %1440 = vmatpush1.bf16.msra.mxu0 %v3482_v49  ;;  %1386 = vmatprep.subr.bf16.mxu1 %v3775_v63 }
 0x355   :  { %1441 = vmatprep.subr.bf16.mxu0 %v3495_v57 }
 0x357   :  { %1387 = vmatpush1.bf16.msra.mxu1 %v3781_v17 }
 0x358   :  { %1442 = vmatpush1.bf16.msra.mxu0 %v3500_v62  ;;  %1388 = vmatprep.subr.bf16.mxu1 %v3787_v21 }
 0x359   :  { %1443 = vmatprep.subr.bf16.mxu0 %v3509_v6 }
 0x35b   :  { %1389 = vmatpush1.bf16.msra.mxu1 %v3793_v9 }
 0x35c   :  { %1444 = vmatpush1.bf16.msra.mxu0 %v3514_v10  ;;  %1390 = vmatprep.subr.bf16.mxu1 %v3799_v12 }
 0x35d   :  { %1445 = vmatprep.subr.bf16.mxu0 %v3521_v16 }
 0x35f   :  { %1391 = vmatpush1.bf16.msra.mxu1 %v3805_v13 }
 0x360   :  { %1446 = vmatpush1.bf16.msra.mxu0 %v3532_v3  ;;  %1497 = vmatprep.subr.bf16.mxu1 %v3716_v4 }
 0x361   :  { %1447 = vmatprep.subr.bf16.mxu0 %v3538_v5 }
 0x364   :  { %1448 = vmatpush1.bf16.msra.mxu0 %v3550_v18 }
 0x365   :  { %1449 = vmatprep.subr.bf16.mxu0 %v3558_v24 }
 0x368   :  { %1450 = vmatpush1.bf16.msra.mxu0 %v3564_v28 }
 0x369   :  { %1556 = vmatprep.subr.bf16.mxu0 %v3443_v22 }
 0x40b   :  { %v1240_v29 = vpop.f32.mrf.mxu0 }
 0x40c   :  { %v1241_v61 = vadd.f32 %v1240_v29, %v3704_v35 }
 0x40d   :  { %v1242_v47 = vpop.f32.mrf.mxu0 }
 0x40e   :  { %2788 = vtanh.f32 %v1241_v61  ;;  %v1243_v32 = vadd.f32 %v1242_v47, %v3708_v7 }
 0x40f   :  { %v1244_v58 = vpop.f32.mrf.mxu0 }
 0x410   :  { %2790 = vtanh.f32 %v1243_v32 }
 0x411   :  { %v1245_v45 = vpop.f32.mrf.mxu0 }
 0x41b   :  { %v2789_v44 = vpop.eup %2788 }
 0x41c   :  { %v1249_v42 = vadd.f32 1.0, %v2789_v44 }
 0x41d   :  { %v2791_v19 = vpop.eup %2790 }
 0x41e   :  { %v1250_v14 = vmul.f32 0.5, %v1249_v42  ;;  %v1251_v25 = vadd.f32 1.0, %v2791_v19 }
 0x420   :  { %v1254_v8 = vmul.f32 %v2791_v19, %v1250_v14  ;;  %v1253_v23 = vmul.f32 0.0, %v1250_v14  ;;  %v1252_v39 = vmul.f32 0.5, %v1251_v25  ;;  %v1284_v19 = vld [vmem:[%s4356_s11] sm:$0x3] }
 0x422   :  { %1256 = vrot.lane.b32.xlu1 %v1254_v8, %s2923_s5  ;;  %v3858_v8 = vrot.slane %v1284_v19, %v3237_v15 }
 0x494   :  { %v1257_v27 = vpop.permute.xlu1 %1256 }
 0x495   :  { %v3810_v60 = vadd.f32 %v1257_v27, %v1253_v23  ;;  %v3862_v23 = vrot.slane %v1284_v19, %v1122_v20 }
 0x497   :  { %2792 = vtanh.f32 %v3810_v60 }
 0x4a4   :  { %v2793_v37 = vpop.eup %2792 }
 0x4a5   :  { %v1261_v38 = vmul.f32 %v2793_v37, %v1252_v39 }
 0x4a7   :  { %1263 = vrot.lane.b32.xlu0 %v1261_v38, %s2923_s5  ;;  %v1433_v33 = vsel %vm900_vm6, %v1432_v31, %v1261_v38 }
 0x4a8   :  { %v1434_v36 = vpack.c.bf16 %v1433_v33, %v1433_v33 }
 0x4aa   :  { %1468 = vmatmul.mubr.bf16.vlgmr.msra.gmra.mxu0 %v1434_v36 }
 0x4ab   :  { %1557 = vmatpush1.bf16.msra.mxu0 %v3450_v40  ;;  %1588 = vmatprep.mubr.bf16.mxu0 %v2920_v2 }
 0x4ac   :  { %1558 = vmatprep.subr.bf16.mxu0 %v3459_v51 }
 0x4af   :  { %1559 = vmatpush1.bf16.msra.mxu0 %v3466_v55 }
 0x4b0   :  { %1560 = vmatprep.subr.bf16.mxu0 %v3475_v0 }
 0x4b3   :  { %1561 = vmatpush1.bf16.msra.mxu0 %v3482_v49 }
 0x4b4   :  { %1562 = vmatprep.subr.bf16.mxu0 %v3495_v57 }
 0x4b7   :  { %1563 = vmatpush1.bf16.msra.mxu0 %v3500_v62 }
 0x4b8   :  { %1564 = vmatprep.subr.bf16.mxu0 %v3509_v6 }
 0x4bb   :  { %1565 = vmatpush1.bf16.msra.mxu0 %v3514_v10 }
 0x4bc   :  { %1566 = vmatprep.subr.bf16.mxu0 %v3521_v16 }
 0x4bf   :  { %1567 = vmatpush1.bf16.msra.mxu0 %v3532_v3 }
 0x4c0   :  { %1568 = vmatprep.subr.bf16.mxu0 %v3538_v5 }
 0x4c3   :  { %1569 = vmatpush1.bf16.msra.mxu0 %v3550_v18 }
 0x4c4   :  { %1570 = vmatprep.subr.bf16.mxu0 %v3558_v24 }
 0x4c7   :  { %1571 = vmatpush1.bf16.msra.mxu0 %v3564_v28 }
 0x4c8   :  { %1677 = vmatprep.subr.bf16.mxu0 %v3443_v22 }
 0x519   :  { %v1264_v30 = vpop.permute.xlu0 %1263 }
 0x51a   :  { %v2561_v52 = vpack.c.bf16 %v1264_v30, %v1264_v30 }
 0x51c   :  { %2562 = vmatmul.mubr.msk.bf16.vlgmr.msra.gmra.mxu1 %vm3675_vm7, %v2561_v52 }
 0x51d   :  { %1498 = vmatpush1.bf16.msra.mxu1 %v3721_v1  ;;  %1529 = vmatprep.mubr.bf16.mxu1 %v2920_v2 }
 0x51e   :  { %1499 = vmatprep.subr.bf16.mxu1 %v3727_v41 }
 0x521   :  { %1500 = vmatpush1.bf16.msra.mxu1 %v3733_v59 }
 0x522   :  { %1501 = vmatprep.subr.bf16.mxu1 %v3739_v43 }
 0x525   :  { %1502 = vmatpush1.bf16.msra.mxu1 %v3745_v48 }
 0x526   :  { %1503 = vmatprep.subr.bf16.mxu1 %v3751_v46 }
 0x529   :  { %1504 = vmatpush1.bf16.msra.mxu1 %v3757_v50 }
 0x52a   :  { %1505 = vmatprep.subr.bf16.mxu1 %v3763_v54 }
 0x52d   :  { %1506 = vmatpush1.bf16.msra.mxu1 %v3769_v56 }
 0x52e   :  { %1507 = vmatprep.subr.bf16.mxu1 %v3775_v63 }
 0x531   :  { %1508 = vmatpush1.bf16.msra.mxu1 %v3781_v17 }
 0x532   :  { %1509 = vmatprep.subr.bf16.mxu1 %v3787_v21 }
 0x535   :  { %1510 = vmatpush1.bf16.msra.mxu1 %v3793_v9 }
 0x536   :  { %1511 = vmatprep.subr.bf16.mxu1 %v3799_v12 }
 0x539   :  { %1512 = vmatpush1.bf16.msra.mxu1 %v3805_v13 }
 0x53a   :  { %1618 = vmatprep.subr.bf16.mxu1 %v3716_v4 }
 0x56a   :  { %v1469_v34 = vpop.f32.mrf.mxu0 }
 0x56b   :  { %v1470_v26 = vadd.f32 %v1469_v34, %v3704_v35 }
 0x56c   :  { %v1471_v29 = vpop.f32.mrf.mxu0 }
 0x56d   :  { %2794 = vtanh.f32 %v1470_v26  ;;  %v1472_v61 = vadd.f32 %v1471_v29, %v3708_v7 }
 0x56e   :  { %v1473_v47 = vpop.f32.mrf.mxu0 }
 0x56f   :  { %2796 = vtanh.f32 %v1472_v61 }
 0x570   :  { %v1474_v32 = vpop.f32.mrf.mxu0 }
 0x571   :  { %v1553_v32 = vld [vmem:[#allocation3 + $0x10] sm:$0xff] }
 0x57a   :  { %v2795_v58 = vpop.eup %2794 }
 0x57b   :  { %v1478_v45 = vadd.f32 1.0, %v2795_v58 }
 0x57c   :  { %v2797_v42 = vpop.eup %2796 }
 0x57d   :  { %v1479_v44 = vmul.f32 0.5, %v1478_v45  ;;  %v1480_v26 = vadd.f32 1.0, %v2797_v42 }
 0x57f   :  { %v1483_v14 = vmul.f32 %v2797_v42, %v1479_v44  ;;  %v1482_v34 = vmul.f32 %v1479_v44, %v3810_v60  ;;  %v1481_v29 = vmul.f32 0.5, %v1480_v26 }
 0x581   :  { %1485 = vrot.lane.b32.xlu1 %v1483_v14, %s2923_s5 }
 0x5dc   :  { %v1410_v27 = vpop.f32.mrf.mxu1 }
 0x5dd   :  { %v1411_v25 = vadd.f32 %v1410_v27, %v3858_v8 }
 0x5de   :  { %v1412_v39 = vpop.f32.mrf.mxu1 }
 0x5df   :  { %2798 = vtanh.f32 %v1411_v25  ;;  %v1413_v37 = vadd.f32 %v1412_v39, %v3862_v23 }
 0x5e0   :  { %v1414_v38 = vpop.f32.mrf.mxu1 }
 0x5e1   :  { %2800 = vtanh.f32 %v1413_v37 }
 0x5e2   :  { %v1415_v31 = vpop.f32.mrf.mxu1 }
 0x5ec   :  { %v2799_v33 = vpop.eup %2798 }
 0x5ed   :  { %v1419_v36 = vadd.f32 1.0, %v2799_v33 }
 0x5ee   :  { %v2801_v52 = vpop.eup %2800 }
 0x5ef   :  { %v1420_v30 = vmul.f32 0.5, %v1419_v36  ;;  %v1421_v42 = vadd.f32 1.0, %v2801_v52 }
 0x5f1   :  { %v1424_v15 = vmul.f32 %v2801_v52, %v1420_v30  ;;  %v1422_v14 = vmul.f32 0.5, %v1421_v42 }
 0x5f3   :  { %1426 = vrot.lane.b32.xlu0 %v1424_v15, %s2923_s5  ;;  %v1486_v11 = vpop.permute.xlu1 %1485 }
 0x5f4   :  { %v3868_v20 = vadd.f32 %v1486_v11, %v1482_v34 }
 0x5f6   :  { %2802 = vtanh.f32 %v3868_v20 }
 0x603   :  { %v2803_v61 = vpop.eup %2802 }
 0x604   :  { %v1490_v47 = vmul.f32 %v2803_v61, %v1481_v29 }
 0x606   :  { %1492 = vrot.lane.b32.xlu1 %v1490_v47, %s2923_s5  ;;  %v1554_v58 = vsel %vm900_vm6, %v1553_v32, %v1490_v47 }
 0x607   :  { %v1555_v45 = vpack.c.bf16 %v1554_v58, %v1554_v58 }
 0x609   :  { %1589 = vmatmul.mubr.bf16.vlgmr.msra.gmra.mxu0 %v1555_v45 }
 0x60a   :  { %1678 = vmatpush1.bf16.msra.mxu0 %v3450_v40  ;;  %1709 = vmatprep.mubr.bf16.mxu0 %v2920_v2  ;;  %v1423_v40 = vmul.f32 0.0, %v1420_v30 }
 0x60b   :  { %1679 = vmatprep.subr.bf16.mxu0 %v3459_v51 }
 0x60e   :  { %1680 = vmatpush1.bf16.msra.mxu0 %v3466_v55 }
 0x60f   :  { %1681 = vmatprep.subr.bf16.mxu0 %v3475_v0 }
 0x612   :  { %1682 = vmatpush1.bf16.msra.mxu0 %v3482_v49 }
 0x613   :  { %1683 = vmatprep.subr.bf16.mxu0 %v3495_v57 }
 0x616   :  { %1684 = vmatpush1.bf16.msra.mxu0 %v3500_v62 }
 0x617   :  { %1685 = vmatprep.subr.bf16.mxu0 %v3509_v6 }
 0x61a   :  { %1686 = vmatpush1.bf16.msra.mxu0 %v3514_v10 }
 0x61b   :  { %1687 = vmatprep.subr.bf16.mxu0 %v3521_v16 }
 0x61e   :  { %1688 = vmatpush1.bf16.msra.mxu0 %v3532_v3 }
 0x61f   :  { %1689 = vmatprep.subr.bf16.mxu0 %v3538_v5 }
 0x622   :  { %1690 = vmatpush1.bf16.msra.mxu0 %v3550_v18 }
 0x623   :  { %1691 = vmatprep.subr.bf16.mxu0 %v3558_v24 }
 0x626   :  { %1692 = vmatpush1.bf16.msra.mxu0 %v3564_v28 }
 0x627   :  { %1798 = vmatprep.subr.bf16.mxu0 %v3443_v22 }
 0x665   :  { %v1427_v60 = vpop.permute.xlu0 %1426 }
 0x666   :  { %v3890_v44 = vadd.f32 %v1427_v60, %v1423_v40 }
 0x668   :  { %2804 = vtanh.f32 %v3890_v44 }
 0x675   :  { %v2805_v19 = vpop.eup %2804 }
 0x676   :  { %v1431_v27 = vmul.f32 %v2805_v19, %v1422_v14 }
 0x678   :  { %v1493_v25 = vpop.permute.xlu1 %1492 }
 0x679   :  { %v1495_v39 = vsel %vm900_vm6, %v1493_v25, %v1431_v27 }
 0x67a   :  { %v1496_v37 = vpack.c.bf16 %v1495_v39, %v1495_v39 }
 0x67c   :  { %1530 = vmatmul.mubr.bf16.vlgmr.msra.gmra.mxu1 %v1496_v37 }
 0x67d   :  { %1619 = vmatpush1.bf16.msra.mxu1 %v3721_v1  ;;  %1650 = vmatprep.mubr.bf16.mxu1 %v2920_v2 }
 0x67e   :  { %1620 = vmatprep.subr.bf16.mxu1 %v3727_v41 }
 0x681   :  { %1621 = vmatpush1.bf16.msra.mxu1 %v3733_v59 }
 0x682   :  { %1622 = vmatprep.subr.bf16.mxu1 %v3739_v43 }
 0x685   :  { %1623 = vmatpush1.bf16.msra.mxu1 %v3745_v48 }
 0x686   :  { %1624 = vmatprep.subr.bf16.mxu1 %v3751_v46 }
 0x689   :  { %1625 = vmatpush1.bf16.msra.mxu1 %v3757_v50 }
 0x68a   :  { %1626 = vmatprep.subr.bf16.mxu1 %v3763_v54 }
 0x68d   :  { %1627 = vmatpush1.bf16.msra.mxu1 %v3769_v56 }
 0x68e   :  { %1628 = vmatprep.subr.bf16.mxu1 %v3775_v63 }
 0x691   :  { %1629 = vmatpush1.bf16.msra.mxu1 %v3781_v17 }
 0x692   :  { %1630 = vmatprep.subr.bf16.mxu1 %v3787_v21 }
 0x695   :  { %1631 = vmatpush1.bf16.msra.mxu1 %v3793_v9 }
 0x696   :  { %1632 = vmatprep.subr.bf16.mxu1 %v3799_v12 }
 0x699   :  { %1633 = vmatpush1.bf16.msra.mxu1 %v3805_v13 }
 0x69a   :  { %1739 = vmatprep.subr.bf16.mxu1 %v3716_v4 }
 0x6c9   :  { %v1590_v22 = vpop.f32.mrf.mxu0 }
 0x6ca   :  { %v1591_v38 = vadd.f32 %v1590_v22, %v3704_v35 }
 0x6cb   :  { %v1592_v31 = vpop.f32.mrf.mxu0 }
 0x6cc   :  { %2806 = vtanh.f32 %v1591_v38  ;;  %v1593_v33 = vadd.f32 %v1592_v31, %v3708_v7 }
 0x6cd   :  { %v1594_v36 = vpop.f32.mrf.mxu0 }
 0x6ce   :  { %2808 = vtanh.f32 %v1593_v33  ;;  %v1674_v33 = vld [vmem:[#allocation3 + $0x18] sm:$0xff] }
 0x6cf   :  { %v1595_v30 = vpop.f32.mrf.mxu0 }
 0x6d9   :  { %v2807_v52 = vpop.eup %2806 }
 0x6da   :  { %v1599_v15 = vadd.f32 1.0, %v2807_v52 }
 0x6db   :  { %v2809_v11 = vpop.eup %2808 }
 0x6dc   :  { %v1600_v34 = vmul.f32 0.5, %v1599_v15  ;;  %v1601_v37 = vadd.f32 1.0, %v2809_v11 }
 0x6de   :  { %v1604_v26 = vmul.f32 %v2809_v11, %v1600_v34  ;;  %v1603_v19 = vmul.f32 %v1600_v34, %v3868_v20  ;;  %v1602_v22 = vmul.f32 0.5, %v1601_v37  ;;  %v3926_v20 = vld [vmem:[%s4351_s8 + $0x70] ss:$8 sps:$4 sm:$0xff]  }
 0x6e0   :  { %1606 = vrot.lane.b32.xlu0 %v1604_v26, %s2923_s5 }
 0x73c   :  { %v1531_v29 = vpop.f32.mrf.mxu1 }
 0x73d   :  { %v1532_v61 = vadd.f32 %v1531_v29, %v3858_v8 }
 0x73e   :  { %v1533_v47 = vpop.f32.mrf.mxu1 }
 0x73f   :  { %2810 = vtanh.f32 %v1532_v61  ;;  %v1534_v32 = vadd.f32 %v1533_v47, %v3862_v23 }
 0x740   :  { %v1535_v58 = vpop.f32.mrf.mxu1 }
 0x741   :  { %2812 = vtanh.f32 %v1534_v32 }
 0x742   :  { %v1536_v45 = vpop.f32.mrf.mxu1 }
 0x74c   :  { %v2811_v40 = vpop.eup %2810 }
 0x74d   :  { %v1540_v60 = vadd.f32 1.0, %v2811_v40 }
 0x74e   :  { %v2813_v14 = vpop.eup %2812 }
 0x74f   :  { %v1541_v42 = vmul.f32 0.5, %v1540_v60 }
 0x751   :  { %v1545_v27 = vmul.f32 %v2813_v14, %v1541_v42 }
 0x752   :  { %v1607_v25 = vpop.permute.xlu0 %1606 }
 0x753   :  { %v3917_v39 = vadd.f32 %v1607_v25, %v1603_v19  ;;  %1547 = vrot.lane.b32.xlu1 %v1545_v27, %s2923_s5 }
 0x755   :  { %2814 = vtanh.f32 %v3917_v39 }
 0x762   :  { %v2815_v38 = vpop.eup %2814 }
 0x763   :  { %v1611_v31 = vmul.f32 %v2815_v38, %v1602_v22 }
 0x765   :  { %1613 = vrot.lane.b32.xlu0 %v1611_v31, %s2923_s5  ;;  %v1675_v36 = vsel %vm900_vm6, %v1674_v33, %v1611_v31 }
 0x766   :  { %v1676_v30 = vpack.c.bf16 %v1675_v36, %v1675_v36 }
 0x768   :  { %1710 = vmatmul.mubr.bf16.vlgmr.msra.gmra.mxu0 %v1676_v30 }
 0x769   :  { %1799 = vmatpush1.bf16.msra.mxu0 %v3926_v20  ;;  %1830 = vmatprep.mubr.bf16.mxu0 %v2920_v2 }
 0x76a   :  { %1800 = vmatprep.subr.bf16.mxu0 %v3459_v51  ;;  %v3947_v51 = vld [vmem:[%s4351_s8 + $0x74] ss:$8 sps:$4 sm:$0xff]  }
 0x76d   :  { %1801 = vmatpush1.bf16.msra.mxu0 %v3466_v55  ;;  %v1544_v55 = vmul.f32 %v1541_v42, %v3890_v44 }
 0x76e   :  { %1802 = vmatprep.subr.bf16.mxu0 %v3475_v0 }
 0x771   :  { %1803 = vmatpush1.bf16.msra.mxu0 %v3482_v49 }
 0x772   :  { %1804 = vmatprep.subr.bf16.mxu0 %v3495_v57  ;;  %v1542_v57 = vadd.f32 1.0, %v2813_v14 }
 0x775   :  { %1805 = vmatpush1.bf16.msra.mxu0 %v3500_v62  ;;  %v1543_v62 = vmul.f32 0.5, %v1542_v57 }
 0x776   :  { %1806 = vmatprep.subr.bf16.mxu0 %v3509_v6 }
 0x779   :  { %1807 = vmatpush1.bf16.msra.mxu0 %v3514_v10 }
 0x77a   :  { %1808 = vmatprep.subr.bf16.mxu0 %v3521_v16 }
 0x77d   :  { %1809 = vmatpush1.bf16.msra.mxu0 %v3532_v3 }
 0x77e   :  { %1810 = vmatprep.subr.bf16.mxu0 %v3538_v5 }
 0x781   :  { %1811 = vmatpush1.bf16.msra.mxu0 %v3550_v18 }
 0x782   :  { %1812 = vmatprep.subr.bf16.mxu0 %v3558_v24 }
 0x785   :  { %1813 = vmatpush1.bf16.msra.mxu0 %v3564_v28 }
 0x786   :  { %1919 = vmatprep.subr.bf16.mxu0 %v3947_v51 }
 0x7c5   :  { %v1548_v0 = vpop.permute.xlu1 %1547 }
 0x7c6   :  { %v3951_v49 = vadd.f32 %v1548_v0, %v1544_v55  ;;  %v1795_v55 = vld [vmem:[#allocation3 + $0x20] sm:$0xff] }
 0x7c8   :  { %2816 = vtanh.f32 %v3951_v49 }
 0x7d5   :  { %v2817_v6 = vpop.eup %2816 }
 0x7d6   :  { %v1552_v10 = vmul.f32 %v2817_v6, %v1543_v62  ;;  %v3995_v62 = vld [vmem:[%s4351_s8 + $0x60] ss:$8 sps:$4 sm:$0xff]   ;;  %v4001_v6 = vld [vmem:[%s4351_s8 + $0x54] ss:$8 sps:$4 sm:$0xff]  }
 0x7d7   :  { %v1614_v16 = vpop.permute.xlu0 %1613 }
 0x7d8   :  { %v1616_v3 = vsel %vm900_vm6, %v1614_v16, %v1552_v10  ;;  %v4007_v10 = vld [vmem:[%s4351_s8 + $0x50] ss:$8 sps:$4 sm:$0xff]   ;;  %v4013_v16 = vld [vmem:[%s4351_s8 + $0x44] ss:$8 sps:$4 sm:$0xff]  }
 0x7d9   :  { %v1617_v5 = vpack.c.bf16 %v1616_v3, %v1616_v3  ;;  %v4019_v3 = vld [vmem:[%s4351_s8 + $0x40] ss:$8 sps:$4 sm:$0xff]  }
 0x7db   :  { %1651 = vmatmul.mubr.bf16.vlgmr.msra.gmra.mxu1 %v1617_v5  ;;  %v4025_v5 = vld [vmem:[%s4351_s8 + $0x34] ss:$8 sps:$4 sm:$0xff]  }
 0x7dc   :  { %1740 = vmatpush1.bf16.msra.mxu1 %v3721_v1  ;;  %1771 = vmatprep.mubr.bf16.mxu1 %v2920_v2 }
 0x7dd   :  { %1741 = vmatprep.subr.bf16.mxu1 %v3727_v41 }
 0x7e0   :  { %1742 = vmatpush1.bf16.msra.mxu1 %v3733_v59 }
 0x7e1   :  { %1743 = vmatprep.subr.bf16.mxu1 %v3739_v43 }
 0x7e4   :  { %1744 = vmatpush1.bf16.msra.mxu1 %v3745_v48 }
 0x7e5   :  { %1745 = vmatprep.subr.bf16.mxu1 %v3751_v46 }
 0x7e8   :  { %1746 = vmatpush1.bf16.msra.mxu1 %v3757_v50 }
 0x7e9   :  { %1747 = vmatprep.subr.bf16.mxu1 %v3763_v54 }
 0x7ec   :  { %1748 = vmatpush1.bf16.msra.mxu1 %v3769_v56 }
 0x7ed   :  { %1749 = vmatprep.subr.bf16.mxu1 %v3775_v63 }
 0x7f0   :  { %1750 = vmatpush1.bf16.msra.mxu1 %v3781_v17 }
 0x7f1   :  { %1751 = vmatprep.subr.bf16.mxu1 %v3787_v21 }
 0x7f4   :  { %1752 = vmatpush1.bf16.msra.mxu1 %v3793_v9 }
 0x7f5   :  { %1753 = vmatprep.subr.bf16.mxu1 %v3799_v12 }
 0x7f8   :  { %1754 = vmatpush1.bf16.msra.mxu1 %v3805_v13 }
 0x7f9   :  { %1860 = vmatprep.subr.bf16.mxu1 %v3716_v4 }
 0x828   :  { %v1711_v18 = vpop.f32.mrf.mxu0 }
 0x829   :  { %v1712_v24 = vadd.f32 %v1711_v18, %v3704_v35  ;;  %v4031_v18 = vld [vmem:[%s4351_s8 + $0x30] ss:$8 sps:$4 sm:$0xff]  }
 0x82a   :  { %v1713_v28 = vpop.f32.mrf.mxu0 }
 0x82b   :  { %2818 = vtanh.f32 %v1712_v24  ;;  %v1714_v44 = vadd.f32 %v1713_v28, %v3708_v7  ;;  %v4037_v24 = vld [vmem:[%s4351_s8 + $0x24] ss:$8 sps:$4 sm:$0xff]   ;;  %v4043_v28 = vld [vmem:[%s4351_s8 + $0x20] ss:$8 sps:$4 sm:$0xff]  }
 0x82c   :  { %v1715_v52 = vpop.f32.mrf.mxu0 }
 0x82d   :  { %2820 = vtanh.f32 %v1714_v44  ;;  %v4049_v44 = vld [vmem:[%s4351_s8 + $0x14] ss:$8 sps:$4 sm:$0xff]   ;;  %v4055_v52 = vld [vmem:[%s4351_s8 + $0x10] ss:$8 sps:$4 sm:$0xff]  }
 0x82e   :  { %v1716_v15 = vpop.f32.mrf.mxu0 }
 0x82f   :  { %v4061_v15 = vld [vmem:[%s4351_s8 + $0x4] ss:$8 sps:$4 sm:$0xff]  }
 0x838   :  { %v2819_v34 = vpop.eup %2818 }
 0x839   :  { %v1720_v11 = vadd.f32 1.0, %v2819_v34  ;;  %v4067_v34 = vld [vmem:[%s4351_s8] ss:$8 sps:$4 sm:$0xff]  }
 0x83a   :  { %v2821_v29 = vpop.eup %2820 }
 0x83b   :  { %v1721_v26 = vmul.f32 0.5, %v1720_v11  ;;  %v1722_v31 = vadd.f32 1.0, %v2821_v29 }
 0x83d   :  { %v1725_v61 = vmul.f32 %v2821_v29, %v1721_v26  ;;  %v1724_v25 = vmul.f32 %v1721_v26, %v3917_v39  ;;  %v1723_v33 = vmul.f32 0.5, %v1722_v31  ;;  %v3989_v39 = vld [vmem:[%s4351_s8 + $0x64] ss:$8 sps:$4 sm:$0xff]  }
 0x83f   :  { %1727 = vrot.lane.b32.xlu1 %v1725_v61, %s2923_s5 }
 0x89b   :  { %v1652_v47 = vpop.f32.mrf.mxu1 }
 0x89c   :  { %v1653_v32 = vadd.f32 %v1652_v47, %v3858_v8 }
 0x89d   :  { %v1654_v58 = vpop.f32.mrf.mxu1 }
 0x89e   :  { %2822 = vtanh.f32 %v1653_v32  ;;  %v1655_v45 = vadd.f32 %v1654_v58, %v3862_v23 }
 0x89f   :  { %v1656_v40 = vpop.f32.mrf.mxu1 }
 0x8a0   :  { %2824 = vtanh.f32 %v1655_v45 }
 0x8a1   :  { %v1657_v60 = vpop.f32.mrf.mxu1 }
 0x8ab   :  { %v2823_v42 = vpop.eup %2822 }
 0x8ac   :  { %v1661_v14 = vadd.f32 1.0, %v2823_v42 }
 0x8ad   :  { %v2825_v27 = vpop.eup %2824 }
 0x8ae   :  { %v1662_v19 = vmul.f32 0.5, %v1661_v14  ;;  %v1663_v61 = vadd.f32 1.0, %v2825_v27 }
 0x8b0   :  { %v1666_v37 = vmul.f32 %v2825_v27, %v1662_v19  ;;  %v1665_v11 = vmul.f32 %v1662_v19, %v3951_v49  ;;  %v1664_v47 = vmul.f32 0.5, %v1663_v61 }
 0x8b1   :  { %v1728_v22 = vpop.permute.xlu1 %1727 }
 0x8b2   :  { %v3978_v38 = vadd.f32 %v1728_v22, %v1724_v25  ;;  %1668 = vrot.lane.b32.xlu0 %v1666_v37, %s2923_s5 }
 0x8b4   :  { %2826 = vtanh.f32 %v3978_v38 }
 0x8c1   :  { %v2827_v36 = vpop.eup %2826 }
 0x8c2   :  { %v1732_v30 = vmul.f32 %v2827_v36, %v1723_v33 }
 0x8c4   :  { %1734 = vrot.lane.b32.xlu1 %v1732_v30, %s2923_s5  ;;  %v1796_v0 = vsel %vm900_vm6, %v1795_v55, %v1732_v30 }
 0x8c5   :  { %v1797_v57 = vpack.c.bf16 %v1796_v0, %v1796_v0 }
 0x8c7   :  { %1831 = vmatmul.mubr.bf16.vlgmr.msra.gmra.mxu0 %v1797_v57 }
 0x8c8   :  { %1920 = vmatpush1.bf16.msra.mxu0 %v3926_v20  ;;  %1951 = vmatprep.mubr.bf16.mxu0 %v2920_v2 }
 0x8c9   :  { %1921 = vmatprep.subr.bf16.mxu0 %v3989_v39 }
 0x8cc   :  { %1922 = vmatpush1.bf16.msra.mxu0 %v3995_v62 }
 0x8cd   :  { %1923 = vmatprep.subr.bf16.mxu0 %v4001_v6 }
 0x8d0   :  { %1924 = vmatpush1.bf16.msra.mxu0 %v4007_v10 }
 0x8d1   :  { %1925 = vmatprep.subr.bf16.mxu0 %v4013_v16 }
 0x8d4   :  { %1926 = vmatpush1.bf16.msra.mxu0 %v4019_v3 }
 0x8d5   :  { %1927 = vmatprep.subr.bf16.mxu0 %v4025_v5 }
 0x8d8   :  { %1928 = vmatpush1.bf16.msra.mxu0 %v4031_v18 }
 0x8d9   :  { %1929 = vmatprep.subr.bf16.mxu0 %v4037_v24 }
 0x8dc   :  { %1930 = vmatpush1.bf16.msra.mxu0 %v4043_v28 }
 0x8dd   :  { %1931 = vmatprep.subr.bf16.mxu0 %v4049_v44 }
 0x8e0   :  { %1932 = vmatpush1.bf16.msra.mxu0 %v4055_v52 }
 0x8e1   :  { %1933 = vmatprep.subr.bf16.mxu0 %v4061_v15 }
 0x8e4   :  { %1934 = vmatpush1.bf16.msra.mxu0 %v4067_v34 }
 0x8e5   :  { %2040 = vmatprep.subr.bf16.mxu0 %v3947_v51 }
 0x924   :  { %v1669_v26 = vpop.permute.xlu0 %1668 }
 0x925   :  { %v4072_v29 = vadd.f32 %v1669_v26, %v1665_v11 }
 0x927   :  { %2828 = vtanh.f32 %v4072_v29 }
 0x934   :  { %v2829_v32 = vpop.eup %2828 }
 0x935   :  { %v1673_v58 = vmul.f32 %v2829_v32, %v1664_v47 }
 0x936   :  { %v1735_v45 = vpop.permute.xlu1 %1734 }
 0x937   :  { %v1737_v40 = vsel %vm900_vm6, %v1735_v45, %v1673_v58 }
 0x938   :  { %v1738_v60 = vpack.c.bf16 %v1737_v40, %v1737_v40 }
 0x93a   :  { %1772 = vmatmul.mubr.bf16.vlgmr.msra.gmra.mxu1 %v1738_v60 }
 0x93b   :  { %1861 = vmatpush1.bf16.msra.mxu1 %v3721_v1  ;;  %1892 = vmatprep.mubr.bf16.mxu1 %v2920_v2 }
 0x93c   :  { %1862 = vmatprep.subr.bf16.mxu1 %v3727_v41 }
 0x93f   :  { %1863 = vmatpush1.bf16.msra.mxu1 %v3733_v59 }
 0x940   :  { %1864 = vmatprep.subr.bf16.mxu1 %v3739_v43 }
 0x943   :  { %1865 = vmatpush1.bf16.msra.mxu1 %v3745_v48 }
 0x944   :  { %1866 = vmatprep.subr.bf16.mxu1 %v3751_v46 }
 0x947   :  { %1867 = vmatpush1.bf16.msra.mxu1 %v3757_v50 }
 0x948   :  { %1868 = vmatprep.subr.bf16.mxu1 %v3763_v54 }
 0x94b   :  { %1869 = vmatpush1.bf16.msra.mxu1 %v3769_v56 }
 0x94c   :  { %1870 = vmatprep.subr.bf16.mxu1 %v3775_v63 }
 0x94f   :  { %1871 = vmatpush1.bf16.msra.mxu1 %v3781_v17 }
 0x950   :  { %1872 = vmatprep.subr.bf16.mxu1 %v3787_v21 }
 0x953   :  { %1873 = vmatpush1.bf16.msra.mxu1 %v3793_v9 }
 0x954   :  { %1874 = vmatprep.subr.bf16.mxu1 %v3799_v12 }
 0x957   :  { %1875 = vmatpush1.bf16.msra.mxu1 %v3805_v13 }
 0x958   :  { %1981 = vmatprep.subr.bf16.mxu1 %v3716_v4 }
 0x987   :  { %v1832_v49 = vpop.f32.mrf.mxu0 }
 0x988   :  { %v1833_v42 = vadd.f32 %v1832_v49, %v3704_v35 }
 0x989   :  { %v1834_v14 = vpop.f32.mrf.mxu0 }
 0x98a   :  { %2830 = vtanh.f32 %v1833_v42  ;;  %v1835_v19 = vadd.f32 %v1834_v14, %v3708_v7 }
 0x98b   :  { %v1836_v27 = vpop.f32.mrf.mxu0 }
 0x98c   :  { %2832 = vtanh.f32 %v1835_v19 }
 0x98d   :  { %v1837_v25 = vpop.f32.mrf.mxu0 }
 0x98e   :  { %v1916_v25 = vld [vmem:[#allocation3 + $0x28] sm:$0xff] }
 0x997   :  { %v2831_v37 = vpop.eup %2830 }
 0x998   :  { %v1841_v22 = vadd.f32 1.0, %v2831_v37 }
 0x999   :  { %v2833_v33 = vpop.eup %2832 }
 0x99a   :  { %v1842_v31 = vmul.f32 0.5, %v1841_v22  ;;  %v1843_v42 = vadd.f32 1.0, %v2833_v33 }
 0x99c   :  { %v1846_v36 = vmul.f32 %v2833_v33, %v1842_v31  ;;  %v1845_v45 = vmul.f32 %v1842_v31, %v3978_v38  ;;  %v1844_v14 = vmul.f32 0.5, %v1843_v42 }
 0x99e   :  { %1848 = vrot.lane.b32.xlu0 %v1846_v36, %s2923_s5 }
 0x9fa   :  { %v1773_v30 = vpop.f32.mrf.mxu1 }
 0x9fb   :  { %v1774_v55 = vadd.f32 %v1773_v30, %v3858_v8 }
 0x9fc   :  { %v1775_v0 = vpop.f32.mrf.mxu1 }
 0x9fd   :  { %2834 = vtanh.f32 %v1774_v55  ;;  %v1776_v57 = vadd.f32 %v1775_v0, %v3862_v23 }
 0x9fe   :  { %v1777_v11 = vpop.f32.mrf.mxu1 }
 0x9ff   :  { %2836 = vtanh.f32 %v1776_v57 }
 0xa00   :  { %v1778_v26 = vpop.f32.mrf.mxu1 }
 0xa0a   :  { %v2835_v61 = vpop.eup %2834 }
 0xa0b   :  { %v1782_v47 = vadd.f32 1.0, %v2835_v61 }
 0xa0c   :  { %v2837_v58 = vpop.eup %2836 }
 0xa0d   :  { %v1783_v32 = vmul.f32 0.5, %v1782_v47  ;;  %v1784_v36 = vadd.f32 1.0, %v2837_v58 }
 0xa0f   :  { %v1787_v40 = vmul.f32 %v2837_v58, %v1783_v32  ;;  %v1786_v38 = vmul.f32 %v1783_v32, %v4072_v29  ;;  %v1785_v30 = vmul.f32 0.5, %v1784_v36 }
 0xa10   :  { %v1849_v60 = vpop.permute.xlu0 %1848 }
 0xa11   :  { %v4099_v49 = vadd.f32 %v1849_v60, %v1845_v45  ;;  %1789 = vrot.lane.b32.xlu1 %v1787_v40, %s2923_s5 }
 0xa13   :  { %2838 = vtanh.f32 %v4099_v49 }
 0xa20   :  { %v2839_v19 = vpop.eup %2838 }
 0xa21   :  { %v1853_v27 = vmul.f32 %v2839_v19, %v1844_v14 }
 0xa23   :  { %1855 = vrot.lane.b32.xlu0 %v1853_v27, %s2923_s5  ;;  %v1917_v37 = vsel %vm900_vm6, %v1916_v25, %v1853_v27 }
 0xa24   :  { %v1918_v22 = vpack.c.bf16 %v1917_v37, %v1917_v37 }
 0xa26   :  { %1952 = vmatmul.mubr.bf16.vlgmr.msra.gmra.mxu0 %v1918_v22 }
 0xa27   :  { %2041 = vmatpush1.bf16.msra.mxu0 %v3926_v20  ;;  %2072 = vmatprep.mubr.bf16.mxu0 %v2920_v2 }
 0xa28   :  { %2042 = vmatprep.subr.bf16.mxu0 %v3989_v39 }
 0xa2b   :  { %2043 = vmatpush1.bf16.msra.mxu0 %v3995_v62 }
 0xa2c   :  { %2044 = vmatprep.subr.bf16.mxu0 %v4001_v6 }
 0xa2f   :  { %2045 = vmatpush1.bf16.msra.mxu0 %v4007_v10 }
 0xa30   :  { %2046 = vmatprep.subr.bf16.mxu0 %v4013_v16 }
 0xa33   :  { %2047 = vmatpush1.bf16.msra.mxu0 %v4019_v3 }
 0xa34   :  { %2048 = vmatprep.subr.bf16.mxu0 %v4025_v5 }
 0xa37   :  { %2049 = vmatpush1.bf16.msra.mxu0 %v4031_v18 }
 0xa38   :  { %2050 = vmatprep.subr.bf16.mxu0 %v4037_v24 }
 0xa3b   :  { %2051 = vmatpush1.bf16.msra.mxu0 %v4043_v28 }
 0xa3c   :  { %2052 = vmatprep.subr.bf16.mxu0 %v4049_v44 }
 0xa3f   :  { %2053 = vmatpush1.bf16.msra.mxu0 %v4055_v52 }
 0xa40   :  { %2054 = vmatprep.subr.bf16.mxu0 %v4061_v15 }
 0xa43   :  { %2055 = vmatpush1.bf16.msra.mxu0 %v4067_v34 }
 0xa44   :  { %2161 = vmatprep.subr.bf16.mxu0 %v3947_v51 }
 0xa83   :  { %v1790_v31 = vpop.permute.xlu1 %1789 }
 0xa84   :  { %v4123_v33 = vadd.f32 %v1790_v31, %v1786_v38 }
 0xa86   :  { %2840 = vtanh.f32 %v4123_v33 }
 0xa93   :  { %v2841_v55 = vpop.eup %2840 }
 0xa94   :  { %v1794_v0 = vmul.f32 %v2841_v55, %v1785_v30 }
 0xa95   :  { %v1856_v57 = vpop.permute.xlu0 %1855 }
 0xa96   :  { %v1858_v11 = vsel %vm900_vm6, %v1856_v57, %v1794_v0 }
 0xa97   :  { %v1859_v26 = vpack.c.bf16 %v1858_v11, %v1858_v11 }
 0xa99   :  { %1893 = vmatmul.mubr.bf16.vlgmr.msra.gmra.mxu1 %v1859_v26  ;;  %v2037_v26 = vld [vmem:[#allocation3 + $0x30] sm:$0xff] }
 0xa9a   :  { %1982 = vmatpush1.bf16.msra.mxu1 %v3721_v1  ;;  %2013 = vmatprep.mubr.bf16.mxu1 %v2920_v2 }
 0xa9b   :  { %1983 = vmatprep.subr.bf16.mxu1 %v3727_v41 }
 0xa9e   :  { %1984 = vmatpush1.bf16.msra.mxu1 %v3733_v59 }
 0xa9f   :  { %1985 = vmatprep.subr.bf16.mxu1 %v3739_v43 }
 0xaa2   :  { %1986 = vmatpush1.bf16.msra.mxu1 %v3745_v48 }
 0xaa3   :  { %1987 = vmatprep.subr.bf16.mxu1 %v3751_v46 }
 0xaa6   :  { %1988 = vmatpush1.bf16.msra.mxu1 %v3757_v50 }
 0xaa7   :  { %1989 = vmatprep.subr.bf16.mxu1 %v3763_v54 }
 0xaaa   :  { %1990 = vmatpush1.bf16.msra.mxu1 %v3769_v56 }
 0xaab   :  { %1991 = vmatprep.subr.bf16.mxu1 %v3775_v63 }
 0xaae   :  { %1992 = vmatpush1.bf16.msra.mxu1 %v3781_v17 }
 0xaaf   :  { %1993 = vmatprep.subr.bf16.mxu1 %v3787_v21 }
 0xab2   :  { %1994 = vmatpush1.bf16.msra.mxu1 %v3793_v9 }
 0xab3   :  { %1995 = vmatprep.subr.bf16.mxu1 %v3799_v12 }
 0xab6   :  { %1996 = vmatpush1.bf16.msra.mxu1 %v3805_v13 }
 0xab7   :  { %2102 = vmatprep.subr.bf16.mxu1 %v3716_v4 }
 0xae6   :  { %v1953_v1 = vpop.f32.mrf.mxu0 }
 0xae7   :  { %v1954_v41 = vadd.f32 %v1953_v1, %v3704_v35 }
 0xae8   :  { %v1955_v59 = vpop.f32.mrf.mxu0 }
 0xae9   :  { %2842 = vtanh.f32 %v1954_v41  ;;  %v1956_v43 = vadd.f32 %v1955_v59, %v3708_v7 }
 0xaea   :  { %v1957_v51 = vpop.f32.mrf.mxu0 }
 0xaeb   :  { %2844 = vtanh.f32 %v1956_v43 }
 0xaec   :  { %v1958_v29 = vpop.f32.mrf.mxu0 }
 0xaf6   :  { %v2843_v61 = vpop.eup %2842 }
 0xaf7   :  { %v1962_v47 = vadd.f32 1.0, %v2843_v61 }
 0xaf8   :  { %v2845_v58 = vpop.eup %2844 }
 0xaf9   :  { %v1963_v32 = vmul.f32 0.5, %v1962_v47  ;;  %v1964_v55 = vadd.f32 1.0, %v2845_v58 }
 0xafb   :  { %v1967_v45 = vmul.f32 %v2845_v58, %v1963_v32  ;;  %v1966_v38 = vmul.f32 %v1963_v32, %v4099_v49  ;;  %v1965_v0 = vmul.f32 0.5, %v1964_v55 }
 0xafd   :  { %1969 = vrot.lane.b32.xlu1 %v1967_v45, %s2923_s5 }
 0xb59   :  { %v1894_v40 = vpop.f32.mrf.mxu1 }
 0xb5a   :  { %v1895_v4 = vadd.f32 %v1894_v40, %v3858_v8 }
 0xb5b   :  { %v1896_v60 = vpop.f32.mrf.mxu1 }
 0xb5c   :  { %2846 = vtanh.f32 %v1895_v4  ;;  %v1897_v42 = vadd.f32 %v1896_v60, %v3862_v23 }
 0xb5d   :  { %v1898_v14 = vpop.f32.mrf.mxu1 }
 0xb5e   :  { %2848 = vtanh.f32 %v1897_v42 }
 0xb5f   :  { %v1899_v19 = vpop.f32.mrf.mxu1 }
 0xb69   :  { %v2847_v27 = vpop.eup %2846 }
 0xb6a   :  { %v1903_v25 = vadd.f32 1.0, %v2847_v27 }
 0xb6b   :  { %v2849_v22 = vpop.eup %2848 }
 0xb6c   :  { %v1904_v37 = vmul.f32 0.5, %v1903_v25  ;;  %v2158_v25 = vld [vmem:[#allocation3 + $0x38] sm:$0xff] }
 0xb6e   :  { %v1908_v31 = vmul.f32 %v2849_v22, %v1904_v37 }
 0xb6f   :  { %v1970_v36 = vpop.permute.xlu1 %1969 }
 0xb70   :  { %v4150_v30 = vadd.f32 %v1970_v36, %v1966_v38  ;;  %1910 = vrot.lane.b32.xlu0 %v1908_v31, %s2923_s5 }
 0xb72   :  { %2850 = vtanh.f32 %v4150_v30 }
 0xb7f   :  { %v2851_v57 = vpop.eup %2850 }
 0xb80   :  { %v1974_v11 = vmul.f32 %v2851_v57, %v1965_v0 }
 0xb82   :  { %1976 = vrot.lane.b32.xlu1 %v1974_v11, %s2923_s5  ;;  %v2038_v1 = vsel %vm900_vm6, %v2037_v26, %v1974_v11 }
 0xb83   :  { %v2039_v41 = vpack.c.bf16 %v2038_v1, %v2038_v1 }
 0xb85   :  { %2073 = vmatmul.mubr.bf16.vlgmr.msra.gmra.mxu0 %v2039_v41  ;;  %v2909_v41 = vld [vmem:[%s4355_s10 + $0x50] ss:$8 sps:$4 sm:$0xff]  }
 0xb86   :  { %2162 = vmatpush1.bf16.msra.mxu0 %v3926_v20  ;;  %2193 = vmatprep.mubr.bf16.mxu0 %v2920_v2  ;;  %v1907_v20 = vmul.f32 %v1904_v37, %v4123_v33 }
 0xb87   :  { %2163 = vmatprep.subr.bf16.mxu0 %v3989_v39 }
 0xb8a   :  { %2164 = vmatpush1.bf16.msra.mxu0 %v3995_v62 }
 0xb8b   :  { %2165 = vmatprep.subr.bf16.mxu0 %v4001_v6  ;;  %v1905_v6 = vadd.f32 1.0, %v2849_v22 }
 0xb8e   :  { %2166 = vmatpush1.bf16.msra.mxu0 %v4007_v10  ;;  %v1906_v10 = vmul.f32 0.5, %v1905_v6  ;;  %v2914_v6 = vld [vmem:[%s4355_s10 + $0x24] ss:$8 sps:$4 sm:$0xff]  }
 0xb8f   :  { %2167 = vmatprep.subr.bf16.mxu0 %v4013_v16 }
 0xb92   :  { %2168 = vmatpush1.bf16.msra.mxu0 %v4019_v3 }
 0xb93   :  { %2169 = vmatprep.subr.bf16.mxu0 %v4025_v5 }
 0xb96   :  { %2170 = vmatpush1.bf16.msra.mxu0 %v4031_v18 }
 0xb97   :  { %2171 = vmatprep.subr.bf16.mxu0 %v4037_v24 }
 0xb9a   :  { %2172 = vmatpush1.bf16.msra.mxu0 %v4043_v28  ;;  %v4181_v28 = vld [vmem:[%s4355_s10 + $0x70] ss:$8 sps:$4 sm:$0xff]  }
 0xb9b   :  { %2173 = vmatprep.subr.bf16.mxu0 %v4049_v44  ;;  %v4188_v44 = vld [vmem:[%s4355_s10 + $0x64] ss:$8 sps:$4 sm:$0xff]  }
 0xb9e   :  { %2174 = vmatpush1.bf16.msra.mxu0 %v4055_v52  ;;  %v4194_v52 = vld [vmem:[%s4355_s10 + $0x60] ss:$8 sps:$4 sm:$0xff]  }
 0xb9f   :  { %2175 = vmatprep.subr.bf16.mxu0 %v4061_v15  ;;  %v4200_v15 = vld [vmem:[%s4355_s10 + $0x54] ss:$8 sps:$4 sm:$0xff]  }
 0xba2   :  { %2176 = vmatpush1.bf16.msra.mxu0 %v4067_v34 }
 0xba3   :  { %2667 = vmatprep.subr.bf16.mxu0 %v2921_v53 }
 0xbe2   :  { %v1911_v39 = vpop.permute.xlu0 %1910 }
 0xbe3   :  { %v4174_v62 = vadd.f32 %v1911_v39, %v1907_v20  ;;  %v2910_v20 = vld [vmem:[%s4355_s10 + $0x44] ss:$8 sps:$4 sm:$0xff]   ;;  %v2912_v39 = vld [vmem:[%s4355_s10 + $0x34] ss:$8 sps:$4 sm:$0xff]  }
 0xbe5   :  { %2852 = vtanh.f32 %v4174_v62 }
 0xbf2   :  { %v2853_v16 = vpop.eup %2852 }
 0xbf3   :  { %v1915_v3 = vmul.f32 %v2853_v16, %v1906_v10  ;;  %v2915_v10 = vld [vmem:[%s4355_s10 + $0x20] ss:$8 sps:$4 sm:$0xff]   ;;  %v2916_v16 = vld [vmem:[%s4355_s10 + $0x14] ss:$8 sps:$4 sm:$0xff]  }
 0xbf4   :  { %v1977_v5 = vpop.permute.xlu1 %1976 }
 0xbf5   :  { %v1979_v18 = vsel %vm900_vm6, %v1977_v5, %v1915_v3  ;;  %v2917_v3 = vld [vmem:[%s4355_s10 + $0x10] ss:$8 sps:$4 sm:$0xff]   ;;  %v2918_v5 = vld [vmem:[%s4355_s10 + $0x4] ss:$8 sps:$4 sm:$0xff]  }
 0xbf6   :  { %v1980_v24 = vpack.c.bf16 %v1979_v18, %v1979_v18  ;;  %v2919_v18 = vld [vmem:[%s4355_s10] ss:$8 sps:$4 sm:$0xff]  }
 0xbf8   :  { %2014 = vmatmul.mubr.bf16.vlgmr.msra.gmra.mxu1 %v1980_v24 }
 0xbf9   :  { %2103 = vmatpush1.bf16.msra.mxu1 %v4181_v28  ;;  %2134 = vmatprep.mubr.bf16.mxu1 %v2920_v2 }
 0xbfa   :  { %2104 = vmatprep.subr.bf16.mxu1 %v4188_v44 }
 0xbfd   :  { %2105 = vmatpush1.bf16.msra.mxu1 %v4194_v52 }
 0xbfe   :  { %2106 = vmatprep.subr.bf16.mxu1 %v4200_v15 }
 0xc01   :  { %2107 = vmatpush1.bf16.msra.mxu1 %v3745_v48  ;;  %v2908_v48 = vld [vmem:[%s4355_s10 + $0x74] ss:$8 sps:$4 sm:$0xff]  }
 0xc02   :  { %2108 = vmatprep.subr.bf16.mxu1 %v3751_v46 }
 0xc05   :  { %2109 = vmatpush1.bf16.msra.mxu1 %v3757_v50 }
 0xc06   :  { %2110 = vmatprep.subr.bf16.mxu1 %v3763_v54 }
 0xc09   :  { %2111 = vmatpush1.bf16.msra.mxu1 %v3769_v56 }
 0xc0a   :  { %2112 = vmatprep.subr.bf16.mxu1 %v3775_v63 }
 0xc0d   :  { %2113 = vmatpush1.bf16.msra.mxu1 %v3781_v17 }
 0xc0e   :  { %2114 = vmatprep.subr.bf16.mxu1 %v3787_v21 }
 0xc11   :  { %2115 = vmatpush1.bf16.msra.mxu1 %v3793_v9 }
 0xc12   :  { %2116 = vmatprep.subr.bf16.mxu1 %v3799_v12 }
 0xc15   :  { %2117 = vmatpush1.bf16.msra.mxu1 %v3805_v13 }
 0xc16   :  { %2223 = vmatprep.subr.bf16.mxu1 %v2908_v48 }
 0xc45   :  { %v2074_v46 = vpop.f32.mrf.mxu0 }
 0xc46   :  { %v2075_v50 = vadd.f32 %v2074_v46, %v3704_v35 }
 0xc47   :  { %v2076_v54 = vpop.f32.mrf.mxu0 }
 0xc48   :  { %2854 = vtanh.f32 %v2075_v50  ;;  %v2077_v56 = vadd.f32 %v2076_v54, %v3708_v7 }
 0xc49   :  { %v2078_v63 = vpop.f32.mrf.mxu0 }
 0xc4a   :  { %2856 = vtanh.f32 %v2077_v56 }
 0xc4b   :  { %v2079_v17 = vpop.f32.mrf.mxu0 }
 0xc55   :  { %v2855_v21 = vpop.eup %2854 }
 0xc56   :  { %v2083_v9 = vadd.f32 1.0, %v2855_v21 }
 0xc57   :  { %v2857_v34 = vpop.eup %2856 }
 0xc58   :  { %v2084_v12 = vmul.f32 0.5, %v2083_v9  ;;  %v2085_v42 = vadd.f32 1.0, %v2857_v34 }
 0xc5a   :  { %v2088_v13 = vmul.f32 %v2857_v34, %v2084_v12  ;;  %v2087_v45 = vmul.f32 %v2084_v12, %v4150_v30  ;;  %v2086_v14 = vmul.f32 0.5, %v2085_v42 }
 0xc5c   :  { %2090 = vrot.lane.b32.xlu0 %v2088_v13, %s2923_s5 }
 0xcb8   :  { %v2015_v49 = vpop.f32.mrf.mxu1 }
 0xcb9   :  { %v2016_v33 = vadd.f32 %v2015_v49, %v3858_v8 }
 0xcba   :  { %v2017_v59 = vpop.f32.mrf.mxu1 }
 0xcbb   :  { %2858 = vtanh.f32 %v2016_v33  ;;  %v2018_v43 = vadd.f32 %v2017_v59, %v3862_v23 }
 0xcbc   :  { %v2019_v51 = vpop.f32.mrf.mxu1 }
 0xcbd   :  { %2860 = vtanh.f32 %v2018_v43 }
 0xcbe   :  { %v2020_v29 = vpop.f32.mrf.mxu1 }
 0xcc8   :  { %v2859_v61 = vpop.eup %2858 }
 0xcc9   :  { %v2024_v47 = vadd.f32 1.0, %v2859_v61 }
 0xcca   :  { %v2861_v58 = vpop.eup %2860 }
 0xccb   :  { %v2025_v32 = vmul.f32 0.5, %v2024_v47  ;;  %v2026_v30 = vadd.f32 1.0, %v2861_v58 }
 0xccd   :  { %v2029_v40 = vmul.f32 %v2861_v58, %v2025_v32  ;;  %v2028_v38 = vmul.f32 %v2025_v32, %v4174_v62  ;;  %v2027_v55 = vmul.f32 0.5, %v2026_v30  ;;  %v2913_v62 = vld [vmem:[%s4355_s10 + $0x30] ss:$8 sps:$4 sm:$0xff]  }
 0xcce   :  { %v2091_v4 = vpop.permute.xlu0 %2090 }
 0xccf   :  { %v4223_v60 = vadd.f32 %v2091_v4, %v2087_v45  ;;  %2031 = vrot.lane.b32.xlu1 %v2029_v40, %s2923_s5 }
 0xcd1   :  { %2862 = vtanh.f32 %v4223_v60 }
 0xcde   :  { %v2863_v19 = vpop.eup %2862 }
 0xcdf   :  { %v2095_v27 = vmul.f32 %v2863_v19, %v2086_v14 }
 0xce1   :  { %2097 = vrot.lane.b32.xlu0 %v2095_v27, %s2923_s5  ;;  %v2159_v37 = vsel %vm900_vm6, %v2158_v25, %v2095_v27 }
 0xce2   :  { %v2160_v22 = vpack.c.bf16 %v2159_v37, %v2159_v37 }
 0xce4   :  { %2194 = vmatmul.mubr.bf16.vlgmr.msra.gmra.mxu0 %v2160_v22 }
 0xce5   :  { %2675 = vmatprep.mubr.msk.bf16.mxu0 %vm2924_vm8, %v2921_v53 }
 0xd41   :  { %v2032_v31 = vpop.permute.xlu1 %2031 }
 0xd42   :  { %v4230_v36 = vadd.f32 %v2032_v31, %v2028_v38 }
 0xd44   :  { %2864 = vtanh.f32 %v4230_v36 }
 0xd51   :  { %v2865_v0 = vpop.eup %2864 }
 0xd52   :  { %v2036_v57 = vmul.f32 %v2865_v0, %v2027_v55 }
 0xd53   :  { %v2098_v11 = vpop.permute.xlu0 %2097 }
 0xd54   :  { %v2100_v26 = vsel %vm900_vm6, %v2098_v11, %v2036_v57 }
 0xd55   :  { %v2101_v1 = vpack.c.bf16 %v2100_v26, %v2100_v26 }
 0xd57   :  { %2135 = vmatmul.mubr.bf16.vlgmr.msra.gmra.mxu1 %v2101_v1 }
 0xd58   :  { %2224 = vmatpush1.bf16.msra.mxu1 %v4181_v28  ;;  %2255 = vmatprep.mubr.bf16.mxu1 %v2920_v2  ;;  %v2911_v2 = vld [vmem:[%s4355_s10 + $0x40] ss:$8 sps:$4 sm:$0xff]  }
 0xd59   :  { %2225 = vmatprep.subr.bf16.mxu1 %v4188_v44 }
 0xd5c   :  { %2226 = vmatpush1.bf16.msra.mxu1 %v4194_v52 }
 0xd5d   :  { %2227 = vmatprep.subr.bf16.mxu1 %v4200_v15 }
 0xd60   :  { %2228 = vmatpush1.bf16.msra.mxu1 %v2909_v41  ;;  %v2772_v41 = vld [vmem:[%s4357_s12 + $0x18] sm:$0xff]  }
 0xd61   :  { %2229 = vmatprep.subr.bf16.mxu1 %v2910_v20  ;;  %2668 = vmatpush3.bf16.msra.mxu0 %v2772_v41  ;;  %v2775_v20 = vld [vmem:[%s4357_s12] sm:$0xff]  }
 0xd62   :  { %2669 = vmatprep.subr.bf16.mxu0 %v2921_v53 }
 0xd64   :  { %2230 = vmatpush1.bf16.msra.mxu1 %v2911_v2 }
 0xd65   :  { %2231 = vmatprep.subr.bf16.mxu1 %v2912_v39 }
 0xd68   :  { %2232 = vmatpush1.bf16.msra.mxu1 %v2913_v62 }
 0xd69   :  { %2233 = vmatprep.subr.bf16.mxu1 %v2914_v6  ;;  %v2776_v6 = vld [vmem:[%s4358_s14 + $0x38] sm:$0xff]  }
 0xd6c   :  { %2234 = vmatpush1.bf16.msra.mxu1 %v2915_v10 }
 0xd6d   :  { %2235 = vmatprep.subr.bf16.mxu1 %v2916_v16  ;;  %v2777_v16 = vld [vmem:[%s4358_s14 + $0x30] sm:$0xff]  }
 0xd70   :  { %2236 = vmatpush1.bf16.msra.mxu1 %v2917_v3 }
 0xd71   :  { %2237 = vmatprep.subr.bf16.mxu1 %v2918_v5  ;;  %v2778_v5 = vld [vmem:[%s4358_s14 + $0x28] sm:$0xff]  }
 0xd74   :  { %2238 = vmatpush1.bf16.msra.mxu1 %v2919_v18 }
 0xd75   :  { %2679 = vmatprep.subr.bf16.mxu1 %v2921_v53 }
 0xda4   :  { %v2195_v24 = vpop.f32.mrf.mxu0 }
 0xda5   :  { %v2196_v28 = vadd.f32 %v2195_v24, %v3704_v35 }
 0xda6   :  { %v2197_v44 = vpop.f32.mrf.mxu0 }
 0xda7   :  { %2866 = vtanh.f32 %v2196_v28  ;;  %v2198_v52 = vadd.f32 %v2197_v44, %v3708_v7  ;;  %v2779_v44 = vld [vmem:[%s4358_s14 + $0x20] sm:$0xff]  }
 0xda8   :  { %v2199_v15 = vpop.f32.mrf.mxu0 }
 0xda9   :  { %2868 = vtanh.f32 %v2198_v52  ;;  %v2780_v52 = vld [vmem:[%s4358_s14 + $0x18] sm:$0xff]   ;;  %v2781_v15 = vld [vmem:[%s4358_s14 + $0x10] sm:$0xff]  }
 0xdaa   :  { %v2200_v48 = vpop.f32.mrf.mxu0 }
 0xdb4   :  { %v2867_v46 = vpop.eup %2866 }
 0xdb5   :  { %v2204_v50 = vadd.f32 1.0, %v2867_v46  ;;  %v2782_v46 = vld [vmem:[%s4358_s14 + $0x8] sm:$0xff]  }
 0xdb6   :  { %v2869_v56 = vpop.eup %2868 }
 0xdb7   :  { %v2205_v54 = vmul.f32 0.5, %v2204_v50  ;;  %v2206_v61 = vadd.f32 1.0, %v2869_v56  ;;  %v2783_v50 = vld [vmem:[%s4358_s14] sm:$0xff]  }
 0xdb9   :  { %v2209_v63 = vmul.f32 %v2869_v56, %v2205_v54  ;;  %v2208_v59 = vmul.f32 %v2205_v54, %v4223_v60  ;;  %v2207_v47 = vmul.f32 0.5, %v2206_v61  ;;  %v2563_v54 = vld [vmem:[%s4359_s13] ss:$0 sm:$0xff] }
 0xdbb   :  { %2211 = vrot.lane.b32.xlu1 %v2209_v63, %s2923_s5 }
 0xe17   :  { %v2136_v17 = vpop.f32.mrf.mxu1 }
 0xe18   :  { %v2137_v21 = vadd.f32 %v2136_v17, %v3858_v8 }
 0xe19   :  { %v2138_v9 = vpop.f32.mrf.mxu1 }
 0xe1a   :  { %2870 = vtanh.f32 %v2137_v21  ;;  %v2139_v35 = vadd.f32 %v2138_v9, %v3862_v23 }
 0xe1b   :  { %v2140_v12 = vpop.f32.mrf.mxu1 }
 0xe1c   :  { %2872 = vtanh.f32 %v2139_v35 }
 0xe1d   :  { %v2141_v34 = vpop.f32.mrf.mxu1 }
 0xe1e   :  { %v2569_v34 = vld [vmem:[%s4360_s15] ss:$0 sm:$0xff] }
 0xe27   :  { %v2871_v7 = vpop.eup %2870 }
 0xe28   :  { %v2145_v13 = vadd.f32 1.0, %v2871_v7 }
 0xe29   :  { %v2873_v33 = vpop.eup %2872 }
 0xe2a   :  { %v2146_v49 = vmul.f32 0.5, %v2145_v13  ;;  %v2147_v42 = vadd.f32 1.0, %v2873_v33 }
 0xe2c   :  { %v2150_v43 = vmul.f32 %v2873_v33, %v2146_v49  ;;  %v2149_v45 = vmul.f32 %v2146_v49, %v4230_v36  ;;  %v2148_v14 = vmul.f32 0.5, %v2147_v42 }
 0xe2d   :  { %v2212_v51 = vpop.permute.xlu1 %2211 }
 0xe2e   :  { %v2214_v29 = vadd.f32 %v2212_v51, %v2208_v59  ;;  %2152 = vrot.lane.b32.xlu0 %v2150_v43, %s2923_s5 }
 0xe30   :  { %2874 = vtanh.f32 %v2214_v29 }
 0xe3d   :  { %v2875_v32 = vpop.eup %2874 }
 0xe3e   :  { %v2216_v58 = vmul.f32 %v2875_v32, %v2207_v47 }
 0xe40   :  { %2218 = vrot.lane.b32.xlu1 %v2216_v58, %s2923_s5 }
 0xea0   :  { %v2153_v40 = vpop.permute.xlu0 %2152 }
 0xea1   :  { %v2155_v4 = vadd.f32 %v2153_v40, %v2149_v45 }
 0xea3   :  { %2876 = vtanh.f32 %v2155_v4 }
 0xeb0   :  { %v2877_v60 = vpop.eup %2876 }
 0xeb1   :  { %v2157_v19 = vmul.f32 %v2877_v60, %v2148_v14 }
 0xeb2   :  { %v2219_v27 = vpop.permute.xlu1 %2218 }
 0xeb3   :  { %v2221_v25 = vsel %vm900_vm6, %v2219_v27, %v2157_v19 }
 0xeb4   :  { %v2222_v37 = vpack.c.bf16 %v2221_v25, %v2221_v25 }
 0xeb6   :  { %2256 = vmatmul.mubr.bf16.vlgmr.msra.gmra.mxu1 %v2222_v37 }
 0xeb7   :  { %2695 = vmatprep.mubr.msk.bf16.mxu1 %vm2924_vm8, %v2921_v53  ;;  %2680 = vmatpush3.bf16.msra.mxu1 %v2776_v6 }
 0xeb8   :  { %2681 = vmatprep.subr.bf16.mxu1 %v2921_v53 }
 0xebb   :  { %2682 = vmatpush3.bf16.msra.mxu1 %v2777_v16 }
 0xebc   :  { %2683 = vmatprep.subr.bf16.mxu1 %v2921_v53 }
 0xebf   :  { %2684 = vmatpush3.bf16.msra.mxu1 %v2778_v5 }
 0xec0   :  { %2685 = vmatprep.subr.bf16.mxu1 %v2921_v53 }
 0xec3   :  { %2686 = vmatpush3.bf16.msra.mxu1 %v2779_v44 }
 0xec4   :  { %2687 = vmatprep.subr.bf16.mxu1 %v2921_v53 }
 0xec7   :  { %2688 = vmatpush3.bf16.msra.mxu1 %v2780_v52 }
 0xec8   :  { %2689 = vmatprep.subr.bf16.mxu1 %v2921_v53 }
 0xecb   :  { %2690 = vmatpush3.bf16.msra.mxu1 %v2781_v15 }
 0xecc   :  { %2691 = vmatprep.subr.bf16.mxu1 %v2921_v53 }
 0xecf   :  { %2692 = vmatpush3.bf16.msra.mxu1 %v2782_v46 }
 0xed0   :  { %2693 = vmatprep.subr.bf16.mxu1 %v2921_v53 }
 0xed3   :  { %2694 = vmatpush3.bf16.msra.mxu1 %v2783_v50 }
 0xf76   :  { %v2257_v22 = vpop.f32.mrf.mxu1 }
 0xf77   :  { %v2258_v38 = vadd.f32 %v2257_v22, %v3858_v8  ;;  %v2773_v8 = vld [vmem:[%s4357_s12 + $0x10] sm:$0xff]  }
 0xf78   :  { %v2259_v31 = vpop.f32.mrf.mxu1  ;;  %2670 = vmatpush3.bf16.msra.mxu0 %v2773_v8 }
 0xf79   :  { %2878 = vtanh.f32 %v2258_v38  ;;  %v2260_v30 = vadd.f32 %v2259_v31, %v3862_v23  ;;  %v2774_v23 = vld [vmem:[%s4357_s12 + $0x8] sm:$0xff]   ;;  %2671 = vmatprep.subr.bf16.mxu0 %v2921_v53 }
 0xf7a   :  { %v2261_v36 = vpop.f32.mrf.mxu1 }
 0xf7b   :  { %2880 = vtanh.f32 %v2260_v30 }
 0xf7c   :  { %v2262_v55 = vpop.f32.mrf.mxu1  ;;  %2672 = vmatpush3.bf16.msra.mxu0 %v2774_v23 }
 0xf7d   :  { %2673 = vmatprep.subr.bf16.mxu0 %v2921_v53 }
 0xf80   :  { %2674 = vmatpush3.bf16.msra.mxu0 %v2775_v20 }
 0xf86   :  { %v2879_v0 = vpop.eup %2878 }
 0xf87   :  { %v2266_v57 = vadd.f32 1.0, %v2879_v0 }
 0xf88   :  { %v2881_v26 = vpop.eup %2880 }
 0xf89   :  { %v2267_v11 = vmul.f32 0.5, %v2266_v57  ;;  %v2268_v10 = vadd.f32 1.0, %v2881_v26 }
 0xf8b   :  { %v2271_v1 = vmul.f32 %v2881_v26, %v2267_v11  ;;  %v2270_v2 = vmul.f32 %v2267_v11, %v2155_v4  ;;  %v2269_v3 = vmul.f32 0.5, %v2268_v10 }
 0xf8d   :  { %2273 = vrot.lane.b32.xlu0 %v2271_v1, %s2923_s5 }
 0xfff   :  { %v2274_v39 = vpop.permute.xlu0 %2273 }
0x1000   :  { %v2276_v62 = vadd.f32 %v2274_v39, %v2270_v2 }
0x1002   :  { %2882 = vtanh.f32 %v2276_v62 }
0x100f   :  { %v2883_v18 = vpop.eup %2882 }
0x1010   :  { %v2278_v24 = vmul.f32 %v2883_v18, %v2269_v3 }
0x1012   :  { %v2279_v28 = vpack.c.bf16 %v2278_v24, %v2278_v24 }
0x1014   :  { %2296 = vrot.lane.b32.xlu1 %v2279_v28, %s2923_s5 }
0x1086   :  { %v2297_v48 = vpop.permute.xlu1 %2296 }
0x1087   :  { %2676 = vmatmul.mubr.msk.bf16.vlgmr.msra.gmra.mxu0 %vm900_vm6, %v2297_v48 }
0x1147   :  { %v2359_v56 = vpop.f32.mrf.mxu0 }
0x1148   :  { %v2360_v63 = vadd.f32 %v2563_v54, %v2359_v56 }
0x1149   :  { %v2677_v17 = vpop.f32.mrf.mxu0 }
0x114a   :  { %v2365_v21 = vmax.f32 %v2360_v63, 0.0 }
0x114b   :  { %v2362_v9 = vpop.f32.mrf.mxu0 }
0x114c   :  { %v2366_v35 = vpack.c.bf16 %v2365_v21, %v2365_v21 }
0x114d   :  { %v2678_v12 = vpop.f32.mrf.mxu0 }
0x114e   :  { %2696 = vmatmul.mubr.bf16.vlgmr.msra.gmra.mxu1 %v2366_v35 }
0x120e   :  { %v2472_v7 = vpop.f32.mrf.mxu1 }
0x120f   :  { %v2473_v13 = vadd.f32 %v2569_v34, %v2472_v7 }
0x1210   :  { %v2697_v53 = vpop.f32.mrf.mxu1 }
0x1211   :  { %2478 = vmax.xlane.f32.xlu0 %v2473_v13 }
0x1212   :  { %v2475_v49 = vpop.f32.mrf.mxu1 }
0x1214   :  { %v2698_v33 = vpop.f32.mrf.mxu1 }
0x129a   :  { %v2479_v59 = vpop.xlane.xlu0 %2478 }
0x129b   :  { %v2480_v43 = vsub.f32 %v2473_v13, %v2479_v59 }
0x129d   :  { %v2481_v51 = vmul.f32 1.442695, %v2480_v43 }
0x129f   :  { %2884 = vpow2.f32 %v2481_v51 }
0x12ac   :  { %v2885_v29 = vpop.eup %2884 }
0x12ad   :  { %2483 = vadd.xlane.f32.xlu1 %v2885_v29 }
0x1336   :  { %v2484_v61 = vpop.xlane.xlu1 %2483 }
0x1337   :  { %2886 = vrcp.f32 %v2484_v61 }
0x1344   :  { %v2887_v47 = vpop.eup %2886 }
0x1345   :  { %v2486_v32 = vmul.f32 %v2887_v47, %v2885_v29 }
0x1347   :  { %2487 = vst [vmem:[%s4361_s16] sm:$0xff] %v2486_v32 }

</bundles_post_ra>
